<compile_context>
chip_gen: v7x
topology: tpu7x:2x2x1
jax: 0.10.0
libtpu: 0.0.40
codegen_flags: <defaults>
</compile_context>

<pallas_src>
import functools

import jax
import jax.numpy as jnp
from jax import lax
from jax.experimental import pallas as pl
from jax.experimental.pallas import tpu as pltpu

EPS = 1e-6
_PATCH = 16                       # patch_size (p16 path)
_C1, _C2, _C3 = 64, 192, 384      # stage output channels of build_conv_p16


# ------------------------------ kernel body ---------------------------------

def _ln_relu(y, g, b):
    """Channel LayerNorm over the last dim + affine + ReLU (all f32)."""
    u = jnp.mean(y, axis=-1, keepdims=True)
    s = jnp.mean(y * y, axis=-1, keepdims=True) - u * u   # one-pass variance
    s = jnp.maximum(s, 0.0)
    y = (y - u) * lax.rsqrt(s + EPS)
    return jnp.maximum(y * g + b, 0.0)


def _fused_patch_embed_kernel(x_ref, w1_ref, b1_ref, g1_ref, be1_ref,
                              w2_ref, b2_ref, g2_ref, be2_ref,
                              w3_ref, b3_ref, g3_ref, be3_ref,
                              w4_ref, b4_ref, o_ref):
    """x_ref: (16, TP, 4*4*Cin) -- axis0 = pos = (r2*2 + c2)*4 + (dr*2 + dc).

    q = r2*2 + c2 is the stage-3 window position, p = dr*2 + dc the stage-2
    window position; the stage-1 cell is (r1, c1) = (2*r2 + dr, 2*c2 + dc).
    o_ref: (TP, embed_dim), one row per patch.
    """
    f32 = jnp.float32
    mxu = w1_ref.dtype                        # MXU input dtype (f32 or bf16)
    w1 = w1_ref[...]
    b1, g1, be1 = b1_ref[...], g1_ref[...], be1_ref[...]
    w2 = w2_ref[...]
    b2, g2, be2 = b2_ref[...], g2_ref[...], be2_ref[...]
    w3 = w3_ref[...]
    b3, g3, be3 = b3_ref[...], g3_ref[...], be3_ref[...]

    y2_parts = []
    for q in range(4):                        # stage-3 window position (q-major)
        # ---- stage 1: conv4x4/s4 (+bias) + LN + ReLU for the 4 cells of q --
        y1_parts = []
        for p in range(4):                    # stage-2 window position
            t = jnp.dot(x_ref[q * 4 + p].astype(mxu), w1,
                        preferred_element_type=f32) + b1
            y1_parts.append(_ln_relu(t, g1, be1))          # (TP, 64) f32
        # ---- stage 2: window sum folded into K -> single K=256 matmul ------
        y1cat = jnp.concatenate(y1_parts, axis=-1)         # (TP, 256) f32
        t2 = jnp.dot(y1cat.astype(mxu), w2, preferred_element_type=f32) + b2
        y2_parts.append(_ln_relu(t2, g2, be2))             # (TP, 192) f32

    # ---- stage 3: window sum folded into K -> single K=768 matmul ----------
    y2cat = jnp.concatenate(y2_parts, axis=-1)             # (TP, 768) f32
    t3 = jnp.dot(y2cat.astype(mxu), w3, preferred_element_type=f32) + b3
    y3 = _ln_relu(t3, g3, be3)                             # (TP, 384) f32

    # ---- stage 4: 1x1 projection conv ---------------------------------------
    out = jnp.dot(y3.astype(mxu), w4_ref[...], preferred_element_type=f32)
    o_ref[...] = (out + b4_ref[...]).astype(o_ref.dtype)


# ---------------------------- parameter prep --------------------------------

def init_params(key, num_channels, embed_dim):
    """build_conv_p16 parameters in PyTorch layout (OIHW convs + LN vectors)."""
    specs = [  # (cin, cout, k, has_ln)
        (num_channels, _C1, 4, True),
        (_C1, _C2, 2, True),
        (_C2, _C3, 2, True),
        (_C3, embed_dim, 1, False),
    ]
    params = []
    for cin, cout, k, has_ln in specs:
        key, kw_, kb_, kg_, kbeta_ = jax.random.split(key, 5)
        fan_in = cin * k * k
        bound = 1.0 / jnp.sqrt(fan_in)
        w = jax.random.uniform(kw_, (cout, cin, k, k), jnp.float32, -bound, bound)
        b = jax.random.uniform(kb_, (cout,), jnp.float32, -bound, bound)
        # Randomize LN affine so the scale/shift path is actually exercised.
        g = 1.0 + 0.1 * jax.random.normal(kg_, (cout,), jnp.float32)
        beta = 0.1 * jax.random.normal(kbeta_, (cout,), jnp.float32)
        params.append(dict(w=w, b=b, g=g, beta=beta, k=k, has_ln=has_ln))
    return params


def prep_params(params, mxu_dtype=jnp.bfloat16):
    """One-time conversion to the kernel layout (hoisted out of the forward).

    Every conv becomes ONE matmul matrix of shape (kh*kw*cin, cout) with rows
    ordered (kh, kw, cin).  For the 2x2/s2 convs that ordering is exactly the
    window-concat layout (row index = p*cin + c, p = dh*2 + dw), so stages 2
    and 3 each run as a single K=256 / K=768 matmul against a lane-concatenated
    LHS.  Weights are stored in `mxu_dtype` (bf16 recommended on v5e/v6e/v7x);
    bias / LN params stay f32.
    """
    def mat(w):       # OIHW -> (kh*kw*cin, cout), flatten order (kh, kw, cin)
        return jnp.transpose(w, (2, 3, 1, 0)).reshape(-1, w.shape[0]).astype(mxu_dtype)

    def row(v):
        return v.reshape(1, -1).astype(jnp.float32)

    p1, p2, p3, p4 = params
    return dict(
        w1=mat(p1["w"]), b1=row(p1["b"]), g1=row(p1["g"]), be1=row(p1["beta"]),
        w2=mat(p2["w"]), b2=row(p2["b"]), g2=row(p2["g"]), be2=row(p2["beta"]),
        w3=mat(p3["w"]), b3=row(p3["b"]), g3=row(p3["g"]), be3=row(p3["beta"]),
        w4=mat(p4["w"]), b4=row(p4["b"]),
    )


# ------------------------------- forward ------------------------------------

@functools.partial(jax.jit, static_argnames=("tile_patches", "pixel_dtype",
                                              "out_dtype", "vmem_limit_bytes"))
def patch_embeddings_forward(pixel_values_nchw, prepped, tile_patches=None,
                             pixel_dtype=None, out_dtype=jnp.float32,
                             vmem_limit_bytes=32 * 1024 * 1024):
    """pixel_values: (B, C, H, W) -> (B, num_patches, embed_dim)."""
    b, c, h, w = pixel_values_nchw.shape
    assert h % _PATCH == 0 and w % _PATCH == 0
    ph, pw = h // _PATCH, w // _PATCH
    n = b * ph * pw
    k1 = 4 * 4 * c
    e = prepped["w4"].shape[1]

    # --- pixels -> (16, num_patches, 4*4*C), q-major position ordering -------
    # Within a patch, H decomposes as (r2, dr, kh) = (2, 2, 4); same for W.
    x = jnp.transpose(pixel_values_nchw, (0, 2, 3, 1))          # NHWC
    x = x.reshape(b, ph, 2, 2, 4, pw, 2, 2, 4, c)
    #   axes:      0  1  r2 dr kh  5  c2 dc kw  9
    x = jnp.transpose(x, (2, 6, 3, 7, 0, 1, 5, 4, 8, 9))        # r2 c2 dr dc | b ph pw | kh kw c
    x = x.reshape(16, n, k1)
    if pixel_dtype is not None:              # explicit opt-in pixel quantization
        x = x.astype(pixel_dtype)

    # --- tile over patches ----------------------------------------------------
    tp = tile_patches if tile_patches is not None else (n if n <= 512 else 512)
    grid = (pl.cdiv(n, tp),)

    weight_order = ("w1", "b1", "g1", "be1", "w2", "b2", "g2", "be2",
                    "w3", "b3", "g3", "be3", "w4", "b4")
    weight_args = [prepped[k] for k in weight_order]

    def const_spec(a):                       # weights: DMA'd once, VMEM-resident
        return pl.BlockSpec(a.shape, lambda i, _nd=a.ndim: (0,) * _nd)

    flops = 2 * n * (16 * k1 * _C1 + 16 * _C1 * _C2 + 4 * _C2 * _C3 + _C3 * e)
    bytes_accessed = int(
        x.size * x.dtype.itemsize + n * e * jnp.dtype(out_dtype).itemsize
        + sum(int(v.size) * v.dtype.itemsize for v in weight_args))
    transcendentals = n * (16 + 4 + 1)       # one rsqrt per LayerNorm row

    out2d = pl.pallas_call(
        _fused_patch_embed_kernel,
        out_shape=jax.ShapeDtypeStruct((n, e), out_dtype),
        grid=grid,
        in_specs=[pl.BlockSpec((16, tp, k1), lambda i: (0, i, 0))]
                 + [const_spec(a) for a in weight_args],
        out_specs=pl.BlockSpec((tp, e), lambda i: (i, 0)),
        compiler_params=pltpu.CompilerParams(
            dimension_semantics=("parallel",),     # shardable across v7x's 2 TCs
            vmem_limit_bytes=vmem_limit_bytes),
        cost_estimate=pl.CostEstimate(flops=flops,
                                      transcendentals=transcendentals,
                                      bytes_accessed=bytes_accessed),
    )(x, *weight_args)

    # Row order is (b, ph, pw) == torch projection(x).flatten(2).transpose(1, 2).
    return out2d.reshape(b, ph * pw, e)


# --------------------------- pure-JAX reference ------------------------------

def reference_forward(pixel_values_nchw, params):
    x = pixel_values_nchw
    for p in params:
        k = p["k"]
        x = lax.conv_general_dilated(
            x, p["w"], window_strides=(k, k), padding="VALID",
            dimension_numbers=("NCHW", "OIHW", "NCHW"))
        x = x + p["b"][None, :, None, None]
        if p["has_ln"]:
            u = x.mean(1, keepdims=True)
            s = ((x - u) ** 2).mean(1, keepdims=True)
            x = (x - u) / jnp.sqrt(s + EPS)
            x = p["g"][None, :, None, None] * x + p["beta"][None, :, None, None]
            x = jnp.maximum(x, 0.0)
    b, c = x.shape[0], x.shape[1]
    return x.reshape(b, c, -1).transpose(0, 2, 1)


# ---------------------------------- main -------------------------------------

if __name__ == "__main__":
    # Small shapes consistent with the module (patch_size=16 path):
    # image 32x32 -> (32/16)^2 = 4 patches per image.
    B, C, H, W = 2, 3, 32, 32
    EMBED_DIM = 128

    key = jax.random.PRNGKey(0)
    k_x, k_p = jax.random.split(key)
    pixel_values = jax.random.normal(k_x, (B, C, H, W), jnp.float32)
    params = init_params(k_p, C, EMBED_DIM)

    ref = jax.block_until_ready(reference_forward(pixel_values, params))

    # f32 MXU path: strict validation against the conv reference.
    out = patch_embeddings_forward(pixel_values, prep_params(params, jnp.float32))
    out = jax.block_until_ready(out)
    assert out.shape == (B, (H // _PATCH) * (W // _PATCH), EMBED_DIM), out.shape
    err_f32 = float(jnp.max(jnp.abs(out - ref)))
    assert jnp.allclose(out, ref, atol=2e-4, rtol=2e-4), err_f32

    # bf16 MXU-input path (recommended default on v5e/v6e/v7x), f32 accumulation,
    # with explicit opt-in bf16 pixel quantization; looser tolerance vs f32 ref.
    out_bf16 = patch_embeddings_forward(
        pixel_values, prep_params(params, jnp.bfloat16), pixel_dtype=jnp.bfloat16)
    out_bf16 = jax.block_until_ready(out_bf16)
    err_bf16 = float(jnp.max(jnp.abs(out_bf16 - ref)))
    assert err_bf16 < 0.25, err_bf16

    print("KERNEL_OK")
</pallas_src>

<mosaic_0001>
module attributes {stable_mosaic.version = 11 : i64} {
  func.func @_fused_patch_embed_kernel(%arg0: i32, %arg1: memref<16x8x48xf32, #tpu.memory_space<vmem>>, %arg2: memref<48x64xf32, #tpu.memory_space<vmem>>, %arg3: memref<1x64xf32, #tpu.memory_space<vmem>>, %arg4: memref<1x64xf32, #tpu.memory_space<vmem>>, %arg5: memref<1x64xf32, #tpu.memory_space<vmem>>, %arg6: memref<256x192xf32, #tpu.memory_space<vmem>>, %arg7: memref<1x192xf32, #tpu.memory_space<vmem>>, %arg8: memref<1x192xf32, #tpu.memory_space<vmem>>, %arg9: memref<1x192xf32, #tpu.memory_space<vmem>>, %arg10: memref<768x384xf32, #tpu.memory_space<vmem>>, %arg11: memref<1x384xf32, #tpu.memory_space<vmem>>, %arg12: memref<1x384xf32, #tpu.memory_space<vmem>>, %arg13: memref<1x384xf32, #tpu.memory_space<vmem>>, %arg14: memref<384x128xf32, #tpu.memory_space<vmem>>, %arg15: memref<1x128xf32, #tpu.memory_space<vmem>>, %arg16: memref<8x128xf32, #tpu.memory_space<vmem>>) attributes {dimension_semantics = [#tpu.dimension_semantics<parallel>], iteration_bounds = array<i64: 1>, scalar_prefetch = 0 : i64, scratch_operands = 0 : i64, tpu.core_type = #tpu.core_type<tc>, window_params = [{transform_indices = @transform_0, window_bounds = array<i64: 16, 8, 48>}, {pipeline_mode = #tpu.pipeline_mode<synchronous>, transform_indices = @transform_1, window_bounds = array<i64: 48, 64>}, {pipeline_mode = #tpu.pipeline_mode<synchronous>, transform_indices = @transform_2, window_bounds = array<i64: 1, 64>}, {pipeline_mode = #tpu.pipeline_mode<synchronous>, transform_indices = @transform_3, window_bounds = array<i64: 1, 64>}, {pipeline_mode = #tpu.pipeline_mode<synchronous>, transform_indices = @transform_4, window_bounds = array<i64: 1, 64>}, {pipeline_mode = #tpu.pipeline_mode<synchronous>, transform_indices = @transform_5, window_bounds = array<i64: 256, 192>}, {pipeline_mode = #tpu.pipeline_mode<synchronous>, transform_indices = @transform_6, window_bounds = array<i64: 1, 192>}, {pipeline_mode = #tpu.pipeline_mode<synchronous>, transform_indices = @transform_7, window_bounds = array<i64: 1, 192>}, {pipeline_mode = #tpu.pipeline_mode<synchronous>, transform_indices = @transform_8, window_bounds = array<i64: 1, 192>}, {pipeline_mode = #tpu.pipeline_mode<synchronous>, transform_indices = @transform_9, window_bounds = array<i64: 768, 384>}, {pipeline_mode = #tpu.pipeline_mode<synchronous>, transform_indices = @transform_10, window_bounds = array<i64: 1, 384>}, {pipeline_mode = #tpu.pipeline_mode<synchronous>, transform_indices = @transform_11, window_bounds = array<i64: 1, 384>}, {pipeline_mode = #tpu.pipeline_mode<synchronous>, transform_indices = @transform_12, window_bounds = array<i64: 1, 384>}, {pipeline_mode = #tpu.pipeline_mode<synchronous>, transform_indices = @transform_13, window_bounds = array<i64: 384, 128>}, {pipeline_mode = #tpu.pipeline_mode<synchronous>, transform_indices = @transform_14, window_bounds = array<i64: 1, 128>}, {transform_indices = @transform_15, window_bounds = array<i64: 8, 128>}]} {
    %c0 = arith.constant 0 : index
    %c0_0 = arith.constant 0 : index
    %0 = vector.load %arg2[%c0, %c0_0] : memref<48x64xf32, #tpu.memory_space<vmem>>, vector<48x64xf32>
    %c0_1 = arith.constant 0 : index
    %c0_2 = arith.constant 0 : index
    %1 = vector.load %arg3[%c0_1, %c0_2] : memref<1x64xf32, #tpu.memory_space<vmem>>, vector<1x64xf32>
    %c0_3 = arith.constant 0 : index
    %c0_4 = arith.constant 0 : index
    %2 = vector.load %arg4[%c0_3, %c0_4] : memref<1x64xf32, #tpu.memory_space<vmem>>, vector<1x64xf32>
    %c0_5 = arith.constant 0 : index
    %c0_6 = arith.constant 0 : index
    %3 = vector.load %arg5[%c0_5, %c0_6] : memref<1x64xf32, #tpu.memory_space<vmem>>, vector<1x64xf32>
    %c0_7 = arith.constant 0 : index
    %c0_8 = arith.constant 0 : index
    %4 = vector.load %arg6[%c0_7, %c0_8] : memref<256x192xf32, #tpu.memory_space<vmem>>, vector<256x192xf32>
    %c0_9 = arith.constant 0 : index
    %c0_10 = arith.constant 0 : index
    %5 = vector.load %arg7[%c0_9, %c0_10] : memref<1x192xf32, #tpu.memory_space<vmem>>, vector<1x192xf32>
    %c0_11 = arith.constant 0 : index
    %c0_12 = arith.constant 0 : index
    %6 = vector.load %arg8[%c0_11, %c0_12] : memref<1x192xf32, #tpu.memory_space<vmem>>, vector<1x192xf32>
    %c0_13 = arith.constant 0 : index
    %c0_14 = arith.constant 0 : index
    %7 = vector.load %arg9[%c0_13, %c0_14] : memref<1x192xf32, #tpu.memory_space<vmem>>, vector<1x192xf32>
    %c0_15 = arith.constant 0 : index
    %c0_16 = arith.constant 0 : index
    %8 = vector.load %arg10[%c0_15, %c0_16] : memref<768x384xf32, #tpu.memory_space<vmem>>, vector<768x384xf32>
    %c0_17 = arith.constant 0 : index
    %c0_18 = arith.constant 0 : index
    %9 = vector.load %arg11[%c0_17, %c0_18] : memref<1x384xf32, #tpu.memory_space<vmem>>, vector<1x384xf32>
    %c0_19 = arith.constant 0 : index
    %c0_20 = arith.constant 0 : index
    %10 = vector.load %arg12[%c0_19, %c0_20] : memref<1x384xf32, #tpu.memory_space<vmem>>, vector<1x384xf32>
    %c0_21 = arith.constant 0 : index
    %c0_22 = arith.constant 0 : index
    %11 = vector.load %arg13[%c0_21, %c0_22] : memref<1x384xf32, #tpu.memory_space<vmem>>, vector<1x384xf32>
    %c0_23 = arith.constant 0 : index
    %c0_24 = arith.constant 0 : index
    %c0_25 = arith.constant 0 : index
    %12 = vector.load %arg1[%c0_23, %c0_24, %c0_25] : memref<16x8x48xf32, #tpu.memory_space<vmem>>, vector<1x8x48xf32>
    %13 = vector.shape_cast %12 : vector<1x8x48xf32> to vector<8x48xf32>
    %cst = arith.constant dense<0.000000e+00> : vector<8x64xf32>
    %14 = tpu.matmul %13, %0, %cst {dimension_numbers = #tpu.dot_dimension_numbers<[1], [0], [0], [1], [0, 0, 1, 1], [], []>} : vector<8x48xf32>, vector<48x64xf32>, vector<8x64xf32> -> vector<8x64xf32>
    %15 = vector.broadcast %1 : vector<1x64xf32> to vector<8x64xf32>
    %16 = arith.addf %14, %15 : vector<8x64xf32>
    %cst_26 = arith.constant dense<0.000000e+00> : vector<8xf32>
    %17 = vector.multi_reduction <add>, %16, %cst_26 [1] : vector<8x64xf32> to vector<8xf32>
    %18 = vector.shape_cast %17 : vector<8xf32> to vector<8x1xf32>
    %cst_27 = arith.constant 6.400000e+01 : f32
    %19 = vector.broadcast %cst_27 : f32 to vector<8x1xf32>
    %20 = arith.divf %18, %19 : vector<8x1xf32>
    %21 = arith.mulf %16, %16 : vector<8x64xf32>
    %cst_28 = arith.constant dense<0.000000e+00> : vector<8xf32>
    %22 = vector.multi_reduction <add>, %21, %cst_28 [1] : vector<8x64xf32> to vector<8xf32>
    %23 = vector.shape_cast %22 : vector<8xf32> to vector<8x1xf32>
    %cst_29 = arith.constant 6.400000e+01 : f32
    %24 = vector.broadcast %cst_29 : f32 to vector<8x1xf32>
    %25 = arith.divf %23, %24 : vector<8x1xf32>
    %26 = arith.mulf %20, %20 : vector<8x1xf32>
    %27 = arith.subf %25, %26 : vector<8x1xf32>
    %cst_30 = arith.constant 0.000000e+00 : f32
    %28 = vector.broadcast %cst_30 : f32 to vector<8x1xf32>
    %29 = arith.maximumf %27, %28 : vector<8x1xf32>
    %30 = vector.broadcast %20 : vector<8x1xf32> to vector<8x64xf32>
    %31 = arith.subf %16, %30 : vector<8x64xf32>
    %cst_31 = arith.constant 9.99999997E-7 : f32
    %32 = vector.broadcast %cst_31 : f32 to vector<8x1xf32>
    %33 = arith.addf %29, %32 : vector<8x1xf32>
    %34 = math.rsqrt %33 : vector<8x1xf32>
    %35 = vector.broadcast %34 : vector<8x1xf32> to vector<8x64xf32>
    %36 = arith.mulf %31, %35 : vector<8x64xf32>
    %37 = vector.broadcast %2 : vector<1x64xf32> to vector<8x64xf32>
    %38 = arith.mulf %36, %37 : vector<8x64xf32>
    %39 = vector.broadcast %3 : vector<1x64xf32> to vector<8x64xf32>
    %40 = arith.addf %38, %39 : vector<8x64xf32>
    %cst_32 = arith.constant 0.000000e+00 : f32
    %41 = vector.broadcast %cst_32 : f32 to vector<8x64xf32>
    %42 = arith.maximumf %40, %41 : vector<8x64xf32>
    %c1 = arith.constant 1 : index
    %c0_33 = arith.constant 0 : index
    %c0_34 = arith.constant 0 : index
    %43 = vector.load %arg1[%c1, %c0_33, %c0_34] : memref<16x8x48xf32, #tpu.memory_space<vmem>>, vector<1x8x48xf32>
    %44 = vector.shape_cast %43 : vector<1x8x48xf32> to vector<8x48xf32>
    %cst_35 = arith.constant dense<0.000000e+00> : vector<8x64xf32>
    %45 = tpu.matmul %44, %0, %cst_35 {dimension_numbers = #tpu.dot_dimension_numbers<[1], [0], [0], [1], [0, 0, 1, 1], [], []>} : vector<8x48xf32>, vector<48x64xf32>, vector<8x64xf32> -> vector<8x64xf32>
    %46 = vector.broadcast %1 : vector<1x64xf32> to vector<8x64xf32>
    %47 = arith.addf %45, %46 : vector<8x64xf32>
    %cst_36 = arith.constant dense<0.000000e+00> : vector<8xf32>
    %48 = vector.multi_reduction <add>, %47, %cst_36 [1] : vector<8x64xf32> to vector<8xf32>
    %49 = vector.shape_cast %48 : vector<8xf32> to vector<8x1xf32>
    %cst_37 = arith.constant 6.400000e+01 : f32
    %50 = vector.broadcast %cst_37 : f32 to vector<8x1xf32>
    %51 = arith.divf %49, %50 : vector<8x1xf32>
    %52 = arith.mulf %47, %47 : vector<8x64xf32>
    %cst_38 = arith.constant dense<0.000000e+00> : vector<8xf32>
    %53 = vector.multi_reduction <add>, %52, %cst_38 [1] : vector<8x64xf32> to vector<8xf32>
    %54 = vector.shape_cast %53 : vector<8xf32> to vector<8x1xf32>
    %cst_39 = arith.constant 6.400000e+01 : f32
    %55 = vector.broadcast %cst_39 : f32 to vector<8x1xf32>
    %56 = arith.divf %54, %55 : vector<8x1xf32>
    %57 = arith.mulf %51, %51 : vector<8x1xf32>
    %58 = arith.subf %56, %57 : vector<8x1xf32>
    %cst_40 = arith.constant 0.000000e+00 : f32
    %59 = vector.broadcast %cst_40 : f32 to vector<8x1xf32>
    %60 = arith.maximumf %58, %59 : vector<8x1xf32>
    %61 = vector.broadcast %51 : vector<8x1xf32> to vector<8x64xf32>
    %62 = arith.subf %47, %61 : vector<8x64xf32>
    %cst_41 = arith.constant 9.99999997E-7 : f32
    %63 = vector.broadcast %cst_41 : f32 to vector<8x1xf32>
    %64 = arith.addf %60, %63 : vector<8x1xf32>
    %65 = math.rsqrt %64 : vector<8x1xf32>
    %66 = vector.broadcast %65 : vector<8x1xf32> to vector<8x64xf32>
    %67 = arith.mulf %62, %66 : vector<8x64xf32>
    %68 = vector.broadcast %2 : vector<1x64xf32> to vector<8x64xf32>
    %69 = arith.mulf %67, %68 : vector<8x64xf32>
    %70 = vector.broadcast %3 : vector<1x64xf32> to vector<8x64xf32>
    %71 = arith.addf %69, %70 : vector<8x64xf32>
    %cst_42 = arith.constant 0.000000e+00 : f32
    %72 = vector.broadcast %cst_42 : f32 to vector<8x64xf32>
    %73 = arith.maximumf %71, %72 : vector<8x64xf32>
    %c2 = arith.constant 2 : index
    %c0_43 = arith.constant 0 : index
    %c0_44 = arith.constant 0 : index
    %74 = vector.load %arg1[%c2, %c0_43, %c0_44] : memref<16x8x48xf32, #tpu.memory_space<vmem>>, vector<1x8x48xf32>
    %75 = vector.shape_cast %74 : vector<1x8x48xf32> to vector<8x48xf32>
    %cst_45 = arith.constant dense<0.000000e+00> : vector<8x64xf32>
    %76 = tpu.matmul %75, %0, %cst_45 {dimension_numbers = #tpu.dot_dimension_numbers<[1], [0], [0], [1], [0, 0, 1, 1], [], []>} : vector<8x48xf32>, vector<48x64xf32>, vector<8x64xf32> -> vector<8x64xf32>
    %77 = vector.broadcast %1 : vector<1x64xf32> to vector<8x64xf32>
    %78 = arith.addf %76, %77 : vector<8x64xf32>
    %cst_46 = arith.constant dense<0.000000e+00> : vector<8xf32>
    %79 = vector.multi_reduction <add>, %78, %cst_46 [1] : vector<8x64xf32> to vector<8xf32>
    %80 = vector.shape_cast %79 : vector<8xf32> to vector<8x1xf32>
    %cst_47 = arith.constant 6.400000e+01 : f32
    %81 = vector.broadcast %cst_47 : f32 to vector<8x1xf32>
    %82 = arith.divf %80, %81 : vector<8x1xf32>
    %83 = arith.mulf %78, %78 : vector<8x64xf32>
    %cst_48 = arith.constant dense<0.000000e+00> : vector<8xf32>
    %84 = vector.multi_reduction <add>, %83, %cst_48 [1] : vector<8x64xf32> to vector<8xf32>
    %85 = vector.shape_cast %84 : vector<8xf32> to vector<8x1xf32>
    %cst_49 = arith.constant 6.400000e+01 : f32
    %86 = vector.broadcast %cst_49 : f32 to vector<8x1xf32>
    %87 = arith.divf %85, %86 : vector<8x1xf32>
    %88 = arith.mulf %82, %82 : vector<8x1xf32>
    %89 = arith.subf %87, %88 : vector<8x1xf32>
    %cst_50 = arith.constant 0.000000e+00 : f32
    %90 = vector.broadcast %cst_50 : f32 to vector<8x1xf32>
    %91 = arith.maximumf %89, %90 : vector<8x1xf32>
    %92 = vector.broadcast %82 : vector<8x1xf32> to vector<8x64xf32>
    %93 = arith.subf %78, %92 : vector<8x64xf32>
    %cst_51 = arith.constant 9.99999997E-7 : f32
    %94 = vector.broadcast %cst_51 : f32 to vector<8x1xf32>
    %95 = arith.addf %91, %94 : vector<8x1xf32>
    %96 = math.rsqrt %95 : vector<8x1xf32>
    %97 = vector.broadcast %96 : vector<8x1xf32> to vector<8x64xf32>
    %98 = arith.mulf %93, %97 : vector<8x64xf32>
    %99 = vector.broadcast %2 : vector<1x64xf32> to vector<8x64xf32>
    %100 = arith.mulf %98, %99 : vector<8x64xf32>
    %101 = vector.broadcast %3 : vector<1x64xf32> to vector<8x64xf32>
    %102 = arith.addf %100, %101 : vector<8x64xf32>
    %cst_52 = arith.constant 0.000000e+00 : f32
    %103 = vector.broadcast %cst_52 : f32 to vector<8x64xf32>
    %104 = arith.maximumf %102, %103 : vector<8x64xf32>
    %c3 = arith.constant 3 : index
    %c0_53 = arith.constant 0 : index
    %c0_54 = arith.constant 0 : index
    %105 = vector.load %arg1[%c3, %c0_53, %c0_54] : memref<16x8x48xf32, #tpu.memory_space<vmem>>, vector<1x8x48xf32>
    %106 = vector.shape_cast %105 : vector<1x8x48xf32> to vector<8x48xf32>
    %cst_55 = arith.constant dense<0.000000e+00> : vector<8x64xf32>
    %107 = tpu.matmul %106, %0, %cst_55 {dimension_numbers = #tpu.dot_dimension_numbers<[1], [0], [0], [1], [0, 0, 1, 1], [], []>} : vector<8x48xf32>, vector<48x64xf32>, vector<8x64xf32> -> vector<8x64xf32>
    %108 = vector.broadcast %1 : vector<1x64xf32> to vector<8x64xf32>
    %109 = arith.addf %107, %108 : vector<8x64xf32>
    %cst_56 = arith.constant dense<0.000000e+00> : vector<8xf32>
    %110 = vector.multi_reduction <add>, %109, %cst_56 [1] : vector<8x64xf32> to vector<8xf32>
    %111 = vector.shape_cast %110 : vector<8xf32> to vector<8x1xf32>
    %cst_57 = arith.constant 6.400000e+01 : f32
    %112 = vector.broadcast %cst_57 : f32 to vector<8x1xf32>
    %113 = arith.divf %111, %112 : vector<8x1xf32>
    %114 = arith.mulf %109, %109 : vector<8x64xf32>
    %cst_58 = arith.constant dense<0.000000e+00> : vector<8xf32>
    %115 = vector.multi_reduction <add>, %114, %cst_58 [1] : vector<8x64xf32> to vector<8xf32>
    %116 = vector.shape_cast %115 : vector<8xf32> to vector<8x1xf32>
    %cst_59 = arith.constant 6.400000e+01 : f32
    %117 = vector.broadcast %cst_59 : f32 to vector<8x1xf32>
    %118 = arith.divf %116, %117 : vector<8x1xf32>
    %119 = arith.mulf %113, %113 : vector<8x1xf32>
    %120 = arith.subf %118, %119 : vector<8x1xf32>
    %cst_60 = arith.constant 0.000000e+00 : f32
    %121 = vector.broadcast %cst_60 : f32 to vector<8x1xf32>
    %122 = arith.maximumf %120, %121 : vector<8x1xf32>
    %123 = vector.broadcast %113 : vector<8x1xf32> to vector<8x64xf32>
    %124 = arith.subf %109, %123 : vector<8x64xf32>
    %cst_61 = arith.constant 9.99999997E-7 : f32
    %125 = vector.broadcast %cst_61 : f32 to vector<8x1xf32>
    %126 = arith.addf %122, %125 : vector<8x1xf32>
    %127 = math.rsqrt %126 : vector<8x1xf32>
    %128 = vector.broadcast %127 : vector<8x1xf32> to vector<8x64xf32>
    %129 = arith.mulf %124, %128 : vector<8x64xf32>
    %130 = vector.broadcast %2 : vector<1x64xf32> to vector<8x64xf32>
    %131 = arith.mulf %129, %130 : vector<8x64xf32>
    %132 = vector.broadcast %3 : vector<1x64xf32> to vector<8x64xf32>
    %133 = arith.addf %131, %132 : vector<8x64xf32>
    %cst_62 = arith.constant 0.000000e+00 : f32
    %134 = vector.broadcast %cst_62 : f32 to vector<8x64xf32>
    %135 = arith.maximumf %133, %134 : vector<8x64xf32>
    %136 = tpu.concatenate %42, %73, %104, %135 in 1 : vector<8x64xf32>, vector<8x64xf32>, vector<8x64xf32>, vector<8x64xf32> -> vector<8x256xf32>
    %cst_63 = arith.constant dense<0.000000e+00> : vector<8x192xf32>
    %137 = tpu.matmul %136, %4, %cst_63 {dimension_numbers = #tpu.dot_dimension_numbers<[1], [0], [0], [1], [0, 0, 1, 1], [], []>} : vector<8x256xf32>, vector<256x192xf32>, vector<8x192xf32> -> vector<8x192xf32>
    %138 = vector.broadcast %5 : vector<1x192xf32> to vector<8x192xf32>
    %139 = arith.addf %137, %138 : vector<8x192xf32>
    %cst_64 = arith.constant dense<0.000000e+00> : vector<8xf32>
    %140 = vector.multi_reduction <add>, %139, %cst_64 [1] : vector<8x192xf32> to vector<8xf32>
    %141 = vector.shape_cast %140 : vector<8xf32> to vector<8x1xf32>
    %cst_65 = arith.constant 1.920000e+02 : f32
    %142 = vector.broadcast %cst_65 : f32 to vector<8x1xf32>
    %143 = arith.divf %141, %142 : vector<8x1xf32>
    %144 = arith.mulf %139, %139 : vector<8x192xf32>
    %cst_66 = arith.constant dense<0.000000e+00> : vector<8xf32>
    %145 = vector.multi_reduction <add>, %144, %cst_66 [1] : vector<8x192xf32> to vector<8xf32>
    %146 = vector.shape_cast %145 : vector<8xf32> to vector<8x1xf32>
    %cst_67 = arith.constant 1.920000e+02 : f32
    %147 = vector.broadcast %cst_67 : f32 to vector<8x1xf32>
    %148 = arith.divf %146, %147 : vector<8x1xf32>
    %149 = arith.mulf %143, %143 : vector<8x1xf32>
    %150 = arith.subf %148, %149 : vector<8x1xf32>
    %cst_68 = arith.constant 0.000000e+00 : f32
    %151 = vector.broadcast %cst_68 : f32 to vector<8x1xf32>
    %152 = arith.maximumf %150, %151 : vector<8x1xf32>
    %153 = vector.broadcast %143 : vector<8x1xf32> to vector<8x192xf32>
    %154 = arith.subf %139, %153 : vector<8x192xf32>
    %cst_69 = arith.constant 9.99999997E-7 : f32
    %155 = vector.broadcast %cst_69 : f32 to vector<8x1xf32>
    %156 = arith.addf %152, %155 : vector<8x1xf32>
    %157 = math.rsqrt %156 : vector<8x1xf32>
    %158 = vector.broadcast %157 : vector<8x1xf32> to vector<8x192xf32>
    %159 = arith.mulf %154, %158 : vector<8x192xf32>
    %160 = vector.broadcast %6 : vector<1x192xf32> to vector<8x192xf32>
    %161 = arith.mulf %159, %160 : vector<8x192xf32>
    %162 = vector.broadcast %7 : vector<1x192xf32> to vector<8x192xf32>
    %163 = arith.addf %161, %162 : vector<8x192xf32>
    %cst_70 = arith.constant 0.000000e+00 : f32
    %164 = vector.broadcast %cst_70 : f32 to vector<8x192xf32>
    %165 = arith.maximumf %163, %164 : vector<8x192xf32>
    %c4 = arith.constant 4 : index
    %c0_71 = arith.constant 0 : index
    %c0_72 = arith.constant 0 : index
    %166 = vector.load %arg1[%c4, %c0_71, %c0_72] : memref<16x8x48xf32, #tpu.memory_space<vmem>>, vector<1x8x48xf32>
    %167 = vector.shape_cast %166 : vector<1x8x48xf32> to vector<8x48xf32>
    %cst_73 = arith.constant dense<0.000000e+00> : vector<8x64xf32>
    %168 = tpu.matmul %167, %0, %cst_73 {dimension_numbers = #tpu.dot_dimension_numbers<[1], [0], [0], [1], [0, 0, 1, 1], [], []>} : vector<8x48xf32>, vector<48x64xf32>, vector<8x64xf32> -> vector<8x64xf32>
    %169 = vector.broadcast %1 : vector<1x64xf32> to vector<8x64xf32>
    %170 = arith.addf %168, %169 : vector<8x64xf32>
    %cst_74 = arith.constant dense<0.000000e+00> : vector<8xf32>
    %171 = vector.multi_reduction <add>, %170, %cst_74 [1] : vector<8x64xf32> to vector<8xf32>
    %172 = vector.shape_cast %171 : vector<8xf32> to vector<8x1xf32>
    %cst_75 = arith.constant 6.400000e+01 : f32
    %173 = vector.broadcast %cst_75 : f32 to vector<8x1xf32>
    %174 = arith.divf %172, %173 : vector<8x1xf32>
    %175 = arith.mulf %170, %170 : vector<8x64xf32>
    %cst_76 = arith.constant dense<0.000000e+00> : vector<8xf32>
    %176 = vector.multi_reduction <add>, %175, %cst_76 [1] : vector<8x64xf32> to vector<8xf32>
    %177 = vector.shape_cast %176 : vector<8xf32> to vector<8x1xf32>
    %cst_77 = arith.constant 6.400000e+01 : f32
    %178 = vector.broadcast %cst_77 : f32 to vector<8x1xf32>
    %179 = arith.divf %177, %178 : vector<8x1xf32>
    %180 = arith.mulf %174, %174 : vector<8x1xf32>
    %181 = arith.subf %179, %180 : vector<8x1xf32>
    %cst_78 = arith.constant 0.000000e+00 : f32
    %182 = vector.broadcast %cst_78 : f32 to vector<8x1xf32>
    %183 = arith.maximumf %181, %182 : vector<8x1xf32>
    %184 = vector.broadcast %174 : vector<8x1xf32> to vector<8x64xf32>
    %185 = arith.subf %170, %184 : vector<8x64xf32>
    %cst_79 = arith.constant 9.99999997E-7 : f32
    %186 = vector.broadcast %cst_79 : f32 to vector<8x1xf32>
    %187 = arith.addf %183, %186 : vector<8x1xf32>
    %188 = math.rsqrt %187 : vector<8x1xf32>
    %189 = vector.broadcast %188 : vector<8x1xf32> to vector<8x64xf32>
    %190 = arith.mulf %185, %189 : vector<8x64xf32>
    %191 = vector.broadcast %2 : vector<1x64xf32> to vector<8x64xf32>
    %192 = arith.mulf %190, %191 : vector<8x64xf32>
    %193 = vector.broadcast %3 : vector<1x64xf32> to vector<8x64xf32>
    %194 = arith.addf %192, %193 : vector<8x64xf32>
    %cst_80 = arith.constant 0.000000e+00 : f32
    %195 = vector.broadcast %cst_80 : f32 to vector<8x64xf32>
    %196 = arith.maximumf %194, %195 : vector<8x64xf32>
    %c5 = arith.constant 5 : index
    %c0_81 = arith.constant 0 : index
    %c0_82 = arith.constant 0 : index
    %197 = vector.load %arg1[%c5, %c0_81, %c0_82] : memref<16x8x48xf32, #tpu.memory_space<vmem>>, vector<1x8x48xf32>
    %198 = vector.shape_cast %197 : vector<1x8x48xf32> to vector<8x48xf32>
    %cst_83 = arith.constant dense<0.000000e+00> : vector<8x64xf32>
    %199 = tpu.matmul %198, %0, %cst_83 {dimension_numbers = #tpu.dot_dimension_numbers<[1], [0], [0], [1], [0, 0, 1, 1], [], []>} : vector<8x48xf32>, vector<48x64xf32>, vector<8x64xf32> -> vector<8x64xf32>
    %200 = vector.broadcast %1 : vector<1x64xf32> to vector<8x64xf32>
    %201 = arith.addf %199, %200 : vector<8x64xf32>
    %cst_84 = arith.constant dense<0.000000e+00> : vector<8xf32>
    %202 = vector.multi_reduction <add>, %201, %cst_84 [1] : vector<8x64xf32> to vector<8xf32>
    %203 = vector.shape_cast %202 : vector<8xf32> to vector<8x1xf32>
    %cst_85 = arith.constant 6.400000e+01 : f32
    %204 = vector.broadcast %cst_85 : f32 to vector<8x1xf32>
    %205 = arith.divf %203, %204 : vector<8x1xf32>
    %206 = arith.mulf %201, %201 : vector<8x64xf32>
    %cst_86 = arith.constant dense<0.000000e+00> : vector<8xf32>
    %207 = vector.multi_reduction <add>, %206, %cst_86 [1] : vector<8x64xf32> to vector<8xf32>
    %208 = vector.shape_cast %207 : vector<8xf32> to vector<8x1xf32>
    %cst_87 = arith.constant 6.400000e+01 : f32
    %209 = vector.broadcast %cst_87 : f32 to vector<8x1xf32>
    %210 = arith.divf %208, %209 : vector<8x1xf32>
    %211 = arith.mulf %205, %205 : vector<8x1xf32>
    %212 = arith.subf %210, %211 : vector<8x1xf32>
    %cst_88 = arith.constant 0.000000e+00 : f32
    %213 = vector.broadcast %cst_88 : f32 to vector<8x1xf32>
    %214 = arith.maximumf %212, %213 : vector<8x1xf32>
    %215 = vector.broadcast %205 : vector<8x1xf32> to vector<8x64xf32>
    %216 = arith.subf %201, %215 : vector<8x64xf32>
    %cst_89 = arith.constant 9.99999997E-7 : f32
    %217 = vector.broadcast %cst_89 : f32 to vector<8x1xf32>
    %218 = arith.addf %214, %217 : vector<8x1xf32>
    %219 = math.rsqrt %218 : vector<8x1xf32>
    %220 = vector.broadcast %219 : vector<8x1xf32> to vector<8x64xf32>
    %221 = arith.mulf %216, %220 : vector<8x64xf32>
    %222 = vector.broadcast %2 : vector<1x64xf32> to vector<8x64xf32>
    %223 = arith.mulf %221, %222 : vector<8x64xf32>
    %224 = vector.broadcast %3 : vector<1x64xf32> to vector<8x64xf32>
    %225 = arith.addf %223, %224 : vector<8x64xf32>
    %cst_90 = arith.constant 0.000000e+00 : f32
    %226 = vector.broadcast %cst_90 : f32 to vector<8x64xf32>
    %227 = arith.maximumf %225, %226 : vector<8x64xf32>
    %c6 = arith.constant 6 : index
    %c0_91 = arith.constant 0 : index
    %c0_92 = arith.constant 0 : index
    %228 = vector.load %arg1[%c6, %c0_91, %c0_92] : memref<16x8x48xf32, #tpu.memory_space<vmem>>, vector<1x8x48xf32>
    %229 = vector.shape_cast %228 : vector<1x8x48xf32> to vector<8x48xf32>
    %cst_93 = arith.constant dense<0.000000e+00> : vector<8x64xf32>
    %230 = tpu.matmul %229, %0, %cst_93 {dimension_numbers = #tpu.dot_dimension_numbers<[1], [0], [0], [1], [0, 0, 1, 1], [], []>} : vector<8x48xf32>, vector<48x64xf32>, vector<8x64xf32> -> vector<8x64xf32>
    %231 = vector.broadcast %1 : vector<1x64xf32> to vector<8x64xf32>
    %232 = arith.addf %230, %231 : vector<8x64xf32>
    %cst_94 = arith.constant dense<0.000000e+00> : vector<8xf32>
    %233 = vector.multi_reduction <add>, %232, %cst_94 [1] : vector<8x64xf32> to vector<8xf32>
    %234 = vector.shape_cast %233 : vector<8xf32> to vector<8x1xf32>
    %cst_95 = arith.constant 6.400000e+01 : f32
    %235 = vector.broadcast %cst_95 : f32 to vector<8x1xf32>
    %236 = arith.divf %234, %235 : vector<8x1xf32>
    %237 = arith.mulf %232, %232 : vector<8x64xf32>
    %cst_96 = arith.constant dense<0.000000e+00> : vector<8xf32>
    %238 = vector.multi_reduction <add>, %237, %cst_96 [1] : vector<8x64xf32> to vector<8xf32>
    %239 = vector.shape_cast %238 : vector<8xf32> to vector<8x1xf32>
    %cst_97 = arith.constant 6.400000e+01 : f32
    %240 = vector.broadcast %cst_97 : f32 to vector<8x1xf32>
    %241 = arith.divf %239, %240 : vector<8x1xf32>
    %242 = arith.mulf %236, %236 : vector<8x1xf32>
    %243 = arith.subf %241, %242 : vector<8x1xf32>
    %cst_98 = arith.constant 0.000000e+00 : f32
    %244 = vector.broadcast %cst_98 : f32 to vector<8x1xf32>
    %245 = arith.maximumf %243, %244 : vector<8x1xf32>
    %246 = vector.broadcast %236 : vector<8x1xf32> to vector<8x64xf32>
    %247 = arith.subf %232, %246 : vector<8x64xf32>
    %cst_99 = arith.constant 9.99999997E-7 : f32
    %248 = vector.broadcast %cst_99 : f32 to vector<8x1xf32>
    %249 = arith.addf %245, %248 : vector<8x1xf32>
    %250 = math.rsqrt %249 : vector<8x1xf32>
    %251 = vector.broadcast %250 : vector<8x1xf32> to vector<8x64xf32>
    %252 = arith.mulf %247, %251 : vector<8x64xf32>
    %253 = vector.broadcast %2 : vector<1x64xf32> to vector<8x64xf32>
    %254 = arith.mulf %252, %253 : vector<8x64xf32>
    %255 = vector.broadcast %3 : vector<1x64xf32> to vector<8x64xf32>
    %256 = arith.addf %254, %255 : vector<8x64xf32>
    %cst_100 = arith.constant 0.000000e+00 : f32
    %257 = vector.broadcast %cst_100 : f32 to vector<8x64xf32>
    %258 = arith.maximumf %256, %257 : vector<8x64xf32>
    %c7 = arith.constant 7 : index
    %c0_101 = arith.constant 0 : index
    %c0_102 = arith.constant 0 : index
    %259 = vector.load %arg1[%c7, %c0_101, %c0_102] : memref<16x8x48xf32, #tpu.memory_space<vmem>>, vector<1x8x48xf32>
    %260 = vector.shape_cast %259 : vector<1x8x48xf32> to vector<8x48xf32>
    %cst_103 = arith.constant dense<0.000000e+00> : vector<8x64xf32>
    %261 = tpu.matmul %260, %0, %cst_103 {dimension_numbers = #tpu.dot_dimension_numbers<[1], [0], [0], [1], [0, 0, 1, 1], [], []>} : vector<8x48xf32>, vector<48x64xf32>, vector<8x64xf32> -> vector<8x64xf32>
    %262 = vector.broadcast %1 : vector<1x64xf32> to vector<8x64xf32>
    %263 = arith.addf %261, %262 : vector<8x64xf32>
    %cst_104 = arith.constant dense<0.000000e+00> : vector<8xf32>
    %264 = vector.multi_reduction <add>, %263, %cst_104 [1] : vector<8x64xf32> to vector<8xf32>
    %265 = vector.shape_cast %264 : vector<8xf32> to vector<8x1xf32>
    %cst_105 = arith.constant 6.400000e+01 : f32
    %266 = vector.broadcast %cst_105 : f32 to vector<8x1xf32>
    %267 = arith.divf %265, %266 : vector<8x1xf32>
    %268 = arith.mulf %263, %263 : vector<8x64xf32>
    %cst_106 = arith.constant dense<0.000000e+00> : vector<8xf32>
    %269 = vector.multi_reduction <add>, %268, %cst_106 [1] : vector<8x64xf32> to vector<8xf32>
    %270 = vector.shape_cast %269 : vector<8xf32> to vector<8x1xf32>
    %cst_107 = arith.constant 6.400000e+01 : f32
    %271 = vector.broadcast %cst_107 : f32 to vector<8x1xf32>
    %272 = arith.divf %270, %271 : vector<8x1xf32>
    %273 = arith.mulf %267, %267 : vector<8x1xf32>
    %274 = arith.subf %272, %273 : vector<8x1xf32>
    %cst_108 = arith.constant 0.000000e+00 : f32
    %275 = vector.broadcast %cst_108 : f32 to vector<8x1xf32>
    %276 = arith.maximumf %274, %275 : vector<8x1xf32>
    %277 = vector.broadcast %267 : vector<8x1xf32> to vector<8x64xf32>
    %278 = arith.subf %263, %277 : vector<8x64xf32>
    %cst_109 = arith.constant 9.99999997E-7 : f32
    %279 = vector.broadcast %cst_109 : f32 to vector<8x1xf32>
    %280 = arith.addf %276, %279 : vector<8x1xf32>
    %281 = math.rsqrt %280 : vector<8x1xf32>
    %282 = vector.broadcast %281 : vector<8x1xf32> to vector<8x64xf32>
    %283 = arith.mulf %278, %282 : vector<8x64xf32>
    %284 = vector.broadcast %2 : vector<1x64xf32> to vector<8x64xf32>
    %285 = arith.mulf %283, %284 : vector<8x64xf32>
    %286 = vector.broadcast %3 : vector<1x64xf32> to vector<8x64xf32>
    %287 = arith.addf %285, %286 : vector<8x64xf32>
    %cst_110 = arith.constant 0.000000e+00 : f32
    %288 = vector.broadcast %cst_110 : f32 to vector<8x64xf32>
    %289 = arith.maximumf %287, %288 : vector<8x64xf32>
    %290 = tpu.concatenate %196, %227, %258, %289 in 1 : vector<8x64xf32>, vector<8x64xf32>, vector<8x64xf32>, vector<8x64xf32> -> vector<8x256xf32>
    %cst_111 = arith.constant dense<0.000000e+00> : vector<8x192xf32>
    %291 = tpu.matmul %290, %4, %cst_111 {dimension_numbers = #tpu.dot_dimension_numbers<[1], [0], [0], [1], [0, 0, 1, 1], [], []>} : vector<8x256xf32>, vector<256x192xf32>, vector<8x192xf32> -> vector<8x192xf32>
    %292 = vector.broadcast %5 : vector<1x192xf32> to vector<8x192xf32>
    %293 = arith.addf %291, %292 : vector<8x192xf32>
    %cst_112 = arith.constant dense<0.000000e+00> : vector<8xf32>
    %294 = vector.multi_reduction <add>, %293, %cst_112 [1] : vector<8x192xf32> to vector<8xf32>
    %295 = vector.shape_cast %294 : vector<8xf32> to vector<8x1xf32>
    %cst_113 = arith.constant 1.920000e+02 : f32
    %296 = vector.broadcast %cst_113 : f32 to vector<8x1xf32>
    %297 = arith.divf %295, %296 : vector<8x1xf32>
    %298 = arith.mulf %293, %293 : vector<8x192xf32>
    %cst_114 = arith.constant dense<0.000000e+00> : vector<8xf32>
    %299 = vector.multi_reduction <add>, %298, %cst_114 [1] : vector<8x192xf32> to vector<8xf32>
    %300 = vector.shape_cast %299 : vector<8xf32> to vector<8x1xf32>
    %cst_115 = arith.constant 1.920000e+02 : f32
    %301 = vector.broadcast %cst_115 : f32 to vector<8x1xf32>
    %302 = arith.divf %300, %301 : vector<8x1xf32>
    %303 = arith.mulf %297, %297 : vector<8x1xf32>
    %304 = arith.subf %302, %303 : vector<8x1xf32>
    %cst_116 = arith.constant 0.000000e+00 : f32
    %305 = vector.broadcast %cst_116 : f32 to vector<8x1xf32>
    %306 = arith.maximumf %304, %305 : vector<8x1xf32>
    %307 = vector.broadcast %297 : vector<8x1xf32> to vector<8x192xf32>
    %308 = arith.subf %293, %307 : vector<8x192xf32>
    %cst_117 = arith.constant 9.99999997E-7 : f32
    %309 = vector.broadcast %cst_117 : f32 to vector<8x1xf32>
    %310 = arith.addf %306, %309 : vector<8x1xf32>
    %311 = math.rsqrt %310 : vector<8x1xf32>
    %312 = vector.broadcast %311 : vector<8x1xf32> to vector<8x192xf32>
    %313 = arith.mulf %308, %312 : vector<8x192xf32>
    %314 = vector.broadcast %6 : vector<1x192xf32> to vector<8x192xf32>
    %315 = arith.mulf %313, %314 : vector<8x192xf32>
    %316 = vector.broadcast %7 : vector<1x192xf32> to vector<8x192xf32>
    %317 = arith.addf %315, %316 : vector<8x192xf32>
    %cst_118 = arith.constant 0.000000e+00 : f32
    %318 = vector.broadcast %cst_118 : f32 to vector<8x192xf32>
    %319 = arith.maximumf %317, %318 : vector<8x192xf32>
    %c8 = arith.constant 8 : index
    %c0_119 = arith.constant 0 : index
    %c0_120 = arith.constant 0 : index
    %320 = vector.load %arg1[%c8, %c0_119, %c0_120] : memref<16x8x48xf32, #tpu.memory_space<vmem>>, vector<1x8x48xf32>
    %321 = vector.shape_cast %320 : vector<1x8x48xf32> to vector<8x48xf32>
    %cst_121 = arith.constant dense<0.000000e+00> : vector<8x64xf32>
    %322 = tpu.matmul %321, %0, %cst_121 {dimension_numbers = #tpu.dot_dimension_numbers<[1], [0], [0], [1], [0, 0, 1, 1], [], []>} : vector<8x48xf32>, vector<48x64xf32>, vector<8x64xf32> -> vector<8x64xf32>
    %323 = vector.broadcast %1 : vector<1x64xf32> to vector<8x64xf32>
    %324 = arith.addf %322, %323 : vector<8x64xf32>
    %cst_122 = arith.constant dense<0.000000e+00> : vector<8xf32>
    %325 = vector.multi_reduction <add>, %324, %cst_122 [1] : vector<8x64xf32> to vector<8xf32>
    %326 = vector.shape_cast %325 : vector<8xf32> to vector<8x1xf32>
    %cst_123 = arith.constant 6.400000e+01 : f32
    %327 = vector.broadcast %cst_123 : f32 to vector<8x1xf32>
    %328 = arith.divf %326, %327 : vector<8x1xf32>
    %329 = arith.mulf %324, %324 : vector<8x64xf32>
    %cst_124 = arith.constant dense<0.000000e+00> : vector<8xf32>
    %330 = vector.multi_reduction <add>, %329, %cst_124 [1] : vector<8x64xf32> to vector<8xf32>
    %331 = vector.shape_cast %330 : vector<8xf32> to vector<8x1xf32>
    %cst_125 = arith.constant 6.400000e+01 : f32
    %332 = vector.broadcast %cst_125 : f32 to vector<8x1xf32>
    %333 = arith.divf %331, %332 : vector<8x1xf32>
    %334 = arith.mulf %328, %328 : vector<8x1xf32>
    %335 = arith.subf %333, %334 : vector<8x1xf32>
    %cst_126 = arith.constant 0.000000e+00 : f32
    %336 = vector.broadcast %cst_126 : f32 to vector<8x1xf32>
    %337 = arith.maximumf %335, %336 : vector<8x1xf32>
    %338 = vector.broadcast %328 : vector<8x1xf32> to vector<8x64xf32>
    %339 = arith.subf %324, %338 : vector<8x64xf32>
    %cst_127 = arith.constant 9.99999997E-7 : f32
    %340 = vector.broadcast %cst_127 : f32 to vector<8x1xf32>
    %341 = arith.addf %337, %340 : vector<8x1xf32>
    %342 = math.rsqrt %341 : vector<8x1xf32>
    %343 = vector.broadcast %342 : vector<8x1xf32> to vector<8x64xf32>
    %344 = arith.mulf %339, %343 : vector<8x64xf32>
    %345 = vector.broadcast %2 : vector<1x64xf32> to vector<8x64xf32>
    %346 = arith.mulf %344, %345 : vector<8x64xf32>
    %347 = vector.broadcast %3 : vector<1x64xf32> to vector<8x64xf32>
    %348 = arith.addf %346, %347 : vector<8x64xf32>
    %cst_128 = arith.constant 0.000000e+00 : f32
    %349 = vector.broadcast %cst_128 : f32 to vector<8x64xf32>
    %350 = arith.maximumf %348, %349 : vector<8x64xf32>
    %c9 = arith.constant 9 : index
    %c0_129 = arith.constant 0 : index
    %c0_130 = arith.constant 0 : index
    %351 = vector.load %arg1[%c9, %c0_129, %c0_130] : memref<16x8x48xf32, #tpu.memory_space<vmem>>, vector<1x8x48xf32>
    %352 = vector.shape_cast %351 : vector<1x8x48xf32> to vector<8x48xf32>
    %cst_131 = arith.constant dense<0.000000e+00> : vector<8x64xf32>
    %353 = tpu.matmul %352, %0, %cst_131 {dimension_numbers = #tpu.dot_dimension_numbers<[1], [0], [0], [1], [0, 0, 1, 1], [], []>} : vector<8x48xf32>, vector<48x64xf32>, vector<8x64xf32> -> vector<8x64xf32>
    %354 = vector.broadcast %1 : vector<1x64xf32> to vector<8x64xf32>
    %355 = arith.addf %353, %354 : vector<8x64xf32>
    %cst_132 = arith.constant dense<0.000000e+00> : vector<8xf32>
    %356 = vector.multi_reduction <add>, %355, %cst_132 [1] : vector<8x64xf32> to vector<8xf32>
    %357 = vector.shape_cast %356 : vector<8xf32> to vector<8x1xf32>
    %cst_133 = arith.constant 6.400000e+01 : f32
    %358 = vector.broadcast %cst_133 : f32 to vector<8x1xf32>
    %359 = arith.divf %357, %358 : vector<8x1xf32>
    %360 = arith.mulf %355, %355 : vector<8x64xf32>
    %cst_134 = arith.constant dense<0.000000e+00> : vector<8xf32>
    %361 = vector.multi_reduction <add>, %360, %cst_134 [1] : vector<8x64xf32> to vector<8xf32>
    %362 = vector.shape_cast %361 : vector<8xf32> to vector<8x1xf32>
    %cst_135 = arith.constant 6.400000e+01 : f32
    %363 = vector.broadcast %cst_135 : f32 to vector<8x1xf32>
    %364 = arith.divf %362, %363 : vector<8x1xf32>
    %365 = arith.mulf %359, %359 : vector<8x1xf32>
    %366 = arith.subf %364, %365 : vector<8x1xf32>
    %cst_136 = arith.constant 0.000000e+00 : f32
    %367 = vector.broadcast %cst_136 : f32 to vector<8x1xf32>
    %368 = arith.maximumf %366, %367 : vector<8x1xf32>
    %369 = vector.broadcast %359 : vector<8x1xf32> to vector<8x64xf32>
    %370 = arith.subf %355, %369 : vector<8x64xf32>
    %cst_137 = arith.constant 9.99999997E-7 : f32
    %371 = vector.broadcast %cst_137 : f32 to vector<8x1xf32>
    %372 = arith.addf %368, %371 : vector<8x1xf32>
    %373 = math.rsqrt %372 : vector<8x1xf32>
    %374 = vector.broadcast %373 : vector<8x1xf32> to vector<8x64xf32>
    %375 = arith.mulf %370, %374 : vector<8x64xf32>
    %376 = vector.broadcast %2 : vector<1x64xf32> to vector<8x64xf32>
    %377 = arith.mulf %375, %376 : vector<8x64xf32>
    %378 = vector.broadcast %3 : vector<1x64xf32> to vector<8x64xf32>
    %379 = arith.addf %377, %378 : vector<8x64xf32>
    %cst_138 = arith.constant 0.000000e+00 : f32
    %380 = vector.broadcast %cst_138 : f32 to vector<8x64xf32>
    %381 = arith.maximumf %379, %380 : vector<8x64xf32>
    %c10 = arith.constant 10 : index
    %c0_139 = arith.constant 0 : index
    %c0_140 = arith.constant 0 : index
    %382 = vector.load %arg1[%c10, %c0_139, %c0_140] : memref<16x8x48xf32, #tpu.memory_space<vmem>>, vector<1x8x48xf32>
    %383 = vector.shape_cast %382 : vector<1x8x48xf32> to vector<8x48xf32>
    %cst_141 = arith.constant dense<0.000000e+00> : vector<8x64xf32>
    %384 = tpu.matmul %383, %0, %cst_141 {dimension_numbers = #tpu.dot_dimension_numbers<[1], [0], [0], [1], [0, 0, 1, 1], [], []>} : vector<8x48xf32>, vector<48x64xf32>, vector<8x64xf32> -> vector<8x64xf32>
    %385 = vector.broadcast %1 : vector<1x64xf32> to vector<8x64xf32>
    %386 = arith.addf %384, %385 : vector<8x64xf32>
    %cst_142 = arith.constant dense<0.000000e+00> : vector<8xf32>
    %387 = vector.multi_reduction <add>, %386, %cst_142 [1] : vector<8x64xf32> to vector<8xf32>
    %388 = vector.shape_cast %387 : vector<8xf32> to vector<8x1xf32>
    %cst_143 = arith.constant 6.400000e+01 : f32
    %389 = vector.broadcast %cst_143 : f32 to vector<8x1xf32>
    %390 = arith.divf %388, %389 : vector<8x1xf32>
    %391 = arith.mulf %386, %386 : vector<8x64xf32>
    %cst_144 = arith.constant dense<0.000000e+00> : vector<8xf32>
    %392 = vector.multi_reduction <add>, %391, %cst_144 [1] : vector<8x64xf32> to vector<8xf32>
    %393 = vector.shape_cast %392 : vector<8xf32> to vector<8x1xf32>
    %cst_145 = arith.constant 6.400000e+01 : f32
    %394 = vector.broadcast %cst_145 : f32 to vector<8x1xf32>
    %395 = arith.divf %393, %394 : vector<8x1xf32>
    %396 = arith.mulf %390, %390 : vector<8x1xf32>
    %397 = arith.subf %395, %396 : vector<8x1xf32>
    %cst_146 = arith.constant 0.000000e+00 : f32
    %398 = vector.broadcast %cst_146 : f32 to vector<8x1xf32>
    %399 = arith.maximumf %397, %398 : vector<8x1xf32>
    %400 = vector.broadcast %390 : vector<8x1xf32> to vector<8x64xf32>
    %401 = arith.subf %386, %400 : vector<8x64xf32>
    %cst_147 = arith.constant 9.99999997E-7 : f32
    %402 = vector.broadcast %cst_147 : f32 to vector<8x1xf32>
    %403 = arith.addf %399, %402 : vector<8x1xf32>
    %404 = math.rsqrt %403 : vector<8x1xf32>
    %405 = vector.broadcast %404 : vector<8x1xf32> to vector<8x64xf32>
    %406 = arith.mulf %401, %405 : vector<8x64xf32>
    %407 = vector.broadcast %2 : vector<1x64xf32> to vector<8x64xf32>
    %408 = arith.mulf %406, %407 : vector<8x64xf32>
    %409 = vector.broadcast %3 : vector<1x64xf32> to vector<8x64xf32>
    %410 = arith.addf %408, %409 : vector<8x64xf32>
    %cst_148 = arith.constant 0.000000e+00 : f32
    %411 = vector.broadcast %cst_148 : f32 to vector<8x64xf32>
    %412 = arith.maximumf %410, %411 : vector<8x64xf32>
    %c11 = arith.constant 11 : index
    %c0_149 = arith.constant 0 : index
    %c0_150 = arith.constant 0 : index
    %413 = vector.load %arg1[%c11, %c0_149, %c0_150] : memref<16x8x48xf32, #tpu.memory_space<vmem>>, vector<1x8x48xf32>
    %414 = vector.shape_cast %413 : vector<1x8x48xf32> to vector<8x48xf32>
    %cst_151 = arith.constant dense<0.000000e+00> : vector<8x64xf32>
    %415 = tpu.matmul %414, %0, %cst_151 {dimension_numbers = #tpu.dot_dimension_numbers<[1], [0], [0], [1], [0, 0, 1, 1], [], []>} : vector<8x48xf32>, vector<48x64xf32>, vector<8x64xf32> -> vector<8x64xf32>
    %416 = vector.broadcast %1 : vector<1x64xf32> to vector<8x64xf32>
    %417 = arith.addf %415, %416 : vector<8x64xf32>
    %cst_152 = arith.constant dense<0.000000e+00> : vector<8xf32>
    %418 = vector.multi_reduction <add>, %417, %cst_152 [1] : vector<8x64xf32> to vector<8xf32>
    %419 = vector.shape_cast %418 : vector<8xf32> to vector<8x1xf32>
    %cst_153 = arith.constant 6.400000e+01 : f32
    %420 = vector.broadcast %cst_153 : f32 to vector<8x1xf32>
    %421 = arith.divf %419, %420 : vector<8x1xf32>
    %422 = arith.mulf %417, %417 : vector<8x64xf32>
    %cst_154 = arith.constant dense<0.000000e+00> : vector<8xf32>
    %423 = vector.multi_reduction <add>, %422, %cst_154 [1] : vector<8x64xf32> to vector<8xf32>
    %424 = vector.shape_cast %423 : vector<8xf32> to vector<8x1xf32>
    %cst_155 = arith.constant 6.400000e+01 : f32
    %425 = vector.broadcast %cst_155 : f32 to vector<8x1xf32>
    %426 = arith.divf %424, %425 : vector<8x1xf32>
    %427 = arith.mulf %421, %421 : vector<8x1xf32>
    %428 = arith.subf %426, %427 : vector<8x1xf32>
    %cst_156 = arith.constant 0.000000e+00 : f32
    %429 = vector.broadcast %cst_156 : f32 to vector<8x1xf32>
    %430 = arith.maximumf %428, %429 : vector<8x1xf32>
    %431 = vector.broadcast %421 : vector<8x1xf32> to vector<8x64xf32>
    %432 = arith.subf %417, %431 : vector<8x64xf32>
    %cst_157 = arith.constant 9.99999997E-7 : f32
    %433 = vector.broadcast %cst_157 : f32 to vector<8x1xf32>
    %434 = arith.addf %430, %433 : vector<8x1xf32>
    %435 = math.rsqrt %434 : vector<8x1xf32>
    %436 = vector.broadcast %435 : vector<8x1xf32> to vector<8x64xf32>
    %437 = arith.mulf %432, %436 : vector<8x64xf32>
    %438 = vector.broadcast %2 : vector<1x64xf32> to vector<8x64xf32>
    %439 = arith.mulf %437, %438 : vector<8x64xf32>
    %440 = vector.broadcast %3 : vector<1x64xf32> to vector<8x64xf32>
    %441 = arith.addf %439, %440 : vector<8x64xf32>
    %cst_158 = arith.constant 0.000000e+00 : f32
    %442 = vector.broadcast %cst_158 : f32 to vector<8x64xf32>
    %443 = arith.maximumf %441, %442 : vector<8x64xf32>
    %444 = tpu.concatenate %350, %381, %412, %443 in 1 : vector<8x64xf32>, vector<8x64xf32>, vector<8x64xf32>, vector<8x64xf32> -> vector<8x256xf32>
    %cst_159 = arith.constant dense<0.000000e+00> : vector<8x192xf32>
    %445 = tpu.matmul %444, %4, %cst_159 {dimension_numbers = #tpu.dot_dimension_numbers<[1], [0], [0], [1], [0, 0, 1, 1], [], []>} : vector<8x256xf32>, vector<256x192xf32>, vector<8x192xf32> -> vector<8x192xf32>
    %446 = vector.broadcast %5 : vector<1x192xf32> to vector<8x192xf32>
    %447 = arith.addf %445, %446 : vector<8x192xf32>
    %cst_160 = arith.constant dense<0.000000e+00> : vector<8xf32>
    %448 = vector.multi_reduction <add>, %447, %cst_160 [1] : vector<8x192xf32> to vector<8xf32>
    %449 = vector.shape_cast %448 : vector<8xf32> to vector<8x1xf32>
    %cst_161 = arith.constant 1.920000e+02 : f32
    %450 = vector.broadcast %cst_161 : f32 to vector<8x1xf32>
    %451 = arith.divf %449, %450 : vector<8x1xf32>
    %452 = arith.mulf %447, %447 : vector<8x192xf32>
    %cst_162 = arith.constant dense<0.000000e+00> : vector<8xf32>
    %453 = vector.multi_reduction <add>, %452, %cst_162 [1] : vector<8x192xf32> to vector<8xf32>
    %454 = vector.shape_cast %453 : vector<8xf32> to vector<8x1xf32>
    %cst_163 = arith.constant 1.920000e+02 : f32
    %455 = vector.broadcast %cst_163 : f32 to vector<8x1xf32>
    %456 = arith.divf %454, %455 : vector<8x1xf32>
    %457 = arith.mulf %451, %451 : vector<8x1xf32>
    %458 = arith.subf %456, %457 : vector<8x1xf32>
    %cst_164 = arith.constant 0.000000e+00 : f32
    %459 = vector.broadcast %cst_164 : f32 to vector<8x1xf32>
    %460 = arith.maximumf %458, %459 : vector<8x1xf32>
    %461 = vector.broadcast %451 : vector<8x1xf32> to vector<8x192xf32>
    %462 = arith.subf %447, %461 : vector<8x192xf32>
    %cst_165 = arith.constant 9.99999997E-7 : f32
    %463 = vector.broadcast %cst_165 : f32 to vector<8x1xf32>
    %464 = arith.addf %460, %463 : vector<8x1xf32>
    %465 = math.rsqrt %464 : vector<8x1xf32>
    %466 = vector.broadcast %465 : vector<8x1xf32> to vector<8x192xf32>
    %467 = arith.mulf %462, %466 : vector<8x192xf32>
    %468 = vector.broadcast %6 : vector<1x192xf32> to vector<8x192xf32>
    %469 = arith.mulf %467, %468 : vector<8x192xf32>
    %470 = vector.broadcast %7 : vector<1x192xf32> to vector<8x192xf32>
    %471 = arith.addf %469, %470 : vector<8x192xf32>
    %cst_166 = arith.constant 0.000000e+00 : f32
    %472 = vector.broadcast %cst_166 : f32 to vector<8x192xf32>
    %473 = arith.maximumf %471, %472 : vector<8x192xf32>
    %c12 = arith.constant 12 : index
    %c0_167 = arith.constant 0 : index
    %c0_168 = arith.constant 0 : index
    %474 = vector.load %arg1[%c12, %c0_167, %c0_168] : memref<16x8x48xf32, #tpu.memory_space<vmem>>, vector<1x8x48xf32>
    %475 = vector.shape_cast %474 : vector<1x8x48xf32> to vector<8x48xf32>
    %cst_169 = arith.constant dense<0.000000e+00> : vector<8x64xf32>
    %476 = tpu.matmul %475, %0, %cst_169 {dimension_numbers = #tpu.dot_dimension_numbers<[1], [0], [0], [1], [0, 0, 1, 1], [], []>} : vector<8x48xf32>, vector<48x64xf32>, vector<8x64xf32> -> vector<8x64xf32>
    %477 = vector.broadcast %1 : vector<1x64xf32> to vector<8x64xf32>
    %478 = arith.addf %476, %477 : vector<8x64xf32>
    %cst_170 = arith.constant dense<0.000000e+00> : vector<8xf32>
    %479 = vector.multi_reduction <add>, %478, %cst_170 [1] : vector<8x64xf32> to vector<8xf32>
    %480 = vector.shape_cast %479 : vector<8xf32> to vector<8x1xf32>
    %cst_171 = arith.constant 6.400000e+01 : f32
    %481 = vector.broadcast %cst_171 : f32 to vector<8x1xf32>
    %482 = arith.divf %480, %481 : vector<8x1xf32>
    %483 = arith.mulf %478, %478 : vector<8x64xf32>
    %cst_172 = arith.constant dense<0.000000e+00> : vector<8xf32>
    %484 = vector.multi_reduction <add>, %483, %cst_172 [1] : vector<8x64xf32> to vector<8xf32>
    %485 = vector.shape_cast %484 : vector<8xf32> to vector<8x1xf32>
    %cst_173 = arith.constant 6.400000e+01 : f32
    %486 = vector.broadcast %cst_173 : f32 to vector<8x1xf32>
    %487 = arith.divf %485, %486 : vector<8x1xf32>
    %488 = arith.mulf %482, %482 : vector<8x1xf32>
    %489 = arith.subf %487, %488 : vector<8x1xf32>
    %cst_174 = arith.constant 0.000000e+00 : f32
    %490 = vector.broadcast %cst_174 : f32 to vector<8x1xf32>
    %491 = arith.maximumf %489, %490 : vector<8x1xf32>
    %492 = vector.broadcast %482 : vector<8x1xf32> to vector<8x64xf32>
    %493 = arith.subf %478, %492 : vector<8x64xf32>
    %cst_175 = arith.constant 9.99999997E-7 : f32
    %494 = vector.broadcast %cst_175 : f32 to vector<8x1xf32>
    %495 = arith.addf %491, %494 : vector<8x1xf32>
    %496 = math.rsqrt %495 : vector<8x1xf32>
    %497 = vector.broadcast %496 : vector<8x1xf32> to vector<8x64xf32>
    %498 = arith.mulf %493, %497 : vector<8x64xf32>
    %499 = vector.broadcast %2 : vector<1x64xf32> to vector<8x64xf32>
    %500 = arith.mulf %498, %499 : vector<8x64xf32>
    %501 = vector.broadcast %3 : vector<1x64xf32> to vector<8x64xf32>
    %502 = arith.addf %500, %501 : vector<8x64xf32>
    %cst_176 = arith.constant 0.000000e+00 : f32
    %503 = vector.broadcast %cst_176 : f32 to vector<8x64xf32>
    %504 = arith.maximumf %502, %503 : vector<8x64xf32>
    %c13 = arith.constant 13 : index
    %c0_177 = arith.constant 0 : index
    %c0_178 = arith.constant 0 : index
    %505 = vector.load %arg1[%c13, %c0_177, %c0_178] : memref<16x8x48xf32, #tpu.memory_space<vmem>>, vector<1x8x48xf32>
    %506 = vector.shape_cast %505 : vector<1x8x48xf32> to vector<8x48xf32>
    %cst_179 = arith.constant dense<0.000000e+00> : vector<8x64xf32>
    %507 = tpu.matmul %506, %0, %cst_179 {dimension_numbers = #tpu.dot_dimension_numbers<[1], [0], [0], [1], [0, 0, 1, 1], [], []>} : vector<8x48xf32>, vector<48x64xf32>, vector<8x64xf32> -> vector<8x64xf32>
    %508 = vector.broadcast %1 : vector<1x64xf32> to vector<8x64xf32>
    %509 = arith.addf %507, %508 : vector<8x64xf32>
    %cst_180 = arith.constant dense<0.000000e+00> : vector<8xf32>
    %510 = vector.multi_reduction <add>, %509, %cst_180 [1] : vector<8x64xf32> to vector<8xf32>
    %511 = vector.shape_cast %510 : vector<8xf32> to vector<8x1xf32>
    %cst_181 = arith.constant 6.400000e+01 : f32
    %512 = vector.broadcast %cst_181 : f32 to vector<8x1xf32>
    %513 = arith.divf %511, %512 : vector<8x1xf32>
    %514 = arith.mulf %509, %509 : vector<8x64xf32>
    %cst_182 = arith.constant dense<0.000000e+00> : vector<8xf32>
    %515 = vector.multi_reduction <add>, %514, %cst_182 [1] : vector<8x64xf32> to vector<8xf32>
    %516 = vector.shape_cast %515 : vector<8xf32> to vector<8x1xf32>
    %cst_183 = arith.constant 6.400000e+01 : f32
    %517 = vector.broadcast %cst_183 : f32 to vector<8x1xf32>
    %518 = arith.divf %516, %517 : vector<8x1xf32>
    %519 = arith.mulf %513, %513 : vector<8x1xf32>
    %520 = arith.subf %518, %519 : vector<8x1xf32>
    %cst_184 = arith.constant 0.000000e+00 : f32
    %521 = vector.broadcast %cst_184 : f32 to vector<8x1xf32>
    %522 = arith.maximumf %520, %521 : vector<8x1xf32>
    %523 = vector.broadcast %513 : vector<8x1xf32> to vector<8x64xf32>
    %524 = arith.subf %509, %523 : vector<8x64xf32>
    %cst_185 = arith.constant 9.99999997E-7 : f32
    %525 = vector.broadcast %cst_185 : f32 to vector<8x1xf32>
    %526 = arith.addf %522, %525 : vector<8x1xf32>
    %527 = math.rsqrt %526 : vector<8x1xf32>
    %528 = vector.broadcast %527 : vector<8x1xf32> to vector<8x64xf32>
    %529 = arith.mulf %524, %528 : vector<8x64xf32>
    %530 = vector.broadcast %2 : vector<1x64xf32> to vector<8x64xf32>
    %531 = arith.mulf %529, %530 : vector<8x64xf32>
    %532 = vector.broadcast %3 : vector<1x64xf32> to vector<8x64xf32>
    %533 = arith.addf %531, %532 : vector<8x64xf32>
    %cst_186 = arith.constant 0.000000e+00 : f32
    %534 = vector.broadcast %cst_186 : f32 to vector<8x64xf32>
    %535 = arith.maximumf %533, %534 : vector<8x64xf32>
    %c14 = arith.constant 14 : index
    %c0_187 = arith.constant 0 : index
    %c0_188 = arith.constant 0 : index
    %536 = vector.load %arg1[%c14, %c0_187, %c0_188] : memref<16x8x48xf32, #tpu.memory_space<vmem>>, vector<1x8x48xf32>
    %537 = vector.shape_cast %536 : vector<1x8x48xf32> to vector<8x48xf32>
    %cst_189 = arith.constant dense<0.000000e+00> : vector<8x64xf32>
    %538 = tpu.matmul %537, %0, %cst_189 {dimension_numbers = #tpu.dot_dimension_numbers<[1], [0], [0], [1], [0, 0, 1, 1], [], []>} : vector<8x48xf32>, vector<48x64xf32>, vector<8x64xf32> -> vector<8x64xf32>
    %539 = vector.broadcast %1 : vector<1x64xf32> to vector<8x64xf32>
    %540 = arith.addf %538, %539 : vector<8x64xf32>
    %cst_190 = arith.constant dense<0.000000e+00> : vector<8xf32>
    %541 = vector.multi_reduction <add>, %540, %cst_190 [1] : vector<8x64xf32> to vector<8xf32>
    %542 = vector.shape_cast %541 : vector<8xf32> to vector<8x1xf32>
    %cst_191 = arith.constant 6.400000e+01 : f32
    %543 = vector.broadcast %cst_191 : f32 to vector<8x1xf32>
    %544 = arith.divf %542, %543 : vector<8x1xf32>
    %545 = arith.mulf %540, %540 : vector<8x64xf32>
    %cst_192 = arith.constant dense<0.000000e+00> : vector<8xf32>
    %546 = vector.multi_reduction <add>, %545, %cst_192 [1] : vector<8x64xf32> to vector<8xf32>
    %547 = vector.shape_cast %546 : vector<8xf32> to vector<8x1xf32>
    %cst_193 = arith.constant 6.400000e+01 : f32
    %548 = vector.broadcast %cst_193 : f32 to vector<8x1xf32>
    %549 = arith.divf %547, %548 : vector<8x1xf32>
    %550 = arith.mulf %544, %544 : vector<8x1xf32>
    %551 = arith.subf %549, %550 : vector<8x1xf32>
    %cst_194 = arith.constant 0.000000e+00 : f32
    %552 = vector.broadcast %cst_194 : f32 to vector<8x1xf32>
    %553 = arith.maximumf %551, %552 : vector<8x1xf32>
    %554 = vector.broadcast %544 : vector<8x1xf32> to vector<8x64xf32>
    %555 = arith.subf %540, %554 : vector<8x64xf32>
    %cst_195 = arith.constant 9.99999997E-7 : f32
    %556 = vector.broadcast %cst_195 : f32 to vector<8x1xf32>
    %557 = arith.addf %553, %556 : vector<8x1xf32>
    %558 = math.rsqrt %557 : vector<8x1xf32>
    %559 = vector.broadcast %558 : vector<8x1xf32> to vector<8x64xf32>
    %560 = arith.mulf %555, %559 : vector<8x64xf32>
    %561 = vector.broadcast %2 : vector<1x64xf32> to vector<8x64xf32>
    %562 = arith.mulf %560, %561 : vector<8x64xf32>
    %563 = vector.broadcast %3 : vector<1x64xf32> to vector<8x64xf32>
    %564 = arith.addf %562, %563 : vector<8x64xf32>
    %cst_196 = arith.constant 0.000000e+00 : f32
    %565 = vector.broadcast %cst_196 : f32 to vector<8x64xf32>
    %566 = arith.maximumf %564, %565 : vector<8x64xf32>
    %c15 = arith.constant 15 : index
    %c0_197 = arith.constant 0 : index
    %c0_198 = arith.constant 0 : index
    %567 = vector.load %arg1[%c15, %c0_197, %c0_198] : memref<16x8x48xf32, #tpu.memory_space<vmem>>, vector<1x8x48xf32>
    %568 = vector.shape_cast %567 : vector<1x8x48xf32> to vector<8x48xf32>
    %cst_199 = arith.constant dense<0.000000e+00> : vector<8x64xf32>
    %569 = tpu.matmul %568, %0, %cst_199 {dimension_numbers = #tpu.dot_dimension_numbers<[1], [0], [0], [1], [0, 0, 1, 1], [], []>} : vector<8x48xf32>, vector<48x64xf32>, vector<8x64xf32> -> vector<8x64xf32>
    %570 = vector.broadcast %1 : vector<1x64xf32> to vector<8x64xf32>
    %571 = arith.addf %569, %570 : vector<8x64xf32>
    %cst_200 = arith.constant dense<0.000000e+00> : vector<8xf32>
    %572 = vector.multi_reduction <add>, %571, %cst_200 [1] : vector<8x64xf32> to vector<8xf32>
    %573 = vector.shape_cast %572 : vector<8xf32> to vector<8x1xf32>
    %cst_201 = arith.constant 6.400000e+01 : f32
    %574 = vector.broadcast %cst_201 : f32 to vector<8x1xf32>
    %575 = arith.divf %573, %574 : vector<8x1xf32>
    %576 = arith.mulf %571, %571 : vector<8x64xf32>
    %cst_202 = arith.constant dense<0.000000e+00> : vector<8xf32>
    %577 = vector.multi_reduction <add>, %576, %cst_202 [1] : vector<8x64xf32> to vector<8xf32>
    %578 = vector.shape_cast %577 : vector<8xf32> to vector<8x1xf32>
    %cst_203 = arith.constant 6.400000e+01 : f32
    %579 = vector.broadcast %cst_203 : f32 to vector<8x1xf32>
    %580 = arith.divf %578, %579 : vector<8x1xf32>
    %581 = arith.mulf %575, %575 : vector<8x1xf32>
    %582 = arith.subf %580, %581 : vector<8x1xf32>
    %cst_204 = arith.constant 0.000000e+00 : f32
    %583 = vector.broadcast %cst_204 : f32 to vector<8x1xf32>
    %584 = arith.maximumf %582, %583 : vector<8x1xf32>
    %585 = vector.broadcast %575 : vector<8x1xf32> to vector<8x64xf32>
    %586 = arith.subf %571, %585 : vector<8x64xf32>
    %cst_205 = arith.constant 9.99999997E-7 : f32
    %587 = vector.broadcast %cst_205 : f32 to vector<8x1xf32>
    %588 = arith.addf %584, %587 : vector<8x1xf32>
    %589 = math.rsqrt %588 : vector<8x1xf32>
    %590 = vector.broadcast %589 : vector<8x1xf32> to vector<8x64xf32>
    %591 = arith.mulf %586, %590 : vector<8x64xf32>
    %592 = vector.broadcast %2 : vector<1x64xf32> to vector<8x64xf32>
    %593 = arith.mulf %591, %592 : vector<8x64xf32>
    %594 = vector.broadcast %3 : vector<1x64xf32> to vector<8x64xf32>
    %595 = arith.addf %593, %594 : vector<8x64xf32>
    %cst_206 = arith.constant 0.000000e+00 : f32
    %596 = vector.broadcast %cst_206 : f32 to vector<8x64xf32>
    %597 = arith.maximumf %595, %596 : vector<8x64xf32>
    %598 = tpu.concatenate %504, %535, %566, %597 in 1 : vector<8x64xf32>, vector<8x64xf32>, vector<8x64xf32>, vector<8x64xf32> -> vector<8x256xf32>
    %cst_207 = arith.constant dense<0.000000e+00> : vector<8x192xf32>
    %599 = tpu.matmul %598, %4, %cst_207 {dimension_numbers = #tpu.dot_dimension_numbers<[1], [0], [0], [1], [0, 0, 1, 1], [], []>} : vector<8x256xf32>, vector<256x192xf32>, vector<8x192xf32> -> vector<8x192xf32>
    %600 = vector.broadcast %5 : vector<1x192xf32> to vector<8x192xf32>
    %601 = arith.addf %599, %600 : vector<8x192xf32>
    %cst_208 = arith.constant dense<0.000000e+00> : vector<8xf32>
    %602 = vector.multi_reduction <add>, %601, %cst_208 [1] : vector<8x192xf32> to vector<8xf32>
    %603 = vector.shape_cast %602 : vector<8xf32> to vector<8x1xf32>
    %cst_209 = arith.constant 1.920000e+02 : f32
    %604 = vector.broadcast %cst_209 : f32 to vector<8x1xf32>
    %605 = arith.divf %603, %604 : vector<8x1xf32>
    %606 = arith.mulf %601, %601 : vector<8x192xf32>
    %cst_210 = arith.constant dense<0.000000e+00> : vector<8xf32>
    %607 = vector.multi_reduction <add>, %606, %cst_210 [1] : vector<8x192xf32> to vector<8xf32>
    %608 = vector.shape_cast %607 : vector<8xf32> to vector<8x1xf32>
    %cst_211 = arith.constant 1.920000e+02 : f32
    %609 = vector.broadcast %cst_211 : f32 to vector<8x1xf32>
    %610 = arith.divf %608, %609 : vector<8x1xf32>
    %611 = arith.mulf %605, %605 : vector<8x1xf32>
    %612 = arith.subf %610, %611 : vector<8x1xf32>
    %cst_212 = arith.constant 0.000000e+00 : f32
    %613 = vector.broadcast %cst_212 : f32 to vector<8x1xf32>
    %614 = arith.maximumf %612, %613 : vector<8x1xf32>
    %615 = vector.broadcast %605 : vector<8x1xf32> to vector<8x192xf32>
    %616 = arith.subf %601, %615 : vector<8x192xf32>
    %cst_213 = arith.constant 9.99999997E-7 : f32
    %617 = vector.broadcast %cst_213 : f32 to vector<8x1xf32>
    %618 = arith.addf %614, %617 : vector<8x1xf32>
    %619 = math.rsqrt %618 : vector<8x1xf32>
    %620 = vector.broadcast %619 : vector<8x1xf32> to vector<8x192xf32>
    %621 = arith.mulf %616, %620 : vector<8x192xf32>
    %622 = vector.broadcast %6 : vector<1x192xf32> to vector<8x192xf32>
    %623 = arith.mulf %621, %622 : vector<8x192xf32>
    %624 = vector.broadcast %7 : vector<1x192xf32> to vector<8x192xf32>
    %625 = arith.addf %623, %624 : vector<8x192xf32>
    %cst_214 = arith.constant 0.000000e+00 : f32
    %626 = vector.broadcast %cst_214 : f32 to vector<8x192xf32>
    %627 = arith.maximumf %625, %626 : vector<8x192xf32>
    %628 = tpu.concatenate %165, %319, %473, %627 in 1 : vector<8x192xf32>, vector<8x192xf32>, vector<8x192xf32>, vector<8x192xf32> -> vector<8x768xf32>
    %cst_215 = arith.constant dense<0.000000e+00> : vector<8x384xf32>
    %629 = tpu.matmul %628, %8, %cst_215 {dimension_numbers = #tpu.dot_dimension_numbers<[1], [0], [0], [1], [0, 0, 1, 1], [], []>} : vector<8x768xf32>, vector<768x384xf32>, vector<8x384xf32> -> vector<8x384xf32>
    %630 = vector.broadcast %9 : vector<1x384xf32> to vector<8x384xf32>
    %631 = arith.addf %629, %630 : vector<8x384xf32>
    %cst_216 = arith.constant dense<0.000000e+00> : vector<8xf32>
    %632 = vector.multi_reduction <add>, %631, %cst_216 [1] : vector<8x384xf32> to vector<8xf32>
    %633 = vector.shape_cast %632 : vector<8xf32> to vector<8x1xf32>
    %cst_217 = arith.constant 3.840000e+02 : f32
    %634 = vector.broadcast %cst_217 : f32 to vector<8x1xf32>
    %635 = arith.divf %633, %634 : vector<8x1xf32>
    %636 = arith.mulf %631, %631 : vector<8x384xf32>
    %cst_218 = arith.constant dense<0.000000e+00> : vector<8xf32>
    %637 = vector.multi_reduction <add>, %636, %cst_218 [1] : vector<8x384xf32> to vector<8xf32>
    %638 = vector.shape_cast %637 : vector<8xf32> to vector<8x1xf32>
    %cst_219 = arith.constant 3.840000e+02 : f32
    %639 = vector.broadcast %cst_219 : f32 to vector<8x1xf32>
    %640 = arith.divf %638, %639 : vector<8x1xf32>
    %641 = arith.mulf %635, %635 : vector<8x1xf32>
    %642 = arith.subf %640, %641 : vector<8x1xf32>
    %cst_220 = arith.constant 0.000000e+00 : f32
    %643 = vector.broadcast %cst_220 : f32 to vector<8x1xf32>
    %644 = arith.maximumf %642, %643 : vector<8x1xf32>
    %645 = vector.broadcast %635 : vector<8x1xf32> to vector<8x384xf32>
    %646 = arith.subf %631, %645 : vector<8x384xf32>
    %cst_221 = arith.constant 9.99999997E-7 : f32
    %647 = vector.broadcast %cst_221 : f32 to vector<8x1xf32>
    %648 = arith.addf %644, %647 : vector<8x1xf32>
    %649 = math.rsqrt %648 : vector<8x1xf32>
    %650 = vector.broadcast %649 : vector<8x1xf32> to vector<8x384xf32>
    %651 = arith.mulf %646, %650 : vector<8x384xf32>
    %652 = vector.broadcast %10 : vector<1x384xf32> to vector<8x384xf32>
    %653 = arith.mulf %651, %652 : vector<8x384xf32>
    %654 = vector.broadcast %11 : vector<1x384xf32> to vector<8x384xf32>
    %655 = arith.addf %653, %654 : vector<8x384xf32>
    %cst_222 = arith.constant 0.000000e+00 : f32
    %656 = vector.broadcast %cst_222 : f32 to vector<8x384xf32>
    %657 = arith.maximumf %655, %656 : vector<8x384xf32>
    %c0_223 = arith.constant 0 : index
    %c0_224 = arith.constant 0 : index
    %658 = vector.load %arg14[%c0_223, %c0_224] : memref<384x128xf32, #tpu.memory_space<vmem>>, vector<384x128xf32>
    %cst_225 = arith.constant dense<0.000000e+00> : vector<8x128xf32>
    %659 = tpu.matmul %657, %658, %cst_225 {dimension_numbers = #tpu.dot_dimension_numbers<[1], [0], [0], [1], [0, 0, 1, 1], [], []>} : vector<8x384xf32>, vector<384x128xf32>, vector<8x128xf32> -> vector<8x128xf32>
    %c0_226 = arith.constant 0 : index
    %c0_227 = arith.constant 0 : index
    %660 = vector.load %arg15[%c0_226, %c0_227] : memref<1x128xf32, #tpu.memory_space<vmem>>, vector<1x128xf32>
    %661 = vector.broadcast %660 : vector<1x128xf32> to vector<8x128xf32>
    %662 = arith.addf %659, %661 : vector<8x128xf32>
    %c0_228 = arith.constant 0 : index
    %c0_229 = arith.constant 0 : index
    %663 = vector.load %arg16[%c0_228, %c0_229] : memref<8x128xf32, #tpu.memory_space<vmem>>, vector<8x128xf32>
    tpu.vector_store %arg16[%c0_228, %c0_229], %662 {strides = array<i32>} : memref<8x128xf32, #tpu.memory_space<vmem>>, vector<8x128xf32>,
    return
  }
  func.func @transform_0(%arg0: i32) -> (i32, i32, i32) {
    %c0_i32 = arith.constant 0 : i32
    %c0_i32_0 = arith.constant 0 : i32
    %c0_i32_1 = arith.constant 0 : i32
    return %c0_i32, %arg0, %c0_i32_0 : i32, i32, i32
  }
  func.func @transform_1(%arg0: i32) -> (i32, i32) {
    %c0_i32 = arith.constant 0 : i32
    %c0_i32_0 = arith.constant 0 : i32
    %c0_i32_1 = arith.constant 0 : i32
    return %c0_i32, %c0_i32_0 : i32, i32
  }
  func.func @transform_2(%arg0: i32) -> (i32, i32) {
    %c0_i32 = arith.constant 0 : i32
    %c0_i32_0 = arith.constant 0 : i32
    %c0_i32_1 = arith.constant 0 : i32
    return %c0_i32, %c0_i32_0 : i32, i32
  }
  func.func @transform_3(%arg0: i32) -> (i32, i32) {
    %c0_i32 = arith.constant 0 : i32
    %c0_i32_0 = arith.constant 0 : i32
    %c0_i32_1 = arith.constant 0 : i32
    return %c0_i32, %c0_i32_0 : i32, i32
  }
  func.func @transform_4(%arg0: i32) -> (i32, i32) {
    %c0_i32 = arith.constant 0 : i32
    %c0_i32_0 = arith.constant 0 : i32
    %c0_i32_1 = arith.constant 0 : i32
    return %c0_i32, %c0_i32_0 : i32, i32
  }
  func.func @transform_5(%arg0: i32) -> (i32, i32) {
    %c0_i32 = arith.constant 0 : i32
    %c0_i32_0 = arith.constant 0 : i32
    %c0_i32_1 = arith.constant 0 : i32
    return %c0_i32, %c0_i32_0 : i32, i32
  }
  func.func @transform_6(%arg0: i32) -> (i32, i32) {
    %c0_i32 = arith.constant 0 : i32
    %c0_i32_0 = arith.constant 0 : i32
    %c0_i32_1 = arith.constant 0 : i32
    return %c0_i32, %c0_i32_0 : i32, i32
  }
  func.func @transform_7(%arg0: i32) -> (i32, i32) {
    %c0_i32 = arith.constant 0 : i32
    %c0_i32_0 = arith.constant 0 : i32
    %c0_i32_1 = arith.constant 0 : i32
    return %c0_i32, %c0_i32_0 : i32, i32
  }
  func.func @transform_8(%arg0: i32) -> (i32, i32) {
    %c0_i32 = arith.constant 0 : i32
    %c0_i32_0 = arith.constant 0 : i32
    %c0_i32_1 = arith.constant 0 : i32
    return %c0_i32, %c0_i32_0 : i32, i32
  }
  func.func @transform_9(%arg0: i32) -> (i32, i32) {
    %c0_i32 = arith.constant 0 : i32
    %c0_i32_0 = arith.constant 0 : i32
    %c0_i32_1 = arith.constant 0 : i32
    return %c0_i32, %c0_i32_0 : i32, i32
  }
  func.func @transform_10(%arg0: i32) -> (i32, i32) {
    %c0_i32 = arith.constant 0 : i32
    %c0_i32_0 = arith.constant 0 : i32
    %c0_i32_1 = arith.constant 0 : i32
    return %c0_i32, %c0_i32_0 : i32, i32
  }
  func.func @transform_11(%arg0: i32) -> (i32, i32) {
    %c0_i32 = arith.constant 0 : i32
    %c0_i32_0 = arith.constant 0 : i32
    %c0_i32_1 = arith.constant 0 : i32
    return %c0_i32, %c0_i32_0 : i32, i32
  }
  func.func @transform_12(%arg0: i32) -> (i32, i32) {
    %c0_i32 = arith.constant 0 : i32
    %c0_i32_0 = arith.constant 0 : i32
    %c0_i32_1 = arith.constant 0 : i32
    return %c0_i32, %c0_i32_0 : i32, i32
  }
  func.func @transform_13(%arg0: i32) -> (i32, i32) {
    %c0_i32 = arith.constant 0 : i32
    %c0_i32_0 = arith.constant 0 : i32
    %c0_i32_1 = arith.constant 0 : i32
    return %c0_i32, %c0_i32_0 : i32, i32
  }
  func.func @transform_14(%arg0: i32) -> (i32, i32) {
    %c0_i32 = arith.constant 0 : i32
    %c0_i32_0 = arith.constant 0 : i32
    %c0_i32_1 = arith.constant 0 : i32
    return %c0_i32, %c0_i32_0 : i32, i32
  }
  func.func @transform_15(%arg0: i32) -> (i32, i32) {
    %c0_i32 = arith.constant 0 : i32
    %c0_i32_0 = arith.constant 0 : i32
    return %arg0, %c0_i32 : i32, i32
  }
}

</mosaic_0001>

<bundles_post_ra>
// kernel: patch_embeddings_forward.1
= control target key start
LH: loop header
LB: loop body
LE: loop exit
PB: predicated region body
PF: predicated region fallthrough
CT: control target
= control target key end

     0   :  { %v6716_v3 = vmov 0.0|0.0   ;;  %vm4572_vm0 = vmmov 0   ;;  %v6718_v6 = vmov 0.0   ;;  %s6700_s0 = inlined_call_operand.vmem [shape: f32[16,8,48], index: 0, kind: input, shape index: {}]   ;;  %s6701_s1 = inlined_call_operand.vmem [shape: f32[48,64], index: 1, kind: input, shape index: {}]   ;;  %s6702_s2 = inlined_call_operand.vmem [shape: f32[1,64], index: 2, kind: input, shape index: {}]   ;;  %s6703_s3 = inlined_call_operand.vmem [shape: f32[1,64], index: 3, kind: input, shape index: {}]   ;;  %s6704_s4 = inlined_call_operand.vmem [shape: f32[1,64], index: 4, kind: input, shape index: {}]   ;;  %s6705_s5 = inlined_call_operand.vmem [shape: f32[256,192], index: 5, kind: input, shape index: {}]   ;;  %s6706_s6 = inlined_call_operand.vmem [shape: f32[1,192], index: 6, kind: input, shape index: {}]   ;;  %s6707_s7 = inlined_call_operand.vmem [shape: f32[1,192], index: 7, kind: input, shape index: {}]   ;;  %s6708_s8 = inlined_call_operand.vmem [shape: f32[1,192], index: 8, kind: input, shape index: {}]   ;;  %s6709_s9 = inlined_call_operand.vmem [shape: f32[768,384], index: 9, kind: input, shape index: {}]   ;;  %s6710_s10 = inlined_call_operand.vmem [shape: f32[1,384], index: 10, kind: input, shape index: {}]   ;;  %s6711_s11 = inlined_call_operand.vmem [shape: f32[1,384], index: 11, kind: input, shape index: {}]   ;;  %s6712_s12 = inlined_call_operand.vmem [shape: f32[1,384], index: 12, kind: input, shape index: {}]   ;;  %s6713_s13 = inlined_call_operand.vmem [shape: f32[384,128], index: 13, kind: input, shape index: {}]   ;;  %s6714_s14 = inlined_call_operand.vmem [shape: f32[1,128], index: 14, kind: input, shape index: {}]   ;;  %s6715_s15 = inlined_call_operand.hbm [shape: f32[8,128], index: 15, kind: output, shape index: {}]  }
   0x1   :  { %v51_v0 = vld [vmem:[%s6701_s1] sm:$0xff]  ;;  %v52_v1 = vld [vmem:[%s6701_s1 + $0x8] sm:$0xff]  ;;  %v53_v2 = vld [vmem:[%s6701_s1 + $0x10] sm:$0xff]  ;;  %3722 = vmatprep.subr.bf16.mxu0 %v6716_v3  ;;  %3749 = vmatprep.subr.bf16.mxu1 %v6716_v3 }
   0x2   :  { %v4667_v4 = vpack.c.bf16 %v52_v1, %v51_v0  ;;  %v54_v5 = vld [vmem:[%s6701_s1 + $0x18] sm:$0xff]  ;;  %3504 = vmatprep.mubr.msk.f32.mxu1 %vm4572_vm0, %v6718_v6  ;;  %3459 = vmatprep.mubr.msk.f32.mxu0 %vm4572_vm0, %v6718_v6  ;;  %v55_v8 = vld [vmem:[%s6701_s1 + $0x20] sm:$0xff]  ;;  %v56_v9 = vld [vmem:[%s6701_s1 + $0x28] sm:$0xff] }
   0x3   :  { %v4678_v7 = vpack.c.bf16 %v54_v5, %v53_v2 }
   0x4   :  { %3724 = vmatpush3.bf16.msra.mxu0 %v4667_v4  ;;  %3751 = vmatpush3.bf16.msra.mxu1 %v4667_v4 }
   0x5   :  { %3725 = vmatprep.subr.bf16.mxu0 %v6716_v3  ;;  %3752 = vmatprep.subr.bf16.mxu1 %v6716_v3 }
   0x6   :  { %20 = vsyncpa [#allocation3], 0  ;;  %v4690_v10 = vpack.c.bf16 %v56_v9, %v55_v8  ;;  %vm425_vm1 = vcmask 392192   ;;  %v3151_v11 = vld [vmem:[%s6700_s0 + $0x18] sm:$0xff]  ;;  %v418_v12 = vld [vmem:[%s6700_s0] sm:$0xff]  ;;  %vm499_vm2 = vcmask 523264  }
   0x7   :  { %v3147_v13 = vld [vmem:[%s6700_s0 + $0x8] sm:$0xff]  ;;  %v3153_v14 = vld [vmem:[%s6700_s0 + $0x20] sm:$0xff]  ;;  %v3149_v16 = vld [vmem:[%s6700_s0 + $0x10] sm:$0xff]  ;;  %s4574_s19 = smov 64  }
   0x8   :  { %3727 = vmatpush3.bf16.msra.mxu0 %v4678_v7  ;;  %3754 = vmatpush3.bf16.msra.mxu1 %v4678_v7  ;;  %v3155_v15 = vld [vmem:[%s6700_s0 + $0x28] sm:$0xff]  ;;  %v3157_v17 = vld [vmem:[%s6700_s0 + $0x30] sm:$0xff]  ;;  %v3159_v18 = vld [vmem:[%s6700_s0 + $0x38] sm:$0xff] }
   0x9   :  { %3728 = vmatprep.subr.bf16.mxu0 %v6716_v3  ;;  %3755 = vmatprep.subr.bf16.mxu1 %v6716_v3  ;;  %v4779_v19 = vld [vmem:[%s6702_s2] ss:$0 sm:$0xff]  ;;  %v61_v8 = vld [vmem:[%s6705_s5 + $0x8] sm:$0xff]  ;;  %v63_v9 = vld [vmem:[%s6705_s5 + $0x18] sm:$0xff] }
   0xc   :  { %3730 = vmatpush3.bf16.msra.mxu0 %v4690_v10  ;;  %3757 = vmatpush3.bf16.msra.mxu1 %v4690_v10 }
   0xd   :  { %3731 = vmatprep.subr.bf16.mxu0 %v6716_v3  ;;  %3822 = vmatprep.subr.bf16.mxu1 %v6716_v3 }
   0xf   :  { %3505 = vmatmul.mubr.msk.f32.vlgmr.msra.gmra.mrb[0].mxu1 %vm425_vm1, %v3151_v11  ;;  %3460 = vmatmul.mubr.msk.f32.vlgmr.msra.gmra.mrb[0].mxu0 %vm425_vm1, %v418_v12  ;;  %v60_v11 = vld [vmem:[%s6705_s5] sm:$0xff]  ;;  %v4854_v12 = vpack.c.bf16 %v63_v9, %v61_v8 }
  0x10   :  { %3733 = vmatpush3.bf16.msra.mxu0 %v4667_v4  ;;  %3824 = vmatpush3.bf16.msra.mxu1 %v4667_v4  ;;  %v92_v9 = vld [vmem:[%s6705_s5 + $0x100] sm:$0xff] }
  0x11   :  { %3734 = vmatprep.subr.bf16.mxu0 %v6716_v3  ;;  %3825 = vmatprep.subr.bf16.mxu1 %v6716_v3 }
  0x12   :  { %3474 = vmatprep.mubr.msk.f32.mxu0 %vm4572_vm0, %v6718_v6  ;;  %3519 = vmatprep.mubr.msk.f32.mxu1 %vm4572_vm0, %v6718_v6 }
  0x14   :  { %3736 = vmatpush3.bf16.msra.mxu0 %v4678_v7  ;;  %3827 = vmatpush3.bf16.msra.mxu1 %v4678_v7 }
  0x15   :  { %3737 = vmatprep.subr.bf16.mxu0 %v6716_v3  ;;  %3828 = vmatprep.subr.bf16.mxu1 %v6716_v3 }
  0x18   :  { %3739 = vmatpush3.bf16.msra.mxu0 %v4690_v10  ;;  %3830 = vmatpush3.bf16.msra.mxu1 %v4690_v10 }
  0x19   :  { %3831 = vmatprep.subr.bf16.mxu1 %v6716_v3  ;;  %3740 = vmatprep.subr.bf16.mxu0 %v6716_v3 }
  0x1b   :  { %3475 = vmatmul.mubr.msk.f32.vlgmr.msra.gmra.mrb[2].mxu0 %vm425_vm1, %v3147_v13  ;;  %3520 = vmatmul.mubr.msk.f32.vlgmr.msra.gmra.mrb[2].mxu1 %vm425_vm1, %v3153_v14  ;;  %v62_v13 = vld [vmem:[%s6705_s5 + $0x10] sm:$0xff]  ;;  %v65_v14 = vld [vmem:[%s6705_s5 + $0x28] sm:$0xff] }
  0x1c   :  { %3833 = vmatpush3.bf16.msra.mxu1 %v4667_v4  ;;  %3534 = vmatprep.mubr.msk.f32.mxu1 %vm4572_vm0, %v6718_v6 }
  0x1d   :  { %3834 = vmatprep.subr.bf16.mxu1 %v6716_v3  ;;  %3742 = vmatpush3.bf16.msra.mxu0 %v4667_v4 }
  0x1e   :  { %3743 = vmatprep.subr.bf16.mxu0 %v6716_v3  ;;  %3489 = vmatprep.mubr.msk.f32.mxu0 %vm4572_vm0, %v6718_v6 }
  0x20   :  { %3836 = vmatpush3.bf16.msra.mxu1 %v4678_v7 }
  0x21   :  { %3837 = vmatprep.subr.bf16.mxu1 %v6716_v3  ;;  %3745 = vmatpush3.bf16.msra.mxu0 %v4678_v7 }
  0x22   :  { %3746 = vmatprep.subr.bf16.mxu0 %v6716_v3 }
  0x24   :  { %3839 = vmatpush3.bf16.msra.mxu1 %v4690_v10 }
  0x25   :  { %3840 = vmatprep.subr.bf16.mxu1 %v6716_v3  ;;  %3748 = vmatpush3.bf16.msra.mxu0 %v4690_v10 }
  0x26   :  { %3759 = vmatprep.subr.bf16.mxu0 %v4854_v12 }
  0x27   :  { %3535 = vmatmul.mubr.msk.f32.vlgmr.msra.gmra.mrb[4].mxu1 %vm425_vm1, %v3155_v15  ;;  %v67_v15 = vld [vmem:[%s6705_s5 + $0x38] sm:$0xff] }
  0x28   :  { %3842 = vmatpush3.bf16.msra.mxu1 %v4667_v4  ;;  %3549 = vmatprep.mubr.msk.f32.mxu1 %vm4572_vm0, %v6718_v6 }
  0x29   :  { %3843 = vmatprep.subr.bf16.mxu1 %v6716_v3  ;;  %3490 = vmatmul.mubr.msk.f32.vlgmr.msra.gmra.mrb[4].mxu0 %vm425_vm1, %v3149_v16  ;;  %v4865_v16 = vpack.c.bf16 %v62_v13, %v60_v11  ;;  %v94_v11 = vld [vmem:[%s6705_s5 + $0x110] sm:$0xff]  ;;  %v97_v13 = vld [vmem:[%s6705_s5 + $0x128] sm:$0xff] }
  0x2b   :  { %3761 = vmatpush1.bf16.msra.mxu0 %v4865_v16 }
  0x2c   :  { %3845 = vmatpush3.bf16.msra.mxu1 %v4678_v7 }
  0x2d   :  { %3846 = vmatprep.subr.bf16.mxu1 %v6716_v3 }
  0x30   :  { %3848 = vmatpush3.bf16.msra.mxu1 %v4690_v10 }
  0x31   :  { %3849 = vmatprep.subr.bf16.mxu1 %v6716_v3 }
  0x33   :  { %3550 = vmatmul.mubr.msk.f32.vlgmr.msra.gmra.mrb[6].mxu1 %vm425_vm1, %v3157_v17  ;;  %v4867_v17 = vpack.c.bf16 %v67_v15, %v65_v14  ;;  %v99_v14 = vld [vmem:[%s6705_s5 + $0x138] sm:$0xff]  ;;  %v5024_v15 = vpack.c.bf16 %v94_v11, %v92_v9 }
  0x34   :  { %3851 = vmatpush3.bf16.msra.mxu1 %v4667_v4  ;;  %3564 = vmatprep.mubr.msk.f32.mxu1 %vm4572_vm0, %v6718_v6 }
  0x35   :  { %3852 = vmatprep.subr.bf16.mxu1 %v6716_v3  ;;  %3763 = vmatprep.subr.bf16.mxu0 %v4867_v17 }
  0x38   :  { %3854 = vmatpush3.bf16.msra.mxu1 %v4678_v7 }
  0x39   :  { %3855 = vmatprep.subr.bf16.mxu1 %v6716_v3 }
  0x3c   :  { %3857 = vmatpush3.bf16.msra.mxu1 %v4690_v10 }
  0x3d   :  { %3859 = vmatprep.subr.bf16.mxu1 %v4854_v12 }
  0x3f   :  { %3565 = vmatmul.mubr.msk.f32.vlgmr.msra.gmra.mrb[8].mxu1 %vm425_vm1, %v3159_v18  ;;  %v64_v18 = vld [vmem:[%s6705_s5 + $0x20] sm:$0xff] }
  0x40   :  { %3861 = vmatpush1.bf16.msra.mxu1 %v4865_v16 }
  0x41   :  { %3863 = vmatprep.subr.bf16.mxu1 %v4867_v17 }
  0xe2   :  { %v791_v20 = vpop.f32.mrb[0].mxu1  ;;  %v495_v21 = vpop.f32.mrb[0].mxu0 }
  0xe3   :  { %v4782_v22 = vadd.f32 %v4779_v19, %v791_v20  ;;  %v3506_v23 = vpop.f32.mrb[1].mxu1  ;;  %v3461_v24 = vpop.f32.mrb[1].mxu0  ;;  %v4805_v43 = vadd.f32 %v4779_v19, %v495_v21  ;;  %v66_v20 = vld [vmem:[%s6705_s5 + $0x30] sm:$0xff]  ;;  %v69_v21 = vld [vmem:[%s6705_s5 + $0x48] sm:$0xff] }
  0xe4   :  { %v71_v23 = vld [vmem:[%s6705_s5 + $0x58] sm:$0xff]  ;;  %v4884_v24 = vpack.c.bf16 %v66_v20, %v64_v18  ;;  %v5028_v18 = vpack.c.bf16 %v99_v14, %v97_v13  ;;  %v96_v20 = vld [vmem:[%s6705_s5 + $0x120] sm:$0xff]  ;;  %v114_v14 = vld [vmem:[%s6705_s5 + $0x1b0] sm:$0xff] }
  0xe5   :  { %v795_v25 = vsel %vm499_vm2, %v4782_v22, 0.0  ;;  %v799_v26 = vmul.f32 %v4782_v22, %v4782_v22  ;;  %v500_v45 = vsel %vm499_vm2, %v4805_v43, 0.0  ;;  %v505_v46 = vmul.f32 %v4805_v43, %v4805_v43  ;;  %v112_v13 = vld [vmem:[%s6705_s5 + $0x1a0] sm:$0xff] }
  0xe6   :  { %796 = vadd.xlane.f32.xlu0 %v795_v25  ;;  %v4888_v25 = vpack.c.bf16 %v71_v23, %v69_v21  ;;  %3765 = vmatpush1.bf16.msra.mxu0 %v4884_v24  ;;  %v98_v21 = vld [vmem:[%s6705_s5 + $0x130] sm:$0xff]  ;;  %v101_v23 = vld [vmem:[%s6705_s5 + $0x148] sm:$0xff] }
  0xe7   :  { %v800_v27 = vsel %vm499_vm2, %v799_v26, 0.0  ;;  %v506_v50 = vsel %vm499_vm2, %v505_v46, 0.0  ;;  %v68_v26 = vld [vmem:[%s6705_s5 + $0x40] sm:$0xff]  ;;  %3865 = vmatpush1.bf16.msra.mxu1 %v4884_v24 }
  0xe8   :  { %801 = vadd.xlane.f32.xlu1 %v800_v27  ;;  %v70_v27 = vld [vmem:[%s6705_s5 + $0x50] sm:$0xff]  ;;  %3767 = vmatprep.subr.bf16.mxu0 %v4888_v25 }
  0xe9   :  { %3867 = vmatprep.subr.bf16.mxu1 %v4888_v25 }
  0xee   :  { %v603_v28 = vpop.f32.mrb[2].mxu0  ;;  %v1027_v29 = vpop.f32.mrb[2].mxu1 }
  0xef   :  { %v4790_v30 = vadd.f32 %v4779_v19, %v603_v28  ;;  %v3521_v31 = vpop.f32.mrb[3].mxu1  ;;  %v3476_v32 = vpop.f32.mrb[3].mxu0  ;;  %v4813_v49 = vadd.f32 %v4779_v19, %v1027_v29  ;;  %v73_v28 = vld [vmem:[%s6705_s5 + $0x68] sm:$0xff]  ;;  %v75_v29 = vld [vmem:[%s6705_s5 + $0x78] sm:$0xff] }
  0xf0   :  { %v4904_v31 = vpack.c.bf16 %v70_v27, %v68_v26  ;;  %v4908_v32 = vpack.c.bf16 %v75_v29, %v73_v28  ;;  %v103_v26 = vld [vmem:[%s6705_s5 + $0x158] sm:$0xff]  ;;  %v5044_v27 = vpack.c.bf16 %v98_v21, %v96_v20  ;;  %v100_v29 = vld [vmem:[%s6705_s5 + $0x140] sm:$0xff]  ;;  %v117_v20 = vld [vmem:[%s6705_s5 + $0x1c8] sm:$0xff] }
  0xf1   :  { %v607_v33 = vsel %vm499_vm2, %v4790_v30, 0.0  ;;  %v611_v34 = vmul.f32 %v4790_v30, %v4790_v30  ;;  %v1031_v51 = vsel %vm499_vm2, %v4813_v49, 0.0  ;;  %v1035_v52 = vmul.f32 %v4813_v49, %v4813_v49  ;;  %v119_v21 = vld [vmem:[%s6705_s5 + $0x1d8] sm:$0xff] }
  0xf2   :  { %608 = vadd.xlane.f32.xlu0 %v607_v33  ;;  %v72_v33 = vld [vmem:[%s6705_s5 + $0x60] sm:$0xff]  ;;  %3769 = vmatpush1.bf16.msra.mxu0 %v4904_v31  ;;  %v5048_v28 = vpack.c.bf16 %v103_v26, %v101_v23  ;;  %v5124_v26 = vpack.c.bf16 %v114_v14, %v112_v13 }
  0xf3   :  { %v612_v35 = vsel %vm499_vm2, %v611_v34, 0.0  ;;  %v1036_v53 = vsel %vm499_vm2, %v1035_v52, 0.0  ;;  %v74_v34 = vld [vmem:[%s6705_s5 + $0x70] sm:$0xff]  ;;  %3869 = vmatpush1.bf16.msra.mxu1 %v4904_v31  ;;  %3771 = vmatprep.subr.bf16.mxu0 %v4908_v32 }
  0xf4   :  { %613 = vadd.xlane.f32.xlu1 %v612_v35  ;;  %v77_v35 = vld [vmem:[%s6705_s5 + $0x88] sm:$0xff]  ;;  %3871 = vmatprep.subr.bf16.mxu1 %v4908_v32 }
  0xfa   :  { %v1121_v36 = vpop.f32.mrb[4].mxu1 }
  0xfb   :  { %v4798_v37 = vadd.f32 %v4779_v19, %v1121_v36  ;;  %v3536_v38 = vpop.f32.mrb[5].mxu1  ;;  %v79_v36 = vld [vmem:[%s6705_s5 + $0x98] sm:$0xff] }
  0xfc   :  { %v697_v39 = vpop.f32.mrb[4].mxu0  ;;  %v4924_v38 = vpack.c.bf16 %v74_v34, %v72_v33  ;;  %v102_v33 = vld [vmem:[%s6705_s5 + $0x150] sm:$0xff]  ;;  %v105_v34 = vld [vmem:[%s6705_s5 + $0x168] sm:$0xff] }
  0xfd   :  { %v1125_v40 = vsel %vm499_vm2, %v4798_v37, 0.0  ;;  %v1129_v41 = vmul.f32 %v4798_v37, %v4798_v37  ;;  %v3491_v42 = vpop.f32.mrb[5].mxu0  ;;  %v4829_v59 = vadd.f32 %v4779_v19, %v697_v39  ;;  %v4928_v39 = vpack.c.bf16 %v79_v36, %v77_v35  ;;  %v107_v35 = vld [vmem:[%s6705_s5 + $0x178] sm:$0xff] }
  0xfe   :  { %1126 = vadd.xlane.f32.xlu1 %v1125_v40  ;;  %v76_v40 = vld [vmem:[%s6705_s5 + $0x80] sm:$0xff]  ;;  %v81_v42 = vld [vmem:[%s6705_s5 + $0xa8] sm:$0xff]  ;;  %3773 = vmatpush1.bf16.msra.mxu0 %v4924_v38  ;;  %v5064_v36 = vpack.c.bf16 %v102_v33, %v100_v29  ;;  %v5128_v33 = vpack.c.bf16 %v119_v21, %v117_v20 }
  0xff   :  { %v1130_v44 = vsel %vm499_vm2, %v1129_v41, 0.0  ;;  %v701_v61 = vsel %vm499_vm2, %v4829_v59, 0.0  ;;  %v705_v62 = vmul.f32 %v4829_v59, %v4829_v59  ;;  %v78_v41 = vld [vmem:[%s6705_s5 + $0x90] sm:$0xff]  ;;  %3873 = vmatpush1.bf16.msra.mxu1 %v4924_v38  ;;  %3775 = vmatprep.subr.bf16.mxu0 %v4928_v39 }
 0x100   :  { %3875 = vmatprep.subr.bf16.mxu1 %v4928_v39 }
 0x101   :  { %v706_v63 = vsel %vm499_vm2, %v705_v62, 0.0  ;;  %v88_v62 = vld [vmem:[%s6705_s5 + $0xe0] sm:$0xff] }
 0x102   :  { %1131 = vadd.xlane.f32.xlu1 %v1130_v44  ;;  %v83_v44 = vld [vmem:[%s6705_s5 + $0xb8] sm:$0xff] }
 0x103   :  { %v4948_v46 = vpack.c.bf16 %v83_v44, %v81_v42  ;;  %v106_v42 = vld [vmem:[%s6705_s5 + $0x170] sm:$0xff]  ;;  %v109_v44 = vld [vmem:[%s6705_s5 + $0x188] sm:$0xff] }
 0x106   :  { %v1215_v47 = vpop.f32.mrb[6].mxu1  ;;  %501 = vadd.xlane.f32.xlu1 %v500_v45  ;;  %v4944_v45 = vpack.c.bf16 %v78_v41, %v76_v40  ;;  %v5068_v40 = vpack.c.bf16 %v107_v35, %v105_v34  ;;  %v104_v41 = vld [vmem:[%s6705_s5 + $0x160] sm:$0xff]  ;;  %v118_v35 = vld [vmem:[%s6705_s5 + $0x1d0] sm:$0xff] }
 0x107   :  { %v3551_v48 = vpop.f32.mrb[7].mxu1  ;;  %v4838_v0 = vadd.f32 %v4779_v19, %v1215_v47  ;;  %v80_v47 = vld [vmem:[%s6705_s5 + $0xa0] sm:$0xff] }
 0x108   :  { %v82_v48 = vld [vmem:[%s6705_s5 + $0xb0] sm:$0xff]  ;;  %3777 = vmatpush1.bf16.msra.mxu0 %v4944_v45  ;;  %3877 = vmatpush1.bf16.msra.mxu1 %v4944_v45  ;;  %v116_v34 = vld [vmem:[%s6705_s5 + $0x1c0] sm:$0xff] }
 0x109   :  { %v1219_v1 = vsel %vm499_vm2, %v4838_v0, 0.0  ;;  %v1223_v2 = vmul.f32 %v4838_v0, %v4838_v0  ;;  %v4964_v52 = vpack.c.bf16 %v82_v48, %v80_v47  ;;  %3779 = vmatprep.subr.bf16.mxu0 %v4948_v46  ;;  %3879 = vmatprep.subr.bf16.mxu1 %v4948_v46  ;;  %v111_v47 = vld [vmem:[%s6705_s5 + $0x198] sm:$0xff]  ;;  %v5084_v48 = vpack.c.bf16 %v106_v42, %v104_v41  ;;  %v121_v41 = vld [vmem:[%s6705_s5 + $0x1e8] sm:$0xff] }
 0x10a   :  { %507 = vadd.xlane.f32.xlu1 %v506_v50  ;;  %v85_v50 = vld [vmem:[%s6705_s5 + $0xc8] sm:$0xff]  ;;  %v123_v42 = vld [vmem:[%s6705_s5 + $0x1f8] sm:$0xff] }
 0x10b   :  { %v1224_v5 = vsel %vm499_vm2, %v1223_v2, 0.0  ;;  %v95_v2 = vld [vmem:[%s6705_s5 + $0x118] sm:$0xff] }
 0x10c   :  { %3781 = vmatpush1.bf16.msra.mxu0 %v4964_v52  ;;  %3881 = vmatpush1.bf16.msra.mxu1 %v4964_v52 }
 0x10e   :  { %1032 = vadd.xlane.f32.xlu1 %v1031_v51  ;;  %v87_v51 = vld [vmem:[%s6705_s5 + $0xd8] sm:$0xff] }
 0x112   :  { %v1309_v54 = vpop.f32.mrb[8].mxu1  ;;  %1037 = vadd.xlane.f32.xlu1 %v1036_v53  ;;  %v4968_v53 = vpack.c.bf16 %v87_v51, %v85_v50  ;;  %v5088_v50 = vpack.c.bf16 %v111_v47, %v109_v44  ;;  %v108_v51 = vld [vmem:[%s6705_s5 + $0x180] sm:$0xff]  ;;  %v5144_v44 = vpack.c.bf16 %v118_v35, %v116_v34  ;;  %v122_v34 = vld [vmem:[%s6705_s5 + $0x1f0] sm:$0xff] }
 0x113   :  { %v4822_v55 = vadd.f32 %v4779_v19, %v1309_v54  ;;  %v3566_v56 = vpop.f32.mrb[9].mxu1  ;;  %v84_v54 = vld [vmem:[%s6705_s5 + $0xc0] sm:$0xff] }
 0x114   :  { %v86_v56 = vld [vmem:[%s6705_s5 + $0xd0] sm:$0xff]  ;;  %3783 = vmatprep.subr.bf16.mxu0 %v4968_v53  ;;  %3883 = vmatprep.subr.bf16.mxu1 %v4968_v53  ;;  %v5165_v35 = vld [vmem:[%s6703_s3] ss:$0 sm:$0xff] }
 0x115   :  { %v1313_v57 = vsel %vm499_vm2, %v4822_v55, 0.0  ;;  %v1317_v58 = vmul.f32 %v4822_v55, %v4822_v55 }
 0x116   :  { %1314 = vadd.xlane.f32.xlu0 %v1313_v57  ;;  %v89_v57 = vld [vmem:[%s6705_s5 + $0xe8] sm:$0xff] }
 0x117   :  { %v1318_v60 = vsel %vm499_vm2, %v1317_v58, 0.0  ;;  %v91_v58 = vld [vmem:[%s6705_s5 + $0xf8] sm:$0xff] }
 0x11a   :  { %1319 = vadd.xlane.f32.xlu0 %v1318_v60  ;;  %v4984_v60 = vpack.c.bf16 %v86_v56, %v84_v54  ;;  %v110_v54 = vld [vmem:[%s6705_s5 + $0x190] sm:$0xff] }
 0x11c   :  { %3785 = vmatpush1.bf16.msra.mxu0 %v4984_v60  ;;  %3885 = vmatpush1.bf16.msra.mxu1 %v4984_v60 }
 0x11e   :  { %702 = vadd.xlane.f32.xlu0 %v701_v61  ;;  %v4988_v61 = vpack.c.bf16 %v91_v58, %v89_v57  ;;  %v113_v57 = vld [vmem:[%s6705_s5 + $0x1a8] sm:$0xff]  ;;  %v115_v58 = vld [vmem:[%s6705_s5 + $0x1b8] sm:$0xff] }
 0x11f   :  { %v5108_v11 = vpack.c.bf16 %v115_v58, %v113_v57 }
 0x120   :  { %3787 = vmatprep.subr.bf16.mxu0 %v4988_v61  ;;  %3887 = vmatprep.subr.bf16.mxu1 %v4988_v61 }
 0x122   :  { %707 = vadd.xlane.f32.xlu0 %v706_v63  ;;  %v90_v63 = vld [vmem:[%s6705_s5 + $0xf0] sm:$0xff] }
 0x126   :  { %1220 = vadd.xlane.f32.xlu0 %v1219_v1  ;;  %v93_v1 = vld [vmem:[%s6705_s5 + $0x108] sm:$0xff] }
 0x127   :  { %v5008_v8 = vpack.c.bf16 %v95_v2, %v93_v1  ;;  %v5104_v1 = vpack.c.bf16 %v110_v54, %v108_v51  ;;  %v5148_v51 = vpack.c.bf16 %v123_v42, %v121_v41 }
 0x12a   :  { %1225 = vadd.xlane.f32.xlu0 %v1224_v5  ;;  %v5004_v5 = vpack.c.bf16 %v90_v63, %v88_v62 }
 0x12c   :  { %3789 = vmatpush1.bf16.msra.mxu0 %v5004_v5  ;;  %3889 = vmatpush1.bf16.msra.mxu1 %v5004_v5 }
 0x12d   :  { %3791 = vmatprep.subr.bf16.mxu0 %v5008_v8  ;;  %3891 = vmatprep.subr.bf16.mxu1 %v5008_v8 }
 0x130   :  { %3793 = vmatpush1.bf16.msra.mxu0 %v5024_v15  ;;  %3893 = vmatpush1.bf16.msra.mxu1 %v5024_v15 }
 0x131   :  { %3795 = vmatprep.subr.bf16.mxu0 %v5028_v18  ;;  %3895 = vmatprep.subr.bf16.mxu1 %v5028_v18 }
 0x134   :  { %3797 = vmatpush1.bf16.msra.mxu0 %v5044_v27  ;;  %3897 = vmatpush1.bf16.msra.mxu1 %v5044_v27 }
 0x135   :  { %3799 = vmatprep.subr.bf16.mxu0 %v5048_v28  ;;  %3899 = vmatprep.subr.bf16.mxu1 %v5048_v28 }
 0x138   :  { %3801 = vmatpush1.bf16.msra.mxu0 %v5064_v36  ;;  %3901 = vmatpush1.bf16.msra.mxu1 %v5064_v36 }
 0x139   :  { %3803 = vmatprep.subr.bf16.mxu0 %v5068_v40  ;;  %3903 = vmatprep.subr.bf16.mxu1 %v5068_v40 }
 0x13c   :  { %3805 = vmatpush1.bf16.msra.mxu0 %v5084_v48  ;;  %3905 = vmatpush1.bf16.msra.mxu1 %v5084_v48 }
 0x13d   :  { %3807 = vmatprep.subr.bf16.mxu0 %v5088_v50  ;;  %3907 = vmatprep.subr.bf16.mxu1 %v5088_v50 }
 0x140   :  { %3809 = vmatpush1.bf16.msra.mxu0 %v5104_v1  ;;  %3909 = vmatpush1.bf16.msra.mxu1 %v5104_v1 }
 0x141   :  { %3811 = vmatprep.subr.bf16.mxu0 %v5108_v11  ;;  %3911 = vmatprep.subr.bf16.mxu1 %v5108_v11 }
 0x144   :  { %3813 = vmatpush1.bf16.msra.mxu0 %v5124_v26  ;;  %3913 = vmatpush1.bf16.msra.mxu1 %v5124_v26 }
 0x145   :  { %3815 = vmatprep.subr.bf16.mxu0 %v5128_v33  ;;  %3915 = vmatprep.subr.bf16.mxu1 %v5128_v33 }
 0x148   :  { %3817 = vmatpush1.bf16.msra.mxu0 %v5144_v44  ;;  %3917 = vmatpush1.bf16.msra.mxu1 %v5144_v44 }
 0x149   :  { %3819 = vmatprep.subr.bf16.mxu0 %v5148_v51  ;;  %3919 = vmatprep.subr.bf16.mxu1 %v5148_v51 }
 0x173   :  { %v797_v56 = vpop.xlane.xlu0 %796 }
 0x174   :  { %v798_v62 = vmul.f32 0.015625, %v797_v56 }
 0x175   :  { %v802_v63 = vpop.xlane.xlu1 %801 }
 0x176   :  { %v804_v2 = vmul.f32 %v798_v62, %v798_v62  ;;  %v803_v9 = vmul.f32 0.015625, %v802_v63  ;;  %v807_v20 = vsub.f32 %v4782_v22, %v798_v62 }
 0x178   :  { %v805_v23 = vsub.f32 %v803_v9, %v804_v2 }
 0x17a   :  { %v806_v29 = vmax.f32 %v805_v23, 0.0 }
 0x17c   :  { %v808_v47 = vadd.f32 1e-06, %v806_v29  ;;  %v120_v29 = vld [vmem:[%s6705_s5 + $0x1e0] sm:$0xff] }
 0x17d   :  { %v5167_v41 = vpack.c.bf16 %v122_v34, %v120_v29 }
 0x17e   :  { %4502 = vrsqrt.f32 %v808_v47 }
 0x17f   :  { %v609_v54 = vpop.xlane.xlu0 %608  ;;  %3821 = vmatpush1.bf16.msra.mxu0 %v5167_v41  ;;  %3921 = vmatpush1.bf16.msra.mxu1 %v5167_v41 }
 0x180   :  { %v610_v56 = vmul.f32 0.015625, %v609_v54  ;;  %3922 = vmatprep.subr.bf16.mxu0 %v6716_v3  ;;  %4022 = vmatprep.subr.bf16.mxu1 %v6716_v3  ;;  %v5178_v54 = vld [vmem:[%s6704_s4] ss:$0 sm:$0xff] }
 0x181   :  { %v614_v57 = vpop.xlane.xlu1 %613 }
 0x182   :  { %v616_v58 = vmul.f32 %v610_v56, %v610_v56  ;;  %v615_v63 = vmul.f32 0.015625, %v614_v57  ;;  %v619_v22 = vsub.f32 %v4790_v30, %v610_v56 }
 0x184   :  { %v617_v2 = vsub.f32 %v615_v63, %v616_v58 }
 0x186   :  { %v618_v9 = vmax.f32 %v617_v2, 0.0 }
 0x188   :  { %v620_v13 = vadd.f32 1e-06, %v618_v9  ;;  %v4503_v14 = vpop.eup %4502 }
 0x189   :  { %v810_v23 = vmul.f32 %v4503_v14, %v807_v20 }
 0x18a   :  { %4504 = vrsqrt.f32 %v620_v13 }
 0x18b   :  { %v1127_v21 = vpop.xlane.xlu1 %1126  ;;  %v811_v62 = vmul.f32 %v5165_v35, %v810_v23 }
 0x18c   :  { %v1128_v47 = vmul.f32 0.015625, %v1127_v21 }
 0x18d   :  { %v812_v2 = vadd.f32 %v5178_v54, %v811_v62 }
 0x18e   :  { %v1134_v30 = vmul.f32 %v1128_v47, %v1128_v47 }
 0x18f   :  { %v1132_v57 = vpop.xlane.xlu1 %1131  ;;  %v813_v14 = vmax.f32 %v812_v2, 0.0  ;;  %v1137_v2 = vsub.f32 %v4798_v37, %v1128_v47 }
 0x190   :  { %v1133_v56 = vmul.f32 0.015625, %v1132_v57 }
 0x192   :  { %v1135_v20 = vsub.f32 %v1133_v56, %v1134_v30 }
 0x194   :  { %v4505_v42 = vpop.eup %4504  ;;  %v1136_v21 = vmax.f32 %v1135_v20, 0.0 }
 0x195   :  { %v622_v58 = vmul.f32 %v4505_v42, %v619_v22 }
 0x196   :  { %v1138_v34 = vadd.f32 1e-06, %v1136_v21 }
 0x197   :  { %v623_v63 = vmul.f32 %v5165_v35, %v622_v58 }
 0x198   :  { %4506 = vrsqrt.f32 %v1138_v34 }
 0x199   :  { %v624_v9 = vadd.f32 %v5178_v54, %v623_v63 }
 0x19b   :  { %v625_v13 = vmax.f32 %v624_v9, 0.0 }
 0x19d   :  { %v4477_v23 = vpack.i.bf16 %v625_v13, %v813_v14 }
 0x19f   :  { %4478 = vrot.lane.b32.xlu0 %v4477_v23, %s4574_s19 }
 0x1a2   :  { %v4507_v63 = vpop.eup %4506 }
 0x1a3   :  { %v1315_v29 = vpop.xlane.xlu0 %1314  ;;  %v1140_v30 = vmul.f32 %v4507_v63, %v1137_v2 }
 0x1a4   :  { %v1316_v3 = vmul.f32 0.015625, %v1315_v29 }
 0x1a5   :  { %v1141_v9 = vmul.f32 %v5165_v35, %v1140_v30 }
 0x1a6   :  { %v1322_v42 = vmul.f32 %v1316_v3, %v1316_v3  ;;  %v1325_v56 = vsub.f32 %v4822_v55, %v1316_v3 }
 0x1a7   :  { %v1320_v22 = vpop.xlane.xlu0 %1319  ;;  %v1142_v20 = vadd.f32 %v5178_v54, %v1141_v9 }
 0x1a8   :  { %v1321_v58 = vmul.f32 0.015625, %v1320_v22  ;;  %v502_v22 = vpop.xlane.xlu1 %501 }
 0x1a9   :  { %v1143_v29 = vmax.f32 %v1142_v20, 0.0 }
 0x1aa   :  { %v1323_v62 = vsub.f32 %v1321_v58, %v1322_v42  ;;  %v504_v42 = vmul.f32 0.015625, %v502_v22 }
 0x1ab   :  { %v703_v37 = vpop.xlane.xlu0 %702 }
 0x1ac   :  { %v1324_v6 = vmax.f32 %v1323_v62, 0.0  ;;  %v508_v47 = vpop.xlane.xlu1 %507  ;;  %v704_v55 = vmul.f32 0.015625, %v703_v37  ;;  %v510_v63 = vmul.f32 %v504_v42, %v504_v42 }
 0x1ad   :  { %v509_v58 = vmul.f32 0.015625, %v508_v47 }
 0x1ae   :  { %v1326_v57 = vadd.f32 1e-06, %v1324_v6  ;;  %v710_v62 = vmul.f32 %v704_v55, %v704_v55 }
 0x1af   :  { %v708_v3 = vpop.xlane.xlu0 %707  ;;  %v511_v2 = vsub.f32 %v509_v58, %v510_v63 }
 0x1b0   :  { %4508 = vrsqrt.f32 %v1326_v57  ;;  %v709_v57 = vmul.f32 0.015625, %v708_v3 }
 0x1b2   :  { %v711_v30 = vsub.f32 %v709_v57, %v710_v62 }
 0x1b4   :  { %v712_v9 = vmax.f32 %v711_v30, 0.0 }
 0x1ba   :  { %v4509_v13 = vpop.eup %4508 }
 0x1bb   :  { %v1328_v14 = vmul.f32 %v4509_v13, %v1325_v56  ;;  %v512_v56 = vmax.f32 %v511_v2, 0.0 }
 0x1bd   :  { %v1329_v23 = vmul.f32 %v5165_v35, %v1328_v14  ;;  %v514_v13 = vadd.f32 1e-06, %v512_v56  ;;  %v714_v14 = vadd.f32 1e-06, %v712_v9 }
 0x1bf   :  { %v1330_v21 = vadd.f32 %v5178_v54, %v1329_v23  ;;  %4510 = vrsqrt.f32 %v514_v13 }
 0x1c0   :  { %4512 = vrsqrt.f32 %v714_v14 }
 0x1c1   :  { %v1331_v34 = vmax.f32 %v1330_v21, 0.0  ;;  %v513_v21 = vsub.f32 %v4805_v43, %v504_v42 }
 0x1c3   :  { %v4482_v6 = vpack.i.bf16 %v1143_v29, %v1331_v34  ;;  %v1033_v29 = vpop.xlane.xlu1 %1032  ;;  %v713_v34 = vsub.f32 %v4829_v59, %v704_v55 }
 0x1c4   :  { %v1034_v62 = vmul.f32 0.015625, %v1033_v29 }
 0x1c5   :  { %4483 = vrot.lane.b32.xlu1 %v4482_v6, %s4574_s19  ;;  %v1221_v6 = vpop.xlane.xlu0 %1220 }
 0x1c6   :  { %v1222_v2 = vmul.f32 0.015625, %v1221_v6  ;;  %v1040_v43 = vmul.f32 %v1034_v62, %v1034_v62 }
 0x1c7   :  { %v1038_v47 = vpop.xlane.xlu1 %1037 }
 0x1c8   :  { %v1039_v63 = vmul.f32 0.015625, %v1038_v47  ;;  %v1228_v59 = vmul.f32 %v1222_v2, %v1222_v2  ;;  %v6721_v47 = vmov 0.0|0.0  }
 0x1c9   :  { %v4511_v20 = vpop.eup %4510  ;;  %v1226_v57 = vpop.xlane.xlu0 %1225 }
 0x1ca   :  { %v4513_v23 = vpop.eup %4512  ;;  %v516_v37 = vmul.f32 %v4511_v20, %v513_v21  ;;  %v1227_v42 = vmul.f32 0.015625, %v1226_v57  ;;  %v1041_v9 = vsub.f32 %v1039_v63, %v1040_v43  ;;  %v3161_v57 = vld [vmem:[%s6700_s0 + $0x40] sm:$0xff]  ;;  %v1231_v43 = vsub.f32 %v4838_v0, %v1222_v2 }
 0x1cb   :  { %v716_v22 = vmul.f32 %v4513_v23, %v713_v34 }
 0x1cc   :  { %v523_v58 = vmul.f32 %v5165_v35, %v516_v37  ;;  %v1229_v21 = vsub.f32 %v1227_v42, %v1228_v59  ;;  %v1042_v6 = vmax.f32 %v1041_v9, 0.0  ;;  %v6720_v37 = vmov 0.0   ;;  %v3163_v42 = vld [vmem:[%s6700_s0 + $0x48] sm:$0xff] }
 0x1cd   :  { %v717_v3 = vmul.f32 %v5165_v35, %v716_v22 }
 0x1ce   :  { %v530_v56 = vadd.f32 %v5178_v54, %v523_v58  ;;  %v1230_v22 = vmax.f32 %v1229_v21, 0.0 }
 0x1cf   :  { %v718_v30 = vadd.f32 %v5178_v54, %v717_v3  ;;  %v1044_v3 = vadd.f32 1e-06, %v1042_v6  ;;  %v3167_v6 = vld [vmem:[%s6700_s0 + $0x58] sm:$0xff] }
 0x1d0   :  { %v531_v23 = vmax.f32 %v530_v56, 0.0  ;;  %v1232_v58 = vadd.f32 1e-06, %v1230_v22  ;;  %v1043_v56 = vsub.f32 %v4813_v49, %v1034_v62  ;;  %v3169_v22 = vld [vmem:[%s6700_s0 + $0x60] sm:$0xff] }
 0x1d1   :  { %v719_v20 = vmax.f32 %v718_v30, 0.0  ;;  %4514 = vrsqrt.f32 %v1044_v3  ;;  %v3171_v3 = vld [vmem:[%s6700_s0 + $0x68] sm:$0xff] }
 0x1d2   :  { %4516 = vrsqrt.f32 %v1232_v58  ;;  %v3173_v58 = vld [vmem:[%s6700_s0 + $0x70] sm:$0xff] }
 0x1db   :  { %v4515_v63 = vpop.eup %4514 }
 0x1dc   :  { %v4517_v30 = vpop.eup %4516  ;;  %v1046_v59 = vmul.f32 %v4515_v63, %v1043_v56 }
 0x1dd   :  { %v1234_v9 = vmul.f32 %v4517_v30, %v1231_v43 }
 0x1de   :  { %v1047_v0 = vmul.f32 %v5165_v35, %v1046_v59 }
 0x1df   :  { %v1235_v49 = vmul.f32 %v5165_v35, %v1234_v9 }
 0x1e0   :  { %v1048_v2 = vadd.f32 %v5178_v54, %v1047_v0 }
 0x1e1   :  { %v1236_v62 = vadd.f32 %v5178_v54, %v1235_v49 }
 0x1e2   :  { %v1049_v21 = vmax.f32 %v1048_v2, 0.0 }
 0x211   :  { %v4479_v55 = vpop.permute.xlu0 %4478 }
 0x212   :  { %v4481_v13 = vunpack.i.h.bf16 %v4479_v55  ;;  %v4480_v14 = vunpack.i.l.bf16 %v4479_v55 }
 0x214   :  { %v823_v34 = vsel %vm499_vm2, %v719_v20, %v4480_v14  ;;  %v822_v29 = vsel %vm499_vm2, %v531_v23, %v4481_v13  ;;  %v3165_v13 = vld [vmem:[%s6700_s0 + $0x50] sm:$0xff]  ;;  %v1237_v23 = vmax.f32 %v1236_v62, 0.0 }
 0x215   :  { %899 = vmatprep.mubr.f32.mxu0 %v823_v34 }
 0x216   :  { %900 = vmatmul.mubr.f32.vlgmr.msra.gmra.mrb[6].mxu0 %v822_v29 }
 0x217   :  { %3924 = vmatpush3.bf16.msra.mxu0 %v4667_v4  ;;  %3579 = vmatprep.mubr.msk.f32.mxu0 %vm4572_vm0, %v6720_v37 }
 0x218   :  { %3925 = vmatprep.subr.bf16.mxu0 %v6721_v47 }
 0x21b   :  { %3927 = vmatpush3.bf16.msra.mxu0 %v4678_v7 }
 0x21c   :  { %3928 = vmatprep.subr.bf16.mxu0 %v6721_v47 }
 0x21f   :  { %3930 = vmatpush3.bf16.msra.mxu0 %v4690_v10 }
 0x220   :  { %3931 = vmatprep.subr.bf16.mxu0 %v6721_v47 }
 0x222   :  { %3580 = vmatmul.mubr.msk.f32.vlgmr.msra.gmra.mrb[8].mxu0 %vm425_vm1, %v3161_v57 }
 0x223   :  { %3933 = vmatpush3.bf16.msra.mxu0 %v4667_v4  ;;  %3594 = vmatprep.mubr.msk.f32.mxu0 %vm4572_vm0, %v6720_v37 }
 0x224   :  { %3934 = vmatprep.subr.bf16.mxu0 %v6721_v47 }
 0x227   :  { %3936 = vmatpush3.bf16.msra.mxu0 %v4678_v7 }
 0x228   :  { %3937 = vmatprep.subr.bf16.mxu0 %v6721_v47 }
 0x22b   :  { %3939 = vmatpush3.bf16.msra.mxu0 %v4690_v10 }
 0x22c   :  { %3940 = vmatprep.subr.bf16.mxu0 %v6721_v47 }
 0x22e   :  { %3595 = vmatmul.mubr.msk.f32.vlgmr.msra.gmra.mrb[10].mxu0 %vm425_vm1, %v3163_v42 }
 0x22f   :  { %3942 = vmatpush3.bf16.msra.mxu0 %v4667_v4  ;;  %3609 = vmatprep.mubr.msk.f32.mxu0 %vm4572_vm0, %v6720_v37 }
 0x230   :  { %3943 = vmatprep.subr.bf16.mxu0 %v6721_v47 }
 0x233   :  { %3945 = vmatpush3.bf16.msra.mxu0 %v4678_v7 }
 0x234   :  { %3946 = vmatprep.subr.bf16.mxu0 %v6721_v47 }
 0x237   :  { %3948 = vmatpush3.bf16.msra.mxu0 %v4690_v10  ;;  %v4484_v55 = vpop.permute.xlu1 %4483 }
 0x238   :  { %v4486_v14 = vunpack.i.h.bf16 %v4484_v55  ;;  %v4485_v20 = vunpack.i.l.bf16 %v4484_v55  ;;  %3949 = vmatprep.subr.bf16.mxu0 %v6721_v47 }
 0x23a   :  { %3610 = vmatmul.mubr.msk.f32.vlgmr.msra.gmra.mrb[12].mxu0 %vm425_vm1, %v3165_v13  ;;  %v1341_v34 = vsel %vm499_vm2, %v1237_v23, %v4485_v20  ;;  %v1340_v29 = vsel %vm499_vm2, %v1049_v21, %v4486_v14 }
 0x23b   :  { %3951 = vmatpush3.bf16.msra.mxu0 %v4667_v4  ;;  %1406 = vmatprep.mubr.f32.mxu1 %v1341_v34 }
 0x23c   :  { %1407 = vmatmul.mubr.f32.vlgmr.msra.gmra.mrb[10].mxu1 %v1340_v29  ;;  %3952 = vmatprep.subr.bf16.mxu0 %v6721_v47 }
 0x23d   :  { %4024 = vmatpush3.bf16.msra.mxu1 %v4667_v4  ;;  %3624 = vmatprep.mubr.msk.f32.mxu0 %vm4572_vm0, %v6720_v37 }
 0x23e   :  { %4025 = vmatprep.subr.bf16.mxu1 %v6721_v47  ;;  %3639 = vmatprep.mubr.msk.f32.mxu1 %vm4572_vm0, %v6720_v37 }
 0x23f   :  { %3954 = vmatpush3.bf16.msra.mxu0 %v4678_v7 }
 0x240   :  { %3955 = vmatprep.subr.bf16.mxu0 %v6721_v47 }
 0x241   :  { %4027 = vmatpush3.bf16.msra.mxu1 %v4678_v7 }
 0x242   :  { %4028 = vmatprep.subr.bf16.mxu1 %v6721_v47 }
 0x243   :  { %3957 = vmatpush3.bf16.msra.mxu0 %v4690_v10 }
 0x244   :  { %3959 = vmatprep.subr.bf16.mxu0 %v4854_v12 }
 0x245   :  { %4030 = vmatpush3.bf16.msra.mxu1 %v4690_v10 }
 0x246   :  { %3625 = vmatmul.mubr.msk.f32.vlgmr.msra.gmra.mrb[14].mxu0 %vm425_vm1, %v3167_v6  ;;  %4031 = vmatprep.subr.bf16.mxu1 %v6721_v47 }
 0x247   :  { %3961 = vmatpush1.bf16.msra.mxu0 %v4865_v16 }
 0x248   :  { %3640 = vmatmul.mubr.msk.f32.vlgmr.msra.gmra.mrb[12].mxu1 %vm425_vm1, %v3169_v22  ;;  %3963 = vmatprep.subr.bf16.mxu0 %v4867_v17 }
 0x249   :  { %4033 = vmatpush3.bf16.msra.mxu1 %v4667_v4  ;;  %3654 = vmatprep.mubr.msk.f32.mxu1 %vm4572_vm0, %v6720_v37 }
 0x24a   :  { %4034 = vmatprep.subr.bf16.mxu1 %v6721_v47 }
 0x24b   :  { %3965 = vmatpush1.bf16.msra.mxu0 %v4884_v24 }
 0x24c   :  { %3967 = vmatprep.subr.bf16.mxu0 %v4888_v25 }
 0x24d   :  { %4036 = vmatpush3.bf16.msra.mxu1 %v4678_v7 }
 0x24e   :  { %4037 = vmatprep.subr.bf16.mxu1 %v6721_v47 }
 0x24f   :  { %3969 = vmatpush1.bf16.msra.mxu0 %v4904_v31 }
 0x250   :  { %3971 = vmatprep.subr.bf16.mxu0 %v4908_v32 }
 0x251   :  { %4039 = vmatpush3.bf16.msra.mxu1 %v4690_v10 }
 0x252   :  { %4040 = vmatprep.subr.bf16.mxu1 %v6721_v47 }
 0x253   :  { %3973 = vmatpush1.bf16.msra.mxu0 %v4924_v38 }
 0x254   :  { %3655 = vmatmul.mubr.msk.f32.vlgmr.msra.gmra.mrb[14].mxu1 %vm425_vm1, %v3171_v3  ;;  %3975 = vmatprep.subr.bf16.mxu0 %v4928_v39 }
 0x255   :  { %4042 = vmatpush3.bf16.msra.mxu1 %v4667_v4  ;;  %3669 = vmatprep.mubr.msk.f32.mxu1 %vm4572_vm0, %v6720_v37 }
 0x256   :  { %4043 = vmatprep.subr.bf16.mxu1 %v6721_v47 }
 0x257   :  { %3977 = vmatpush1.bf16.msra.mxu0 %v4944_v45 }
 0x258   :  { %3979 = vmatprep.subr.bf16.mxu0 %v4948_v46 }
 0x259   :  { %4045 = vmatpush3.bf16.msra.mxu1 %v4678_v7 }
 0x25a   :  { %4046 = vmatprep.subr.bf16.mxu1 %v6721_v47 }
 0x25b   :  { %3981 = vmatpush1.bf16.msra.mxu0 %v4964_v52 }
 0x25c   :  { %3983 = vmatprep.subr.bf16.mxu0 %v4968_v53 }
 0x25d   :  { %4048 = vmatpush3.bf16.msra.mxu1 %v4690_v10 }
 0x25e   :  { %4049 = vmatprep.subr.bf16.mxu1 %v6721_v47 }
 0x25f   :  { %3985 = vmatpush1.bf16.msra.mxu0 %v4984_v60 }
 0x260   :  { %3670 = vmatmul.mubr.msk.f32.vlgmr.msra.gmra.mrb[16].mxu1 %vm425_vm1, %v3173_v58  ;;  %3987 = vmatprep.subr.bf16.mxu0 %v4988_v61 }
 0x261   :  { %4051 = vmatpush3.bf16.msra.mxu1 %v4667_v4  ;;  %3684 = vmatprep.mubr.msk.f32.mxu1 %vm4572_vm0, %v6720_v37  ;;  %v3175_v4 = vld [vmem:[%s6700_s0 + $0x78] sm:$0xff] }
 0x262   :  { %4052 = vmatprep.subr.bf16.mxu1 %v6721_v47 }
 0x263   :  { %3989 = vmatpush1.bf16.msra.mxu0 %v5004_v5 }
 0x264   :  { %3991 = vmatprep.subr.bf16.mxu0 %v5008_v8 }
 0x265   :  { %4054 = vmatpush3.bf16.msra.mxu1 %v4678_v7 }
 0x266   :  { %4055 = vmatprep.subr.bf16.mxu1 %v6721_v47 }
 0x267   :  { %3993 = vmatpush1.bf16.msra.mxu0 %v5024_v15 }
 0x268   :  { %3995 = vmatprep.subr.bf16.mxu0 %v5028_v18 }
 0x269   :  { %4057 = vmatpush3.bf16.msra.mxu1 %v4690_v10 }
 0x26a   :  { %4059 = vmatprep.subr.bf16.mxu1 %v4854_v12 }
 0x26b   :  { %3997 = vmatpush1.bf16.msra.mxu0 %v5044_v27 }
 0x26c   :  { %3685 = vmatmul.mubr.msk.f32.vlgmr.msra.gmra.mrb[18].mxu1 %vm425_vm1, %v3175_v4  ;;  %3999 = vmatprep.subr.bf16.mxu0 %v5048_v28 }
 0x26d   :  { %4061 = vmatpush1.bf16.msra.mxu1 %v4865_v16 }
 0x26e   :  { %4063 = vmatprep.subr.bf16.mxu1 %v4867_v17 }
 0x26f   :  { %4001 = vmatpush1.bf16.msra.mxu0 %v5064_v36 }
 0x270   :  { %4003 = vmatprep.subr.bf16.mxu0 %v5068_v40 }
 0x271   :  { %4065 = vmatpush1.bf16.msra.mxu1 %v4884_v24 }
 0x272   :  { %4067 = vmatprep.subr.bf16.mxu1 %v4888_v25 }
 0x273   :  { %4005 = vmatpush1.bf16.msra.mxu0 %v5084_v48 }
 0x274   :  { %4007 = vmatprep.subr.bf16.mxu0 %v5088_v50 }
 0x275   :  { %4069 = vmatpush1.bf16.msra.mxu1 %v4904_v31 }
 0x276   :  { %4071 = vmatprep.subr.bf16.mxu1 %v4908_v32 }
 0x277   :  { %4009 = vmatpush1.bf16.msra.mxu0 %v5104_v1 }
 0x278   :  { %4011 = vmatprep.subr.bf16.mxu0 %v5108_v11 }
 0x279   :  { %4073 = vmatpush1.bf16.msra.mxu1 %v4924_v38 }
 0x27a   :  { %4075 = vmatprep.subr.bf16.mxu1 %v4928_v39 }
 0x27b   :  { %4013 = vmatpush1.bf16.msra.mxu0 %v5124_v26 }
 0x27c   :  { %4015 = vmatprep.subr.bf16.mxu0 %v5128_v33 }
 0x27d   :  { %4077 = vmatpush1.bf16.msra.mxu1 %v4944_v45 }
 0x27e   :  { %4079 = vmatprep.subr.bf16.mxu1 %v4948_v46 }
 0x27f   :  { %4017 = vmatpush1.bf16.msra.mxu0 %v5144_v44 }
 0x280   :  { %4019 = vmatprep.subr.bf16.mxu0 %v5148_v51 }
 0x281   :  { %4081 = vmatpush1.bf16.msra.mxu1 %v4964_v52 }
 0x282   :  { %4083 = vmatprep.subr.bf16.mxu1 %v4968_v53 }
 0x283   :  { %4021 = vmatpush1.bf16.msra.mxu0 %v5167_v41 }
 0x285   :  { %4085 = vmatpush1.bf16.msra.mxu1 %v4984_v60 }
 0x286   :  { %4087 = vmatprep.subr.bf16.mxu1 %v4988_v61 }
 0x289   :  { %4089 = vmatpush1.bf16.msra.mxu1 %v5004_v5 }
 0x28a   :  { %4091 = vmatprep.subr.bf16.mxu1 %v5008_v8 }
 0x28d   :  { %4093 = vmatpush1.bf16.msra.mxu1 %v5024_v15 }
 0x28e   :  { %4095 = vmatprep.subr.bf16.mxu1 %v5028_v18 }
 0x291   :  { %4097 = vmatpush1.bf16.msra.mxu1 %v5044_v27 }
 0x292   :  { %4099 = vmatprep.subr.bf16.mxu1 %v5048_v28 }
 0x295   :  { %4101 = vmatpush1.bf16.msra.mxu1 %v5064_v36 }
 0x296   :  { %4103 = vmatprep.subr.bf16.mxu1 %v5068_v40 }
 0x299   :  { %4105 = vmatpush1.bf16.msra.mxu1 %v5084_v48 }
 0x29a   :  { %4107 = vmatprep.subr.bf16.mxu1 %v5088_v50 }
 0x29d   :  { %4109 = vmatpush1.bf16.msra.mxu1 %v5104_v1 }
 0x29e   :  { %4111 = vmatprep.subr.bf16.mxu1 %v5108_v11 }
 0x2a1   :  { %4113 = vmatpush1.bf16.msra.mxu1 %v5124_v26 }
 0x2a2   :  { %4115 = vmatprep.subr.bf16.mxu1 %v5128_v33 }
 0x2a5   :  { %4117 = vmatpush1.bf16.msra.mxu1 %v5144_v44 }
 0x2a6   :  { %4119 = vmatprep.subr.bf16.mxu1 %v5148_v51 }
 0x2a9   :  { %4121 = vmatpush1.bf16.msra.mxu1 %v5167_v41 }
 0x2e9   :  { %v5365_v7 = vpop.f32.mrb[6].mxu0 }
 0x2ea   :  { %v5367_v10 = vpop.f32.mrb[7].mxu0 }
 0x2f5   :  { %v1511_v12 = vpop.f32.mrb[8].mxu0 }
 0x2f6   :  { %v3581_v16 = vpop.f32.mrb[9].mxu0 }
 0x301   :  { %v1605_v17 = vpop.f32.mrb[10].mxu0 }
 0x302   :  { %v5370_v24 = vadd.f32 %v4779_v19, %v1605_v17  ;;  %v3596_v25 = vpop.f32.mrb[11].mxu0  ;;  %v4544_v19 = vld [vmem:[%s6702_s2] ss:$0 sm:$0xff] }
 0x303   :  { %v5398_v11 = vadd.f32 %v4544_v19, %v1511_v12 }
 0x304   :  { %v1609_v31 = vsel %vm499_vm2, %v5370_v24, 0.0  ;;  %v1613_v32 = vmul.f32 %v5370_v24, %v5370_v24 }
 0x305   :  { %1610 = vadd.xlane.f32.xlu0 %v1609_v31  ;;  %v1515_v26 = vsel %vm499_vm2, %v5398_v11, 0.0  ;;  %v1519_v33 = vmul.f32 %v5398_v11, %v5398_v11 }
 0x306   :  { %v1614_v38 = vsel %vm499_vm2, %v1613_v32, 0.0 }
 0x307   :  { %1615 = vadd.xlane.f32.xlu1 %v1614_v38  ;;  %v1520_v57 = vsel %vm499_vm2, %v1519_v33, 0.0 }
 0x30d   :  { %v1699_v39 = vpop.f32.mrb[12].mxu0 }
 0x30e   :  { %v3611_v45 = vpop.f32.mrb[13].mxu0  ;;  %v5418_v0 = vadd.f32 %v4544_v19, %v1699_v39 }
 0x30f   :  { %v5377_v46 = vpop.f32.mrb[10].mxu1 }
 0x310   :  { %v5379_v52 = vpop.f32.mrb[11].mxu1  ;;  %v1703_v2 = vsel %vm499_vm2, %v5418_v0, 0.0  ;;  %v1707_v55 = vmul.f32 %v5418_v0, %v5418_v0 }
 0x312   :  { %v1708_v14 = vsel %vm499_vm2, %v1707_v55, 0.0  ;;  %v124_v55 = vld [vmem:[%s6706_s6] sm:$0x3] }
 0x319   :  { %v1793_v53 = vpop.f32.mrb[14].mxu0 }
 0x31a   :  { %v5384_v60 = vadd.f32 %v4544_v19, %v1793_v53  ;;  %v3626_v61 = vpop.f32.mrb[15].mxu0 }
 0x31b   :  { %v1995_v5 = vpop.f32.mrb[12].mxu1 }
 0x31c   :  { %v3641_v8 = vpop.f32.mrb[13].mxu1  ;;  %v1797_v15 = vsel %vm499_vm2, %v5384_v60, 0.0  ;;  %v1801_v18 = vmul.f32 %v5384_v60, %v5384_v60  ;;  %v5404_v41 = vadd.f32 %v4544_v19, %v1995_v5 }
 0x31d   :  { %1798 = vadd.xlane.f32.xlu1 %v1797_v15 }
 0x31e   :  { %v1802_v27 = vsel %vm499_vm2, %v1801_v18, 0.0  ;;  %v1999_v63 = vsel %vm499_vm2, %v5404_v41, 0.0  ;;  %v2003_v30 = vmul.f32 %v5404_v41, %v5404_v41 }
 0x31f   :  { %1803 = vadd.xlane.f32.xlu0 %v1802_v27 }
 0x320   :  { %v2004_v56 = vsel %vm499_vm2, %v2003_v30, 0.0 }
 0x327   :  { %v2089_v28 = vpop.f32.mrb[14].mxu1 }
 0x328   :  { %v5391_v36 = vadd.f32 %v4544_v19, %v2089_v28  ;;  %v3656_v40 = vpop.f32.mrb[15].mxu1 }
 0x32a   :  { %v2093_v48 = vsel %vm499_vm2, %v5391_v36, 0.0  ;;  %v2097_v50 = vmul.f32 %v5391_v36, %v5391_v36 }
 0x32b   :  { %2094 = vadd.xlane.f32.xlu1 %v2093_v48 }
 0x32c   :  { %v2098_v1 = vsel %vm499_vm2, %v2097_v50, 0.0 }
 0x32f   :  { %2099 = vadd.xlane.f32.xlu1 %v2098_v1 }
 0x333   :  { %v2183_v44 = vpop.f32.mrb[16].mxu1  ;;  %1516 = vadd.xlane.f32.xlu1 %v1515_v26 }
 0x334   :  { %v3671_v51 = vpop.f32.mrb[17].mxu1  ;;  %v5425_v13 = vadd.f32 %v4544_v19, %v2183_v44 }
 0x336   :  { %v2187_v20 = vsel %vm499_vm2, %v5425_v13, 0.0  ;;  %v2191_v23 = vmul.f32 %v5425_v13, %v5425_v13 }
 0x337   :  { %1521 = vadd.xlane.f32.xlu1 %v1520_v57 }
 0x338   :  { %v2192_v21 = vsel %vm499_vm2, %v2191_v23, 0.0 }
 0x33b   :  { %2000 = vadd.xlane.f32.xlu1 %v1999_v63  ;;  %v825_v63 = vlaneseq }
 0x33f   :  { %v2277_v43 = vpop.f32.mrb[18].mxu1  ;;  %2005 = vadd.xlane.f32.xlu1 %v2004_v56 }
 0x340   :  { %v5412_v42 = vadd.f32 %v4544_v19, %v2277_v43  ;;  %v3686_v9 = vpop.f32.mrb[19].mxu1 }
 0x341   :  { %v5440_v9 = vshrl.u32 %v825_v63, 7 }
 0x342   :  { %v2281_v59 = vsel %vm499_vm2, %v5412_v42, 0.0  ;;  %v2285_v49 = vmul.f32 %v5412_v42, %v5412_v42 }
 0x343   :  { %2282 = vadd.xlane.f32.xlu0 %v2281_v59 }
 0x344   :  { %v2286_v62 = vsel %vm499_vm2, %v2285_v49, 0.0 }
 0x347   :  { %2287 = vadd.xlane.f32.xlu0 %v2286_v62 }
 0x34b   :  { %1704 = vadd.xlane.f32.xlu0 %v1703_v2  ;;  %v5443_v2 = vsub.s32 1, %v5440_v9 }
 0x34d   :  { %v5449_v23 = vrot.slane %v124_v55, %v5443_v2 }
 0x34f   :  { %1709 = vadd.xlane.f32.xlu0 %v1708_v14 }
 0x353   :  { %2188 = vadd.xlane.f32.xlu0 %v2187_v20 }
 0x357   :  { %2193 = vadd.xlane.f32.xlu0 %v2192_v21  ;;  %v5452_v21 = vsub.s32 0, %v5440_v9 }
 0x392   :  { %v1611_v34 = vpop.xlane.xlu0 %1610 }
 0x393   :  { %v1612_v29 = vmul.f32 0.015625, %v1611_v34 }
 0x394   :  { %v1616_v6 = vpop.xlane.xlu1 %1615 }
 0x395   :  { %v1618_v22 = vmul.f32 %v1612_v29, %v1612_v29  ;;  %v1617_v3 = vmul.f32 0.015625, %v1616_v6  ;;  %v1621_v19 = vsub.f32 %v5370_v24, %v1612_v29  ;;  %v5456_v29 = vadd.f32 %v5379_v52, %v5449_v23 }
 0x397   :  { %v1619_v58 = vsub.f32 %v1617_v3, %v1618_v22  ;;  %v5459_v22 = vrot.slane %v124_v55, %v5452_v21 }
 0x399   :  { %v1620_v4 = vmax.f32 %v1619_v58, 0.0  ;;  %v1419_v58 = vmul.f32 %v5456_v29, %v5456_v29 }
 0x39b   :  { %v1622_v12 = vadd.f32 1e-06, %v1620_v4  ;;  %v5466_v4 = vadd.f32 %v5377_v46, %v5459_v22  ;;  %v1420_v52 = vsel %vm499_vm2, %v1419_v58, 0.0 }
 0x39d   :  { %4518 = vrsqrt.f32 %v1622_v12 }
 0x3a7   :  { %v4519_v53 = vpop.eup %4518 }
 0x3a8   :  { %v1624_v61 = vmul.f32 %v4519_v53, %v1621_v19 }
 0x3aa   :  { %v1799_v16 = vpop.xlane.xlu1 %1798  ;;  %v1625_v15 = vmul.f32 %v5165_v35, %v1624_v61 }
 0x3ab   :  { %v1800_v17 = vmul.f32 0.015625, %v1799_v16  ;;  %v5470_v16 = vadd.f32 %v5367_v10, %v5449_v23 }
 0x3ac   :  { %v1804_v25 = vpop.xlane.xlu0 %1803  ;;  %v1626_v48 = vadd.f32 %v5178_v54, %v1625_v15 }
 0x3ad   :  { %v1806_v31 = vmul.f32 %v1800_v17, %v1800_v17  ;;  %v1805_v32 = vmul.f32 0.015625, %v1804_v25  ;;  %v1809_v8 = vsub.f32 %v5384_v60, %v1800_v17  ;;  %v1418_v17 = vmul.f32 %v5466_v4, %v5466_v4 }
 0x3ae   :  { %v1627_v44 = vmax.f32 %v1626_v48, 0.0  ;;  %v906_v46 = vsel %vm499_vm2, %v5470_v16, 0.0 }
 0x3af   :  { %v1807_v38 = vsub.f32 %v1805_v32, %v1806_v31  ;;  %v1421_v32 = vadd.f32 %v1420_v52, %v1418_v17 }
 0x3b1   :  { %v1808_v39 = vmax.f32 %v1807_v38, 0.0 }
 0x3b3   :  { %v1810_v45 = vadd.f32 1e-06, %v1808_v39  ;;  %v5481_v39 = vadd.f32 %v5365_v7, %v5459_v22 }
 0x3b5   :  { %4520 = vrsqrt.f32 %v1810_v45  ;;  %v907_v53 = vadd.f32 %v906_v46, %v5481_v39 }
 0x3b8   :  { %v2095_v5 = vpop.xlane.xlu1 %2094 }
 0x3b9   :  { %v2096_v28 = vmul.f32 0.015625, %v2095_v5 }
 0x3bb   :  { %v2102_v26 = vmul.f32 %v2096_v28, %v2096_v28  ;;  %v2105_v3 = vsub.f32 %v5391_v36, %v2096_v28  ;;  %v1413_v28 = vsel %vm499_vm2, %v5456_v29, 0.0 }
 0x3bc   :  { %v2100_v40 = vpop.xlane.xlu1 %2099 }
 0x3bd   :  { %v2101_v33 = vmul.f32 0.015625, %v2100_v40  ;;  %v913_v40 = vmul.f32 %v5470_v16, %v5470_v16 }
 0x3bf   :  { %v4521_v18 = vpop.eup %4520  ;;  %v2103_v57 = vsub.f32 %v2101_v33, %v2102_v26  ;;  %v1414_v26 = vadd.f32 %v1413_v28, %v5466_v4  ;;  %v134_v28 = vld [vmem:[%s6709_s9 + $0x38] sm:$0xff] }
 0x3c0   :  { %v1812_v27 = vmul.f32 %v4521_v18, %v1809_v8  ;;  %v1517_v8 = vpop.xlane.xlu1 %1516 }
 0x3c1   :  { %v2104_v60 = vmax.f32 %v2103_v57, 0.0  ;;  %v1518_v7 = vmul.f32 0.015625, %v1517_v8  ;;  %v128_v8 = vld [vmem:[%s6709_s9 + $0x8] sm:$0xff] }
 0x3c2   :  { %v1813_v50 = vmul.f32 %v5165_v35, %v1812_v27 }
 0x3c3   :  { %v2106_v56 = vadd.f32 1e-06, %v2104_v60  ;;  %v1524_v33 = vmul.f32 %v1518_v7, %v1518_v7  ;;  %v1527_v55 = vsub.f32 %v5398_v11, %v1518_v7 }
 0x3c4   :  { %v1814_v1 = vadd.f32 %v5178_v54, %v1813_v50  ;;  %v1522_v18 = vpop.xlane.xlu1 %1521 }
 0x3c5   :  { %4522 = vrsqrt.f32 %v2106_v56  ;;  %v1523_v50 = vmul.f32 0.015625, %v1522_v18  ;;  %v127_v18 = vld [vmem:[%s6709_s9] sm:$0xff] }
 0x3c6   :  { %v1815_v24 = vmax.f32 %v1814_v1, 0.0 }
 0x3c7   :  { %v1525_v57 = vsub.f32 %v1523_v50, %v1524_v33  ;;  %v136_v33 = vld [vmem:[%s6709_s9 + $0x48] sm:$0xff] }
 0x3c8   :  { %v4487_v51 = vpack.i.bf16 %v1627_v44, %v1815_v24  ;;  %v914_v44 = vsel %vm499_vm2, %v913_v40, 0.0  ;;  %v137_v40 = vld [vmem:[%s6709_s9 + $0x50] sm:$0xff] }
 0x3ca   :  { %4488 = vrot.lane.b32.xlu0 %v4487_v51, %s4574_s19  ;;  %v912_v51 = vmul.f32 %v5481_v39, %v5481_v39 }
 0x3cc   :  { %v915_v63 = vadd.f32 %v914_v44, %v912_v51  ;;  %v140_v44 = vld [vmem:[%s6709_s9 + $0x68] sm:$0xff]  ;;  %v143_v51 = vld [vmem:[%s6709_s9 + $0x80] sm:$0xff] }
 0x3cf   :  { %v4523_v6 = vpop.eup %4522 }
 0x3d0   :  { %v2283_v30 = vpop.xlane.xlu0 %2282  ;;  %v2108_v12 = vmul.f32 %v4523_v6, %v2105_v3  ;;  %v2001_v6 = vpop.xlane.xlu1 %2000 }
 0x3d1   :  { %v2284_v43 = vmul.f32 0.015625, %v2283_v30  ;;  %v1526_v30 = vmax.f32 %v1525_v57, 0.0  ;;  %v5500_v52 = vmul.f32 0.015625, %v2001_v6  ;;  %v155_v6 = vld [vmem:[%s6709_s9 + $0xe0] sm:$0xff] }
 0x3d2   :  { %v2109_v36 = vmul.f32 %v5165_v35, %v2108_v12 }
 0x3d3   :  { %v2290_v49 = vmul.f32 %v2284_v43, %v2284_v43  ;;  %v2293_v25 = vsub.f32 %v5412_v42, %v2284_v43  ;;  %v1528_v43 = vadd.f32 1e-06, %v1526_v30  ;;  %v142_v30 = vld [vmem:[%s6709_s9 + $0x78] sm:$0xff] }
 0x3d4   :  { %v2288_v59 = vpop.xlane.xlu0 %2287  ;;  %v2110_v10 = vadd.f32 %v5178_v54, %v2109_v36  ;;  %v2006_v17 = vpop.xlane.xlu1 %2005 }
 0x3d5   :  { %v2289_v62 = vmul.f32 0.015625, %v2288_v59  ;;  %v2007_v11 = vmul.f32 0.015625, %v2006_v17  ;;  %v154_v17 = vld [vmem:[%s6709_s9 + $0xd8] sm:$0xff] }
 0x3d6   :  { %v2111_v19 = vmax.f32 %v2110_v10, 0.0 }
 0x3d7   :  { %v2291_v14 = vsub.f32 %v2289_v62, %v2290_v49 }
 0x3d8   :  { %v1705_v15 = vpop.xlane.xlu0 %1704 }
 0x3d9   :  { %v2292_v20 = vmax.f32 %v2291_v14, 0.0  ;;  %v1706_v48 = vmul.f32 0.015625, %v1705_v15  ;;  %v131_v15 = vld [vmem:[%s6709_s9 + $0x20] sm:$0xff] }
 0x3da   :  { %v4122_v7 = vpack.c.bf16 %v131_v15, %v128_v8  ;;  %v170_v8 = vld [vmem:[%s6709_s9 + $0x158] sm:$0xff]  ;;  %v173_v15 = vld [vmem:[%s6709_s9 + $0x170] sm:$0xff] }
 0x3db   :  { %v2294_v34 = vadd.f32 1e-06, %v2292_v20  ;;  %v1712_v24 = vmul.f32 %v1706_v48, %v1706_v48  ;;  %v1715_v14 = vsub.f32 %v5418_v0, %v1706_v48  ;;  %v2008_v0 = vmul.f32 %v5500_v52, %v5500_v52 }
 0x3dc   :  { %v1710_v27 = vpop.xlane.xlu0 %1709  ;;  %4123 = vmatprep.subr.bf16.mxu0 %v4122_v7 }
 0x3dd   :  { %4524 = vrsqrt.f32 %v2294_v34  ;;  %v1711_v1 = vmul.f32 0.015625, %v1710_v27  ;;  %v130_v27 = vld [vmem:[%s6709_s9 + $0x18] sm:$0xff] }
 0x3de   :  { %4526 = vrsqrt.f32 %v1528_v43  ;;  %v4124_v50 = vpack.c.bf16 %v130_v27, %v127_v18  ;;  %v146_v43 = vld [vmem:[%s6709_s9 + $0x98] sm:$0xff] }
 0x3df   :  { %v1713_v60 = vsub.f32 %v1711_v1, %v1712_v24  ;;  %v4126_v1 = vpack.c.bf16 %v137_v40, %v134_v28  ;;  %v4150_v28 = vpack.c.bf16 %v173_v15, %v170_v8 }
 0x3e0   :  { %v2189_v3 = vpop.xlane.xlu0 %2188 }
 0x3e1   :  { %v1714_v56 = vmax.f32 %v1713_v60, 0.0  ;;  %v4130_v60 = vpack.c.bf16 %v143_v51, %v140_v44 }
 0x3e3   :  { %v1716_v59 = vadd.f32 1e-06, %v1714_v56 }
 0x3e5   :  { %4528 = vrsqrt.f32 %v1716_v59  ;;  %v149_v59 = vld [vmem:[%s6709_s9 + $0xb0] sm:$0xff] }
 0x3e7   :  { %v4525_v31 = vpop.eup %4524 }
 0x3e8   :  { %v2296_v38 = vmul.f32 %v4525_v31, %v2293_v25  ;;  %v4527_v49 = vpop.eup %4526  ;;  %v2194_v25 = vpop.xlane.xlu0 %2193 }
 0x3e9   :  { %1422 = vadd.xlane.f32.xlu0 %v1421_v32  ;;  %v1530_v34 = vmul.f32 %v4527_v49, %v1527_v55  ;;  %v5504_v32 = vmul.f32 0.015625, %v2189_v3  ;;  %v2195_v46 = vmul.f32 0.015625, %v2194_v25  ;;  %v4134_v55 = vpack.c.bf16 %v149_v59, %v146_v43  ;;  %v158_v25 = vld [vmem:[%s6709_s9 + $0xf8] sm:$0xff]  ;;  %v177_v43 = vld [vmem:[%s6709_s9 + $0x190] sm:$0xff] }
 0x3ea   :  { %v2297_v45 = vmul.f32 %v5165_v35, %v2296_v38 }
 0x3eb   :  { %v1531_v12 = vmul.f32 %v5165_v35, %v1530_v34  ;;  %v152_v34 = vld [vmem:[%s6709_s9 + $0xc8] sm:$0xff] }
 0x3ec   :  { %v2298_v42 = vadd.f32 %v5178_v54, %v2297_v45 }
 0x3ed   :  { %908 = vadd.xlane.f32.xlu0 %v907_v53  ;;  %v1532_v31 = vadd.f32 %v5178_v54, %v1531_v12  ;;  %v151_v12 = vld [vmem:[%s6709_s9 + $0xc0] sm:$0xff] }
 0x3ee   :  { %v2299_v61 = vmax.f32 %v2298_v42, 0.0  ;;  %v2196_v42 = vmul.f32 %v5504_v32, %v5504_v32 }
 0x3ef   :  { %v4529_v62 = vpop.eup %4528 }
 0x3f0   :  { %v4492_v5 = vpack.i.bf16 %v2111_v19, %v2299_v61  ;;  %v1718_v20 = vmul.f32 %v4529_v62, %v1715_v14  ;;  %v2009_v19 = vsub.f32 %v2007_v11, %v2008_v0  ;;  %v145_v14 = vld [vmem:[%s6709_s9 + $0x90] sm:$0xff] }
 0x3f1   :  { %v157_v0 = vld [vmem:[%s6709_s9 + $0xf0] sm:$0xff] }
 0x3f2   :  { %4493 = vrot.lane.b32.xlu1 %v4492_v5, %s4574_s19  ;;  %v1719_v58 = vmul.f32 %v5165_v35, %v1718_v20  ;;  %v1533_v35 = vmax.f32 %v1532_v31, 0.0  ;;  %v2197_v5 = vsub.f32 %v2195_v46, %v2196_v42  ;;  %v2010_v48 = vmax.f32 %v2009_v19, 0.0  ;;  %v148_v20 = vld [vmem:[%s6709_s9 + $0xa8] sm:$0xff]  ;;  %v163_v19 = vld [vmem:[%s6709_s9 + $0x120] sm:$0xff] }
 0x3f3   :  { %v4136_v3 = vpack.c.bf16 %v148_v20, %v145_v14  ;;  %v4140_v31 = vpack.c.bf16 %v154_v17, %v151_v12  ;;  %v160_v46 = vld [vmem:[%s6709_s9 + $0x108] sm:$0xff]  ;;  %v185_v12 = vld [vmem:[%s6709_s9 + $0x1d0] sm:$0xff]  ;;  %v183_v17 = vld [vmem:[%s6709_s9 + $0x1c0] sm:$0xff] }
 0x3f4   :  { %v1720_v36 = vadd.f32 %v5178_v54, %v1719_v58  ;;  %v2198_v24 = vmax.f32 %v2197_v5, 0.0  ;;  %v2012_v56 = vadd.f32 1e-06, %v2010_v48  ;;  %v4138_v58 = vpack.c.bf16 %v155_v6, %v152_v34  ;;  %v129_v34 = vld [vmem:[%s6709_s9 + $0x10] sm:$0xff]  ;;  %v132_v6 = vld [vmem:[%s6709_s9 + $0x28] sm:$0xff] }
 0x3f5   :  { %v2199_v5 = vsub.f32 %v5425_v13, %v5504_v32  ;;  %v172_v13 = vld [vmem:[%s6709_s9 + $0x168] sm:$0xff] }
 0x3f6   :  { %v1721_v53 = vmax.f32 %v1720_v36, 0.0  ;;  %v2200_v49 = vadd.f32 1e-06, %v2198_v24  ;;  %4530 = vrsqrt.f32 %v2012_v56  ;;  %v161_v36 = vld [vmem:[%s6709_s9 + $0x110] sm:$0xff]  ;;  %v179_v56 = vld [vmem:[%s6709_s9 + $0x1a0] sm:$0xff] }
 0x3f7   :  { %v4142_v11 = vpack.c.bf16 %v161_v36, %v158_v25  ;;  %v186_v36 = vld [vmem:[%s6709_s9 + $0x1d8] sm:$0xff] }
 0x3f8   :  { %4532 = vrsqrt.f32 %v2200_v49  ;;  %v180_v49 = vld [vmem:[%s6709_s9 + $0x1a8] sm:$0xff] }
 0x3f9   :  { %v4314_v14 = vpack.c.bf16 %v180_v49, %v177_v43  ;;  %v202_v49 = vld [vmem:[%s6709_s9 + $0x258] sm:$0xff] }
 0x3fb   :  { %4315 = vmatprep.subr.bf16.mxu1 %v4314_v14 }
 0x416   :  { %1415 = vadd.xlane.f32.xlu1 %v1414_v26  ;;  %v133_v26 = vld [vmem:[%s6709_s9 + $0x30] sm:$0xff] }
 0x417   :  { %v4128_v57 = vpack.c.bf16 %v136_v33, %v133_v26 }
 0x41a   :  { %916 = vadd.xlane.f32.xlu1 %v915_v63  ;;  %v139_v63 = vld [vmem:[%s6709_s9 + $0x60] sm:$0xff] }
 0x41b   :  { %v4132_v62 = vpack.c.bf16 %v142_v30, %v139_v63  ;;  %v176_v30 = vld [vmem:[%s6709_s9 + $0x188] sm:$0xff] }
 0x41c   :  { %v4154_v59 = vpack.c.bf16 %v179_v56, %v176_v30 }
 0x43c   :  { %v4489_v38 = vpop.permute.xlu0 %4488 }
 0x43d   :  { %v4491_v10 = vunpack.i.h.bf16 %v4489_v38  ;;  %v4490_v45 = vunpack.i.l.bf16 %v4489_v38  ;;  %v164_v38 = vld [vmem:[%s6709_s9 + $0x128] sm:$0xff] }
 0x43f   :  { %v1825_v61 = vsel %vm499_vm2, %v1721_v53, %v4490_v45  ;;  %v1824_v54 = vsel %vm499_vm2, %v1533_v35, %v4491_v10  ;;  %v167_v10 = vld [vmem:[%s6709_s9 + $0x140] sm:$0xff]  ;;  %v4531_v45 = vpop.eup %4530  ;;  %v4144_v53 = vpack.c.bf16 %v160_v46, %v157_v0  ;;  %v4318_v0 = vpack.c.bf16 %v186_v36, %v183_v17  ;;  %v210_v17 = vld [vmem:[%s6709_s9 + $0x298] sm:$0xff] }
 0x440   :  { %1890 = vmatprep.mubr.f32.mxu0 %v1825_v61  ;;  %v4533_v35 = vpop.eup %4532  ;;  %v4146_v42 = vpack.c.bf16 %v167_v10, %v164_v38  ;;  %v166_v61 = vld [vmem:[%s6709_s9 + $0x138] sm:$0xff]  ;;  %v135_v38 = vld [vmem:[%s6709_s9 + $0x40] sm:$0xff] }
 0x441   :  { %1891 = vmatmul.mubr.f32.vlgmr.msra.gmra.mrb[16].mxu0 %v1824_v54  ;;  %v2011_v54 = vsub.f32 %v5404_v41, %v5500_v52  ;;  %v2202_v18 = vmul.f32 %v4533_v35, %v2199_v5  ;;  %v4148_v27 = vpack.c.bf16 %v166_v61, %v163_v19  ;;  %v169_v41 = vld [vmem:[%s6709_s9 + $0x150] sm:$0xff]  ;;  %v4545_v52 = vld [vmem:[%s6703_s3] ss:$0 sm:$0xff]  ;;  %v138_v10 = vld [vmem:[%s6709_s9 + $0x58] sm:$0xff] }
 0x442   :  { %4125 = vmatpush1.bf16.msra.mxu0 %v4124_v50  ;;  %v4152_v48 = vpack.c.bf16 %v172_v13, %v169_v41  ;;  %v4546_v50 = vld [vmem:[%s6704_s4] ss:$0 sm:$0xff]  ;;  %v192_v61 = vld [vmem:[%s6709_s9 + $0x208] sm:$0xff]  ;;  %v190_v5 = vld [vmem:[%s6709_s9 + $0x1f8] sm:$0xff] }
 0x443   :  { %4127 = vmatprep.subr.bf16.mxu0 %v4126_v1  ;;  %v2014_v7 = vmul.f32 %v4531_v45, %v2011_v54  ;;  %v2203_v32 = vmul.f32 %v4545_v52, %v2202_v18  ;;  %v4320_v45 = vpack.c.bf16 %v138_v10, %v135_v38  ;;  %v191_v35 = vld [vmem:[%s6709_s9 + $0x200] sm:$0xff]  ;;  %v141_v18 = vld [vmem:[%s6709_s9 + $0x70] sm:$0xff]  ;;  %v162_v38 = vld [vmem:[%s6709_s9 + $0x118] sm:$0xff] }
 0x444   :  { %v187_v54 = vld [vmem:[%s6709_s9 + $0x1e0] sm:$0xff]  ;;  %v197_v41 = vld [vmem:[%s6709_s9 + $0x230] sm:$0xff] }
 0x445   :  { %v2015_v40 = vmul.f32 %v4545_v52, %v2014_v7  ;;  %v2204_v1 = vadd.f32 %v4546_v50, %v2203_v32  ;;  %v4164_v15 = vpack.c.bf16 %v190_v5, %v187_v54  ;;  %v144_v7 = vld [vmem:[%s6709_s9 + $0x88] sm:$0xff]  ;;  %v195_v13 = vld [vmem:[%s6709_s9 + $0x220] sm:$0xff]  ;;  %v198_v32 = vld [vmem:[%s6709_s9 + $0x238] sm:$0xff] }
 0x446   :  { %4129 = vmatpush1.bf16.msra.mxu0 %v4128_v57  ;;  %v216_v54 = vld [vmem:[%s6709_s9 + $0x2c8] sm:$0xff]  ;;  %v211_v5 = vld [vmem:[%s6709_s9 + $0x2a0] sm:$0xff] }
 0x447   :  { %4131 = vmatprep.subr.bf16.mxu0 %v4130_v60  ;;  %v2016_v26 = vadd.f32 %v4546_v50, %v2015_v40  ;;  %v2205_v51 = vmax.f32 %v2204_v1, 0.0  ;;  %v193_v40 = vld [vmem:[%s6709_s9 + $0x210] sm:$0xff]  ;;  %v4326_v50 = vpack.c.bf16 %v198_v32, %v195_v13  ;;  %v219_v13 = vld [vmem:[%s6709_s9 + $0x2e0] sm:$0xff] }
 0x449   :  { %v2017_v57 = vmax.f32 %v2016_v26, 0.0  ;;  %v147_v26 = vld [vmem:[%s6709_s9 + $0xa0] sm:$0xff] }
 0x44a   :  { %4133 = vmatpush1.bf16.msra.mxu0 %v4132_v62  ;;  %v175_v62 = vld [vmem:[%s6709_s9 + $0x180] sm:$0xff] }
 0x44b   :  { %4135 = vmatprep.subr.bf16.mxu0 %v4134_v55  ;;  %v178_v55 = vld [vmem:[%s6709_s9 + $0x198] sm:$0xff] }
 0x44c   :  { %v4156_v20 = vpack.c.bf16 %v178_v55, %v175_v62  ;;  %v153_v62 = vld [vmem:[%s6709_s9 + $0xd0] sm:$0xff] }
 0x44e   :  { %4137 = vmatpush1.bf16.msra.mxu0 %v4136_v3  ;;  %v4316_v3 = vpack.c.bf16 %v132_v6, %v129_v34  ;;  %v206_v34 = vld [vmem:[%s6709_s9 + $0x278] sm:$0xff]  ;;  %v209_v6 = vld [vmem:[%s6709_s9 + $0x290] sm:$0xff] }
 0x44f   :  { %4139 = vmatprep.subr.bf16.mxu0 %v4138_v58  ;;  %v182_v58 = vld [vmem:[%s6709_s9 + $0x1b8] sm:$0xff] }
 0x450   :  { %v4158_v25 = vpack.c.bf16 %v185_v12, %v182_v58  ;;  %v4174_v58 = vpack.c.bf16 %v209_v6, %v206_v34  ;;  %v207_v12 = vld [vmem:[%s6709_s9 + $0x280] sm:$0xff] }
 0x452   :  { %4141 = vmatpush1.bf16.msra.mxu0 %v4140_v31  ;;  %v181_v31 = vld [vmem:[%s6709_s9 + $0x1b0] sm:$0xff] }
 0x453   :  { %4143 = vmatprep.subr.bf16.mxu0 %v4142_v11  ;;  %v184_v11 = vld [vmem:[%s6709_s9 + $0x1c8] sm:$0xff] }
 0x454   :  { %v4160_v46 = vpack.c.bf16 %v184_v11, %v181_v31  ;;  %v4334_v11 = vpack.c.bf16 %v210_v17, %v207_v12 }
 0x456   :  { %4145 = vmatpush1.bf16.msra.mxu0 %v4144_v53  ;;  %v188_v53 = vld [vmem:[%s6709_s9 + $0x1e8] sm:$0xff] }
 0x457   :  { %4147 = vmatprep.subr.bf16.mxu0 %v4146_v42  ;;  %v189_v42 = vld [vmem:[%s6709_s9 + $0x1f0] sm:$0xff]  ;;  %v4162_v19 = vpack.c.bf16 %v191_v35, %v188_v53  ;;  %v215_v53 = vld [vmem:[%s6709_s9 + $0x2c0] sm:$0xff] }
 0x458   :  { %v4322_v8 = vpack.c.bf16 %v192_v61, %v189_v42  ;;  %v213_v35 = vld [vmem:[%s6709_s9 + $0x2b0] sm:$0xff] }
 0x45a   :  { %4149 = vmatpush1.bf16.msra.mxu0 %v4148_v27  ;;  %v4324_v27 = vpack.c.bf16 %v144_v7, %v141_v18  ;;  %v165_v18 = vld [vmem:[%s6709_s9 + $0x130] sm:$0xff]  ;;  %v168_v7 = vld [vmem:[%s6709_s9 + $0x148] sm:$0xff] }
 0x45b   :  { %4151 = vmatprep.subr.bf16.mxu0 %v4150_v28  ;;  %v194_v28 = vld [vmem:[%s6709_s9 + $0x218] sm:$0xff] }
 0x45c   :  { %v4166_v52 = vpack.c.bf16 %v197_v41, %v194_v28  ;;  %v221_v41 = vld [vmem:[%s6709_s9 + $0x2f0] sm:$0xff] }
 0x45e   :  { %4153 = vmatpush1.bf16.msra.mxu0 %v4152_v48  ;;  %v196_v48 = vld [vmem:[%s6709_s9 + $0x228] sm:$0xff] }
 0x45f   :  { %4155 = vmatprep.subr.bf16.mxu0 %v4154_v59  ;;  %v4168_v1 = vpack.c.bf16 %v196_v48, %v193_v40  ;;  %v199_v59 = vld [vmem:[%s6709_s9 + $0x240] sm:$0xff]  ;;  %v4340_v48 = vpack.c.bf16 %v168_v7, %v165_v18 }
 0x460   :  { %v4172_v14 = vpack.c.bf16 %v202_v49, %v199_v59 }
 0x462   :  { %4157 = vmatpush1.bf16.msra.mxu0 %v4156_v20  ;;  %v156_v20 = vld [vmem:[%s6709_s9 + $0xe8] sm:$0xff] }
 0x463   :  { %4159 = vmatprep.subr.bf16.mxu0 %v4158_v25  ;;  %v205_v25 = vld [vmem:[%s6709_s9 + $0x270] sm:$0xff] }
 0x464   :  { %v4494_v33 = vpop.permute.xlu1 %4493 }
 0x465   :  { %v4496_v44 = vunpack.i.h.bf16 %v4494_v33  ;;  %v4495_v24 = vunpack.i.l.bf16 %v4494_v33  ;;  %v150_v33 = vld [vmem:[%s6709_s9 + $0xb8] sm:$0xff] }
 0x466   :  { %4161 = vmatpush1.bf16.msra.mxu0 %v4160_v46  ;;  %v159_v46 = vld [vmem:[%s6709_s9 + $0x100] sm:$0xff] }
 0x467   :  { %v2309_v60 = vsel %vm499_vm2, %v2205_v51, %v4495_v24  ;;  %v2308_v63 = vsel %vm499_vm2, %v2017_v57, %v4496_v44  ;;  %4163 = vmatprep.subr.bf16.mxu0 %v4162_v19  ;;  %v200_v44 = vld [vmem:[%s6709_s9 + $0x248] sm:$0xff]  ;;  %v4328_v24 = vpack.c.bf16 %v150_v33, %v147_v26  ;;  %v203_v51 = vld [vmem:[%s6709_s9 + $0x260] sm:$0xff]  ;;  %v201_v57 = vld [vmem:[%s6709_s9 + $0x250] sm:$0xff]  ;;  %v4336_v19 = vpack.c.bf16 %v162_v38, %v159_v46 }
 0x468   :  { %2374 = vmatprep.mubr.f32.mxu1 %v2309_v60  ;;  %v204_v60 = vld [vmem:[%s6709_s9 + $0x268] sm:$0xff]  ;;  %v4170_v56 = vpack.c.bf16 %v203_v51, %v200_v44  ;;  %v171_v44 = vld [vmem:[%s6709_s9 + $0x160] sm:$0xff] }
 0x469   :  { %2375 = vmatmul.mubr.f32.vlgmr.msra.gmra.mrb[20].mxu1 %v2308_v63  ;;  %v4330_v43 = vpack.c.bf16 %v204_v60, %v201_v57  ;;  %v220_v26 = vld [vmem:[%s6709_s9 + $0x2e8] sm:$0xff]  ;;  %v125_v60 = vld [vmem:[%s6707_s7] sm:$0x3] }
 0x46a   :  { %4317 = vmatpush3.bf16.msra.mxu1 %v4316_v3  ;;  %4165 = vmatpush1.bf16.msra.mxu0 %v4164_v15  ;;  %v4332_v3 = vpack.c.bf16 %v156_v20, %v153_v62  ;;  %v4338_v15 = vpack.c.bf16 %v216_v54, %v213_v35  ;;  %v5860_v18 = vrot.slane %v125_v60, %v5443_v2 }
 0x46b   :  { %4319 = vmatprep.subr.bf16.mxu1 %v4318_v0  ;;  %4167 = vmatprep.subr.bf16.mxu0 %v4166_v52  ;;  %v208_v0 = vld [vmem:[%s6709_s9 + $0x288] sm:$0xff]  ;;  %v222_v52 = vld [vmem:[%s6709_s9 + $0x2f8] sm:$0xff] }
 0x46c   :  { %v4176_v10 = vpack.c.bf16 %v208_v0, %v205_v25  ;;  %v4342_v33 = vpack.c.bf16 %v222_v52, %v219_v13 }
 0x46e   :  { %4321 = vmatpush3.bf16.msra.mxu1 %v4320_v45  ;;  %4169 = vmatpush1.bf16.msra.mxu0 %v4168_v1  ;;  %v212_v45 = vld [vmem:[%s6709_s9 + $0x2a8] sm:$0xff]  ;;  %v217_v1 = vld [vmem:[%s6709_s9 + $0x2d0] sm:$0xff] }
 0x46f   :  { %4323 = vmatprep.subr.bf16.mxu1 %v4322_v8  ;;  %4171 = vmatprep.subr.bf16.mxu0 %v4170_v56  ;;  %v4178_v61 = vpack.c.bf16 %v215_v53, %v212_v45  ;;  %v214_v8 = vld [vmem:[%s6709_s9 + $0x2b8] sm:$0xff]  ;;  %v4184_v51 = vpack.c.bf16 %v220_v26, %v217_v1 }
 0x470   :  { %v4180_v32 = vpack.c.bf16 %v214_v8, %v211_v5 }
 0x472   :  { %4325 = vmatpush3.bf16.msra.mxu1 %v4324_v27  ;;  %4173 = vmatpush1.bf16.msra.mxu0 %v4172_v14  ;;  %v218_v27 = vld [vmem:[%s6709_s9 + $0x2d8] sm:$0xff] }
 0x473   :  { %4327 = vmatprep.subr.bf16.mxu1 %v4326_v50  ;;  %4175 = vmatprep.subr.bf16.mxu0 %v4174_v58  ;;  %v4182_v50 = vpack.c.bf16 %v221_v41, %v218_v27 }
 0x476   :  { %v1423_v63 = vpop.xlane.xlu0 %1422  ;;  %4329 = vmatpush3.bf16.msra.mxu1 %v4328_v24  ;;  %4177 = vmatpush1.bf16.msra.mxu0 %v4176_v10  ;;  %v174_v24 = vld [vmem:[%s6709_s9 + $0x178] sm:$0xff] }
 0x477   :  { %4331 = vmatprep.subr.bf16.mxu1 %v4330_v43  ;;  %v1424_v36 = vmul.f32 0.0052083335, %v1423_v63  ;;  %4179 = vmatprep.subr.bf16.mxu0 %v4178_v61  ;;  %v4344_v57 = vpack.c.bf16 %v174_v24, %v171_v44  ;;  %v126_v63 = vld [vmem:[%s6708_s8] sm:$0x3]  ;;  %v5827_v43 = vrot.slane %v125_v60, %v5452_v21  ;;  %v229_v24 = vld [vmem:[%s6709_s9 + $0x330] sm:$0xff] }
 0x478   :  { %v5832_v14 = vrot.slane %v126_v63, %v5452_v21  ;;  %v239_v60 = vld [vmem:[%s6709_s9 + $0x380] sm:$0xff] }
 0x47a   :  { %4333 = vmatpush3.bf16.msra.mxu1 %v4332_v3  ;;  %4181 = vmatpush1.bf16.msra.mxu0 %v4180_v32  ;;  %v909_v3 = vpop.xlane.xlu0 %908  ;;  %v230_v32 = vld [vmem:[%s6709_s9 + $0x338] sm:$0xff] }
 0x47b   :  { %4335 = vmatprep.subr.bf16.mxu1 %v4334_v11  ;;  %4183 = vmatprep.subr.bf16.mxu0 %v4182_v50  ;;  %v911_v12 = vmul.f32 0.0052083335, %v909_v3  ;;  %v282_v3 = vld [vmem:[%s6709_s9 + $0x4d8] sm:$0xff] }
 0x47d   :  { %v919_v25 = vmul.f32 %v911_v12, %v911_v12  ;;  %v923_v5 = vsub.f32 %v5470_v16, %v911_v12  ;;  %v922_v8 = vsub.f32 %v5481_v39, %v911_v12  ;;  %v223_v16 = vld [vmem:[%s6709_s9 + $0x300] sm:$0xff]  ;;  %v226_v39 = vld [vmem:[%s6709_s9 + $0x318] sm:$0xff]  ;;  %v245_v12 = vld [vmem:[%s6709_s9 + $0x3b0] sm:$0xff] }
 0x47e   :  { %4337 = vmatpush3.bf16.msra.mxu1 %v4336_v19  ;;  %4185 = vmatpush1.bf16.msra.mxu0 %v4184_v51  ;;  %v4188_v1 = vpack.c.bf16 %v226_v39, %v223_v16  ;;  %v232_v51 = vld [vmem:[%s6709_s9 + $0x348] sm:$0xff]  ;;  %v243_v39 = vld [vmem:[%s6709_s9 + $0x3a0] sm:$0xff] }
 0x47f   :  { %4339 = vmatprep.subr.bf16.mxu1 %v4338_v15 }
 0x482   :  { %4341 = vmatpush3.bf16.msra.mxu1 %v4340_v48 }
 0x483   :  { %4343 = vmatprep.subr.bf16.mxu1 %v4342_v33 }
 0x486   :  { %4345 = vmatpush3.bf16.msra.mxu1 %v4344_v57  ;;  %v236_v57 = vld [vmem:[%s6709_s9 + $0x368] sm:$0xff] }
 0x4a3   :  { %v1416_v30 = vpop.xlane.xlu1 %1415 }
 0x4a4   :  { %v5737_v55 = vmul.f32 0.0052083335, %v1416_v30 }
 0x4a6   :  { %v1425_v31 = vmul.f32 %v5737_v55, %v5737_v55  ;;  %v1428_v30 = vsub.f32 %v5466_v4, %v5737_v55  ;;  %v1429_v56 = vsub.f32 %v5456_v29, %v5737_v55  ;;  %v224_v29 = vld [vmem:[%s6709_s9 + $0x308] sm:$0xff]  ;;  %v227_v4 = vld [vmem:[%s6709_s9 + $0x320] sm:$0xff] }
 0x4a7   :  { %v4186_v55 = vpack.c.bf16 %v227_v4, %v224_v29  ;;  %v917_v58 = vpop.xlane.xlu1 %916  ;;  %v238_v29 = vld [vmem:[%s6709_s9 + $0x378] sm:$0xff] }
 0x4a8   :  { %v1426_v42 = vsub.f32 %v1424_v36, %v1425_v31  ;;  %v918_v17 = vmul.f32 0.0052083335, %v917_v58  ;;  %v242_v58 = vld [vmem:[%s6709_s9 + $0x398] sm:$0xff] }
 0x4a9   :  { %4187 = vmatprep.subr.bf16.mxu0 %v4186_v55  ;;  %v279_v55 = vld [vmem:[%s6709_s9 + $0x4c0] sm:$0xff] }
 0x4aa   :  { %v1427_v28 = vmax.f32 %v1426_v42, 0.0  ;;  %v920_v36 = vsub.f32 %v918_v17, %v919_v25  ;;  %v4350_v17 = vpack.c.bf16 %v282_v3, %v279_v55  ;;  %v231_v25 = vld [vmem:[%s6709_s9 + $0x340] sm:$0xff]  ;;  %v262_v3 = vld [vmem:[%s6709_s9 + $0x438] sm:$0xff] }
 0x4ac   :  { %v1430_v40 = vadd.f32 1e-06, %v1427_v28  ;;  %v921_v31 = vmax.f32 %v920_v36, 0.0  ;;  %v5864_v28 = vrot.slane %v126_v63, %v5443_v2  ;;  %v273_v63 = vld [vmem:[%s6709_s9 + $0x490] sm:$0xff]  ;;  %v234_v36 = vld [vmem:[%s6709_s9 + $0x358] sm:$0xff] }
 0x4ae   :  { %4534 = vrsqrt.f32 %v1430_v40  ;;  %v924_v0 = vadd.f32 1e-06, %v921_v31  ;;  %v233_v40 = vld [vmem:[%s6709_s9 + $0x350] sm:$0xff] }
 0x4af   :  { %v4190_v44 = vpack.c.bf16 %v233_v40, %v230_v32 }
 0x4b0   :  { %4536 = vrsqrt.f32 %v924_v0  ;;  %v4352_v0 = vpack.c.bf16 %v234_v36, %v231_v25  ;;  %v249_v36 = vld [vmem:[%s6709_s9 + $0x3d0] sm:$0xff] }
 0x4b8   :  { %v4535_v59 = vpop.eup %4534 }
 0x4b9   :  { %v1432_v49 = vmul.f32 %v4535_v59, %v1428_v30  ;;  %v5829_v62 = vmul.f32 %v4535_v59, %v1429_v56  ;;  %v276_v30 = vld [vmem:[%s6709_s9 + $0x4a8] sm:$0xff]  ;;  %v4192_v56 = vpack.c.bf16 %v232_v51, %v229_v24  ;;  %v235_v59 = vld [vmem:[%s6709_s9 + $0x360] sm:$0xff]  ;;  %v257_v24 = vld [vmem:[%s6709_s9 + $0x410] sm:$0xff] }
 0x4ba   :  { %v4537_v54 = vpop.eup %4536  ;;  %v4196_v31 = vpack.c.bf16 %v238_v29, %v235_v59  ;;  %v256_v59 = vld [vmem:[%s6709_s9 + $0x408] sm:$0xff]  ;;  %v259_v29 = vld [vmem:[%s6709_s9 + $0x420] sm:$0xff] }
 0x4bb   :  { %v1434_v20 = vmul.f32 %v1432_v49, %v5827_v43  ;;  %v927_v15 = vmul.f32 %v4537_v54, %v923_v5  ;;  %v926_v7 = vmul.f32 %v4537_v54, %v922_v8  ;;  %v4346_v49 = vpack.c.bf16 %v276_v30, %v273_v63  ;;  %v240_v54 = vld [vmem:[%s6709_s9 + $0x388] sm:$0xff] }
 0x4bc   :  { %v248_v8 = vld [vmem:[%s6709_s9 + $0x3c8] sm:$0xff] }
 0x4bd   :  { %v1436_v34 = vadd.f32 %v1434_v20, %v5832_v14  ;;  %v940_v27 = vmul.f32 %v5860_v18, %v927_v15  ;;  %v939_v41 = vmul.f32 %v5827_v43, %v926_v7  ;;  %v225_v20 = vld [vmem:[%s6709_s9 + $0x310] sm:$0xff]  ;;  %4347 = vmatprep.subr.bf16.mxu1 %v4346_v49  ;;  %v251_v15 = vld [vmem:[%s6709_s9 + $0x3e0] sm:$0xff] }
 0x4be   :  { %v291_v7 = vld [vmem:[%s6709_s9 + $0x520] sm:$0xff] }
 0x4bf   :  { %v1438_v6 = vmax.f32 %v1436_v34, 0.0  ;;  %v953_v13 = vadd.f32 %v5864_v28, %v940_v27  ;;  %v952_v52 = vadd.f32 %v5832_v14, %v939_v41  ;;  %v228_v34 = vld [vmem:[%s6709_s9 + $0x328] sm:$0xff] }
 0x4c0   :  { %v4348_v4 = vpack.c.bf16 %v228_v34, %v225_v20  ;;  %v260_v20 = vld [vmem:[%s6709_s9 + $0x428] sm:$0xff]  ;;  %v263_v34 = vld [vmem:[%s6709_s9 + $0x440] sm:$0xff] }
 0x4c1   :  { %2410 = vrot.lane.b32.xlu0 %v1438_v6, %s4574_s19  ;;  %v955_v48 = vmax.f32 %v953_v13, 0.0  ;;  %v954_v33 = vmax.f32 %v952_v52, 0.0  ;;  %v4194_v6 = vpack.c.bf16 %v239_v60, %v236_v57  ;;  %v294_v13 = vld [vmem:[%s6709_s9 + $0x538] sm:$0xff]  ;;  %v4210_v55 = vpack.c.bf16 %v263_v34, %v260_v20 }
 0x4c2   :  { %v270_v20 = vld [vmem:[%s6709_s9 + $0x478] sm:$0xff] }
 0x514   :  { %v1892_v11 = vpop.f32.mrb[16].mxu0 }
 0x515   :  { %v1894_v46 = vpop.f32.mrb[17].mxu0  ;;  %v5847_v10 = vadd.f32 %v1892_v11, %v5459_v22  ;;  %v241_v11 = vld [vmem:[%s6709_s9 + $0x390] sm:$0xff] }
 0x516   :  { %v5844_v38 = vadd.f32 %v1894_v46, %v5449_v23  ;;  %v285_v46 = vld [vmem:[%s6709_s9 + $0x4f0] sm:$0xff] }
 0x517   :  { %v1902_v19 = vmul.f32 %v5847_v10, %v5847_v10 }
 0x518   :  { %v1897_v45 = vsel %vm499_vm2, %v5844_v38, 0.0  ;;  %v1903_v53 = vmul.f32 %v5844_v38, %v5844_v38 }
 0x519   :  { %v1898_v35 = vadd.f32 %v1897_v45, %v5847_v10  ;;  %v288_v45 = vld [vmem:[%s6709_s9 + $0x508] sm:$0xff] }
 0x51a   :  { %v1904_v42 = vsel %vm499_vm2, %v1903_v53, 0.0 }
 0x51b   :  { %1899 = vadd.xlane.f32.xlu1 %v1898_v35  ;;  %v1905_v61 = vadd.f32 %v1904_v42, %v1902_v19  ;;  %v4198_v35 = vpack.c.bf16 %v245_v12, %v242_v58  ;;  %v244_v42 = vld [vmem:[%s6709_s9 + $0x3a8] sm:$0xff]  ;;  %v4354_v19 = vpack.c.bf16 %v288_v45, %v285_v46  ;;  %v266_v58 = vld [vmem:[%s6709_s9 + $0x458] sm:$0xff]  ;;  %v4212_v45 = vpack.c.bf16 %v262_v3, %v259_v29 }
 0x51c   :  { %v4200_v16 = vpack.c.bf16 %v244_v42, %v241_v11  ;;  %v300_v12 = vld [vmem:[%s6709_s9 + $0x568] sm:$0xff]  ;;  %v306_v46 = vld [vmem:[%s6709_s9 + $0x598] sm:$0xff] }
 0x51d   :  { %v286_v3 = vld [vmem:[%s6709_s9 + $0x4f8] sm:$0xff] }
 0x51f   :  { %1906 = vadd.xlane.f32.xlu1 %v1905_v61  ;;  %v237_v61 = vld [vmem:[%s6709_s9 + $0x370] sm:$0xff] }
 0x520   :  { %v4356_v41 = vpack.c.bf16 %v240_v54, %v237_v61  ;;  %v268_v61 = vld [vmem:[%s6709_s9 + $0x468] sm:$0xff]  ;;  %v258_v54 = vld [vmem:[%s6709_s9 + $0x418] sm:$0xff] }
 0x533   :  { %v5881_v50 = vpop.permute.xlu0 %2410 }
 0x534   :  { %v2426_v26 = vsel %vm499_vm2, %v955_v48, %v5881_v50  ;;  %v247_v48 = vld [vmem:[%s6709_s9 + $0x3c0] sm:$0xff] }
 0x535   :  { %2508 = vmatprep.mubr.f32.mxu0 %v2426_v26  ;;  %2721 = vmatprep.mubr.f32.mxu1 %v2426_v26  ;;  %v4358_v26 = vpack.c.bf16 %v294_v13, %v291_v7  ;;  %v1435_v7 = vmul.f32 %v5829_v62, %v5860_v18  ;;  %v271_v13 = vld [vmem:[%s6709_s9 + $0x480] sm:$0xff]  ;;  %v278_v62 = vld [vmem:[%s6709_s9 + $0x4b8] sm:$0xff] }
 0x536   :  { %2509 = vmatmul.mubr.f32.vlgmr.msra.gmra.mrb[18].mxu0 %v954_v33  ;;  %2722 = vmatmul.mubr.f32.vlgmr.msra.gmra.mrb[22].mxu1 %v954_v33 }
 0x537   :  { %4189 = vmatpush1.bf16.msra.mxu0 %v4188_v1  ;;  %4349 = vmatpush3.bf16.msra.mxu1 %v4348_v4  ;;  %v250_v1 = vld [vmem:[%s6709_s9 + $0x3d8] sm:$0xff]  ;;  %v297_v4 = vld [vmem:[%s6709_s9 + $0x550] sm:$0xff] }
 0x538   :  { %4191 = vmatprep.subr.bf16.mxu0 %v4190_v44  ;;  %4351 = vmatprep.subr.bf16.mxu1 %v4350_v17  ;;  %v254_v44 = vld [vmem:[%s6709_s9 + $0x3f8] sm:$0xff]  ;;  %v4204_v63 = vpack.c.bf16 %v250_v1, %v247_v48  ;;  %v269_v17 = vld [vmem:[%s6709_s9 + $0x470] sm:$0xff]  ;;  %v4362_v25 = vpack.c.bf16 %v300_v12, %v297_v4  ;;  %v264_v1 = vld [vmem:[%s6709_s9 + $0x448] sm:$0xff] }
 0x539   :  { %v4206_v30 = vpack.c.bf16 %v257_v24, %v254_v44  ;;  %v4214_v42 = vpack.c.bf16 %v269_v17, %v266_v58  ;;  %v261_v48 = vld [vmem:[%s6709_s9 + $0x430] sm:$0xff]  ;;  %v290_v58 = vld [vmem:[%s6709_s9 + $0x518] sm:$0xff] }
 0x53a   :  { %v277_v24 = vld [vmem:[%s6709_s9 + $0x4b0] sm:$0xff] }
 0x53b   :  { %4193 = vmatpush1.bf16.msra.mxu0 %v4192_v56  ;;  %4353 = vmatpush3.bf16.msra.mxu1 %v4352_v0  ;;  %v253_v56 = vld [vmem:[%s6709_s9 + $0x3f0] sm:$0xff]  ;;  %v303_v0 = vld [vmem:[%s6709_s9 + $0x580] sm:$0xff] }
 0x53c   :  { %v2376_v53 = vpop.f32.mrb[20].mxu1  ;;  %4195 = vmatprep.subr.bf16.mxu0 %v4194_v6  ;;  %4355 = vmatprep.subr.bf16.mxu1 %v4354_v19  ;;  %v4208_v6 = vpack.c.bf16 %v256_v59, %v253_v56  ;;  %v265_v19 = vld [vmem:[%s6709_s9 + $0x450] sm:$0xff]  ;;  %v287_v56 = vld [vmem:[%s6709_s9 + $0x500] sm:$0xff] }
 0x53d   :  { %v2378_v5 = vpop.f32.mrb[21].mxu1  ;;  %v5967_v52 = vadd.f32 %v2376_v53, %v5459_v22  ;;  %v4202_v22 = vpack.c.bf16 %v251_v15, %v248_v8  ;;  %v4366_v53 = vpack.c.bf16 %v306_v46, %v303_v0  ;;  %v275_v8 = vld [vmem:[%s6709_s9 + $0x4a0] sm:$0xff]  ;;  %v293_v12 = vld [vmem:[%s6709_s9 + $0x530] sm:$0xff] }
 0x53e   :  { %v5961_v27 = vadd.f32 %v2378_v5, %v5449_v23  ;;  %v246_v23 = vld [vmem:[%s6709_s9 + $0x3b8] sm:$0xff]  ;;  %v272_v5 = vld [vmem:[%s6709_s9 + $0x488] sm:$0xff]  ;;  %v299_v0 = vld [vmem:[%s6709_s9 + $0x560] sm:$0xff] }
 0x53f   :  { %4197 = vmatpush1.bf16.msra.mxu0 %v4196_v31  ;;  %4357 = vmatpush3.bf16.msra.mxu1 %v4356_v41  ;;  %v4360_v57 = vpack.c.bf16 %v246_v23, %v243_v39  ;;  %v2386_v60 = vmul.f32 %v5967_v52, %v5967_v52  ;;  %v252_v31 = vld [vmem:[%s6709_s9 + $0x3e8] sm:$0xff]  ;;  %v4216_v41 = vpack.c.bf16 %v268_v61, %v265_v19  ;;  %v274_v23 = vld [vmem:[%s6709_s9 + $0x498] sm:$0xff]  ;;  %v305_v19 = vld [vmem:[%s6709_s9 + $0x590] sm:$0xff] }
 0x540   :  { %v2381_v32 = vsel %vm499_vm2, %v5961_v27, 0.0  ;;  %v2387_v40 = vmul.f32 %v5961_v27, %v5961_v27  ;;  %4199 = vmatprep.subr.bf16.mxu0 %v4198_v35  ;;  %4359 = vmatprep.subr.bf16.mxu1 %v4358_v26  ;;  %v4364_v11 = vpack.c.bf16 %v252_v31, %v249_v36  ;;  %v255_v35 = vld [vmem:[%s6709_s9 + $0x400] sm:$0xff]  ;;  %v4218_v39 = vpack.c.bf16 %v275_v8, %v272_v5  ;;  %v289_v36 = vld [vmem:[%s6709_s9 + $0x510] sm:$0xff]  ;;  %v292_v31 = vld [vmem:[%s6709_s9 + $0x528] sm:$0xff] }
 0x541   :  { %v2382_v33 = vadd.f32 %v2381_v32, %v5967_v52  ;;  %v4368_v15 = vpack.c.bf16 %v258_v54, %v255_v35  ;;  %v312_v32 = vld [vmem:[%s6709_s9 + $0x5c8] sm:$0xff]  ;;  %v1437_v26 = vadd.f32 %v1435_v7, %v5864_v28  ;;  %v4220_v44 = vpack.c.bf16 %v274_v23, %v271_v13  ;;  %v298_v35 = vld [vmem:[%s6709_s9 + $0x558] sm:$0xff]  ;;  %v301_v5 = vld [vmem:[%s6709_s9 + $0x570] sm:$0xff] }
 0x542   :  { %v2388_v51 = vsel %vm499_vm2, %v2387_v40, 0.0  ;;  %v281_v40 = vld [vmem:[%s6709_s9 + $0x4d0] sm:$0xff]  ;;  %v4232_v46 = vpack.c.bf16 %v292_v31, %v289_v36  ;;  %v304_v8 = vld [vmem:[%s6709_s9 + $0x588] sm:$0xff]  ;;  %v311_v7 = vld [vmem:[%s6709_s9 + $0x5c0] sm:$0xff] }
 0x543   :  { %2383 = vadd.xlane.f32.xlu1 %v2382_v33  ;;  %4201 = vmatpush1.bf16.msra.mxu0 %v4200_v16  ;;  %v2389_v49 = vadd.f32 %v2388_v51, %v2386_v60  ;;  %v309_v16 = vld [vmem:[%s6709_s9 + $0x5b0] sm:$0xff]  ;;  %v4372_v33 = vpack.c.bf16 %v264_v1, %v261_v48  ;;  %v315_v51 = vld [vmem:[%s6709_s9 + $0x5e0] sm:$0xff]  ;;  %v280_v60 = vld [vmem:[%s6709_s9 + $0x4c8] sm:$0xff]  ;;  %v1439_v34 = vmax.f32 %v1437_v26, 0.0 }
 0x544   :  { %4203 = vmatprep.subr.bf16.mxu0 %v4202_v22  ;;  %4361 = vmatpush3.bf16.msra.mxu1 %v4360_v57  ;;  %v4370_v22 = vpack.c.bf16 %v312_v32, %v309_v16  ;;  %v4222_v57 = vpack.c.bf16 %v281_v40, %v278_v62  ;;  %v4224_v29 = vpack.c.bf16 %v280_v60, %v277_v24  ;;  %v307_v16 = vld [vmem:[%s6709_s9 + $0x5a0] sm:$0xff]  ;;  %v314_v23 = vld [vmem:[%s6709_s9 + $0x5d8] sm:$0xff]  ;;  %v317_v62 = vld [vmem:[%s6709_s9 + $0x5f0] sm:$0xff] }
 0x545   :  { %4363 = vmatprep.subr.bf16.mxu1 %v4362_v25  ;;  %v4230_v25 = vpack.c.bf16 %v293_v12, %v290_v58  ;;  %v4246_v40 = vpack.c.bf16 %v317_v62, %v314_v23  ;;  %v316_v48 = vld [vmem:[%s6709_s9 + $0x5e8] sm:$0xff]  ;;  %v369_v24 = vld [vmem:[%s6709_s9 + $0x790] sm:$0xff]  ;;  %v330_v23 = vld [vmem:[%s6709_s9 + $0x658] sm:$0xff] }
 0x546   :  { %v320_v26 = vld [vmem:[%s6709_s9 + $0x608] sm:$0xff] }
 0x547   :  { %2390 = vadd.xlane.f32.xlu1 %v2389_v49  ;;  %4205 = vmatpush1.bf16.msra.mxu0 %v4204_v63  ;;  %v284_v63 = vld [vmem:[%s6709_s9 + $0x4e8] sm:$0xff]  ;;  %v267_v49 = vld [vmem:[%s6709_s9 + $0x460] sm:$0xff] }
 0x548   :  { %4207 = vmatprep.subr.bf16.mxu0 %v4206_v30  ;;  %4365 = vmatpush3.bf16.msra.mxu1 %v4364_v11  ;;  %v318_v30 = vld [vmem:[%s6709_s9 + $0x5f8] sm:$0xff]  ;;  %v4226_v4 = vpack.c.bf16 %v287_v56, %v284_v63  ;;  %v296_v11 = vld [vmem:[%s6709_s9 + $0x548] sm:$0xff] }
 0x549   :  { %4367 = vmatprep.subr.bf16.mxu1 %v4366_v53  ;;  %v4374_v59 = vpack.c.bf16 %v318_v30, %v315_v51  ;;  %v295_v53 = vld [vmem:[%s6709_s9 + $0x540] sm:$0xff]  ;;  %v372_v51 = vld [vmem:[%s6709_s9 + $0x7a8] sm:$0xff] }
 0x54a   :  { %v4236_v61 = vpack.c.bf16 %v298_v35, %v295_v53  ;;  %v329_v35 = vld [vmem:[%s6709_s9 + $0x650] sm:$0xff] }
 0x54b   :  { %4209 = vmatpush1.bf16.msra.mxu0 %v4208_v6  ;;  %v4376_v6 = vpack.c.bf16 %v270_v20, %v267_v49 }
 0x54c   :  { %4211 = vmatprep.subr.bf16.mxu0 %v4210_v55  ;;  %4369 = vmatpush3.bf16.msra.mxu1 %v4368_v15  ;;  %v283_v55 = vld [vmem:[%s6709_s9 + $0x4e0] sm:$0xff]  ;;  %v308_v15 = vld [vmem:[%s6709_s9 + $0x5a8] sm:$0xff] }
 0x54d   :  { %4371 = vmatprep.subr.bf16.mxu1 %v4370_v22  ;;  %v4228_v17 = vpack.c.bf16 %v286_v3, %v283_v55  ;;  %v4242_v13 = vpack.c.bf16 %v311_v7, %v308_v15  ;;  %v313_v22 = vld [vmem:[%s6709_s9 + $0x5d0] sm:$0xff] }
 0x54e   :  { %v4248_v1 = vpack.c.bf16 %v316_v48, %v313_v22  ;;  %v381_v22 = vld [vmem:[%s6709_s9 + $0x7f0] sm:$0xff]  ;;  %v384_v48 = vld [vmem:[%s6709_s9 + $0x808] sm:$0xff] }
 0x54f   :  { %4213 = vmatpush1.bf16.msra.mxu0 %v4212_v45  ;;  %v4234_v45 = vpack.c.bf16 %v299_v0, %v296_v11  ;;  %v326_v11 = vld [vmem:[%s6709_s9 + $0x638] sm:$0xff]  ;;  %v321_v0 = vld [vmem:[%s6709_s9 + $0x610] sm:$0xff] }
 0x550   :  { %4215 = vmatprep.subr.bf16.mxu0 %v4214_v42  ;;  %4373 = vmatpush3.bf16.msra.mxu1 %v4372_v33  ;;  %v302_v42 = vld [vmem:[%s6709_s9 + $0x578] sm:$0xff]  ;;  %v323_v33 = vld [vmem:[%s6709_s9 + $0x620] sm:$0xff] }
 0x551   :  { %4375 = vmatprep.subr.bf16.mxu1 %v4374_v59  ;;  %v4238_v54 = vpack.c.bf16 %v305_v19, %v302_v42  ;;  %v375_v42 = vld [vmem:[%s6709_s9 + $0x7c0] sm:$0xff]  ;;  %v378_v19 = vld [vmem:[%s6709_s9 + $0x7d8] sm:$0xff] }
 0x553   :  { %4217 = vmatpush1.bf16.msra.mxu0 %v4216_v41  ;;  %v4240_v41 = vpack.c.bf16 %v304_v8, %v301_v5  ;;  %v325_v5 = vld [vmem:[%s6709_s9 + $0x630] sm:$0xff]  ;;  %v328_v8 = vld [vmem:[%s6709_s9 + $0x648] sm:$0xff] }
 0x554   :  { %4219 = vmatprep.subr.bf16.mxu0 %v4218_v39  ;;  %4377 = vmatpush3.bf16.msra.mxu1 %v4376_v6  ;;  %v310_v39 = vld [vmem:[%s6709_s9 + $0x5b8] sm:$0xff] }
 0x555   :  { %v4244_v32 = vpack.c.bf16 %v310_v39, %v307_v16  ;;  %v4382_v16 = vpack.c.bf16 %v378_v19, %v375_v42  ;;  %v327_v39 = vld [vmem:[%s6709_s9 + $0x640] sm:$0xff]  ;;  %v345_v42 = vld [vmem:[%s6709_s9 + $0x6d0] sm:$0xff]  ;;  %v348_v19 = vld [vmem:[%s6709_s9 + $0x6e8] sm:$0xff] }
 0x557   :  { %4221 = vmatpush1.bf16.msra.mxu0 %v4220_v44  ;;  %v4250_v44 = vpack.c.bf16 %v323_v33, %v320_v26  ;;  %v4256_v26 = vpack.c.bf16 %v328_v8, %v325_v5  ;;  %v334_v33 = vld [vmem:[%s6709_s9 + $0x678] sm:$0xff] }
 0x558   :  { %2412 = vrot.lane.b32.xlu1 %v1439_v34, %s4574_s19  ;;  %4223 = vmatprep.subr.bf16.mxu0 %v4222_v57  ;;  %v4378_v57 = vpack.c.bf16 %v372_v51, %v369_v24  ;;  %v338_v51 = vld [vmem:[%s6709_s9 + $0x698] sm:$0xff] }
 0x55a   :  { %4379 = vmatprep.subr.bf16.mxu1 %v4378_v57  ;;  %v4386_v57 = vpack.c.bf16 %v384_v48, %v381_v22  ;;  %v405_v22 = vld [vmem:[%s6709_s9 + $0x8b0] sm:$0xff]  ;;  %v408_v48 = vld [vmem:[%s6709_s9 + $0x8c8] sm:$0xff] }
 0x55b   :  { %4225 = vmatpush1.bf16.msra.mxu0 %v4224_v29 }
 0x55c   :  { %4227 = vmatprep.subr.bf16.mxu0 %v4226_v4 }
 0x55f   :  { %4229 = vmatpush1.bf16.msra.mxu0 %v4228_v17 }
 0x560   :  { %4231 = vmatprep.subr.bf16.mxu0 %v4230_v25 }
 0x563   :  { %4233 = vmatpush1.bf16.msra.mxu0 %v4232_v46  ;;  %v324_v46 = vld [vmem:[%s6709_s9 + $0x628] sm:$0xff] }
 0x564   :  { %4235 = vmatprep.subr.bf16.mxu0 %v4234_v45  ;;  %v4380_v15 = vpack.c.bf16 %v324_v46, %v321_v0  ;;  %v350_v0 = vld [vmem:[%s6709_s9 + $0x6f8] sm:$0xff] }
 0x567   :  { %4237 = vmatpush1.bf16.msra.mxu0 %v4236_v61 }
 0x568   :  { %4239 = vmatprep.subr.bf16.mxu0 %v4238_v54 }
 0x56b   :  { %4241 = vmatpush1.bf16.msra.mxu0 %v4240_v41  ;;  %v4254_v41 = vpack.c.bf16 %v329_v35, %v326_v11  ;;  %v346_v11 = vld [vmem:[%s6709_s9 + $0x6d8] sm:$0xff] }
 0x56c   :  { %4243 = vmatprep.subr.bf16.mxu0 %v4242_v13  ;;  %v332_v13 = vld [vmem:[%s6709_s9 + $0x668] sm:$0xff] }
 0x56f   :  { %4245 = vmatpush1.bf16.msra.mxu0 %v4244_v32 }
 0x570   :  { %4247 = vmatprep.subr.bf16.mxu0 %v4246_v40  ;;  %v335_v40 = vld [vmem:[%s6709_s9 + $0x680] sm:$0xff] }
 0x571   :  { %v4258_v24 = vpack.c.bf16 %v335_v40, %v332_v13  ;;  %v349_v13 = vld [vmem:[%s6709_s9 + $0x6f0] sm:$0xff]  ;;  %v354_v40 = vld [vmem:[%s6709_s9 + $0x718] sm:$0xff] }
 0x573   :  { %4249 = vmatpush1.bf16.msra.mxu0 %v4248_v1 }
 0x574   :  { %4251 = vmatprep.subr.bf16.mxu0 %v4250_v44  ;;  %v4384_v44 = vpack.c.bf16 %v330_v23, %v327_v39  ;;  %v356_v39 = vld [vmem:[%s6709_s9 + $0x728] sm:$0xff] }
 0x5a8   :  { %v1900_v60 = vpop.xlane.xlu1 %1899 }
 0x5a9   :  { %v1901_v63 = vmul.f32 0.0052083335, %v1900_v60  ;;  %v333_v60 = vld [vmem:[%s6709_s9 + $0x670] sm:$0xff] }
 0x5ab   :  { %v1909_v56 = vmul.f32 %v1901_v63, %v1901_v63  ;;  %v1912_v6 = vsub.f32 %v5847_v10, %v1901_v63  ;;  %v1913_v29 = vsub.f32 %v5844_v38, %v1901_v63  ;;  %v319_v10 = vld [vmem:[%s6709_s9 + $0x600] sm:$0xff]  ;;  %v322_v38 = vld [vmem:[%s6709_s9 + $0x618] sm:$0xff]  ;;  %v336_v63 = vld [vmem:[%s6709_s9 + $0x688] sm:$0xff] }
 0x5ac   :  { %v1907_v30 = vpop.xlane.xlu1 %1906  ;;  %v4252_v54 = vpack.c.bf16 %v322_v38, %v319_v10  ;;  %v396_v10 = vld [vmem:[%s6709_s9 + $0x868] sm:$0xff] }
 0x5ad   :  { %v1908_v59 = vmul.f32 0.0052083335, %v1907_v30  ;;  %v341_v30 = vld [vmem:[%s6709_s9 + $0x6b0] sm:$0xff] }
 0x5af   :  { %v1910_v49 = vsub.f32 %v1908_v59, %v1909_v56  ;;  %v387_v56 = vld [vmem:[%s6709_s9 + $0x820] sm:$0xff]  ;;  %v390_v59 = vld [vmem:[%s6709_s9 + $0x838] sm:$0xff] }
 0x5b1   :  { %v1911_v20 = vmax.f32 %v1910_v49, 0.0 }
 0x5b3   :  { %v1914_v34 = vadd.f32 1e-06, %v1911_v20  ;;  %v337_v20 = vld [vmem:[%s6709_s9 + $0x690] sm:$0xff] }
 0x5b5   :  { %4538 = vrsqrt.f32 %v1914_v34  ;;  %v340_v34 = vld [vmem:[%s6709_s9 + $0x6a8] sm:$0xff] }
 0x5b6   :  { %v4264_v38 = vpack.c.bf16 %v340_v34, %v337_v20 }
 0x5bf   :  { %v4539_v4 = vpop.eup %4538 }
 0x5c0   :  { %v1916_v55 = vmul.f32 %v4539_v4, %v1912_v6  ;;  %v6187_v3 = vmul.f32 %v4539_v4, %v1913_v29  ;;  %v4388_v6 = vpack.c.bf16 %v336_v63, %v333_v60  ;;  %v4262_v29 = vpack.c.bf16 %v341_v30, %v338_v51  ;;  %v344_v4 = vld [vmem:[%s6709_s9 + $0x6c8] sm:$0xff]  ;;  %v357_v30 = vld [vmem:[%s6709_s9 + $0x730] sm:$0xff] }
 0x5c1   :  { %v4402_v63 = vpack.c.bf16 %v408_v48, %v405_v22 }
 0x5c2   :  { %v1918_v58 = vmul.f32 %v1916_v55, %v5827_v43  ;;  %v4390_v55 = vpack.c.bf16 %v390_v59, %v387_v56  ;;  %v360_v56 = vld [vmem:[%s6709_s9 + $0x748] sm:$0xff]  ;;  %v411_v59 = vld [vmem:[%s6709_s9 + $0x8e0] sm:$0xff] }
 0x5c4   :  { %v1920_v12 = vadd.f32 %v1918_v58, %v5832_v14  ;;  %v339_v58 = vld [vmem:[%s6709_s9 + $0x6a0] sm:$0xff] }
 0x5c6   :  { %v1922_v17 = vmax.f32 %v1920_v12, 0.0  ;;  %v342_v12 = vld [vmem:[%s6709_s9 + $0x6b8] sm:$0xff] }
 0x5c7   :  { %v4392_v46 = vpack.c.bf16 %v342_v12, %v339_v58  ;;  %v364_v12 = vld [vmem:[%s6709_s9 + $0x768] sm:$0xff] }
 0x5c8   :  { %2579 = vmatprep.mubr.f32.mxu0 %v1922_v17  ;;  %2791 = vmatprep.mubr.f32.mxu1 %v1922_v17  ;;  %v347_v17 = vld [vmem:[%s6709_s9 + $0x6e0] sm:$0xff] }
 0x5d0   :  { %v2384_v25 = vpop.xlane.xlu1 %2383 }
 0x5d1   :  { %v6191_v36 = vmul.f32 0.0052083335, %v2384_v25  ;;  %v393_v25 = vld [vmem:[%s6709_s9 + $0x850] sm:$0xff] }
 0x5d2   :  { %v4394_v35 = vpack.c.bf16 %v396_v10, %v393_v25  ;;  %v363_v25 = vld [vmem:[%s6709_s9 + $0x760] sm:$0xff]  ;;  %v366_v10 = vld [vmem:[%s6709_s9 + $0x778] sm:$0xff] }
 0x5d3   :  { %v2393_v45 = vmul.f32 %v6191_v36, %v6191_v36  ;;  %v2396_v5 = vsub.f32 %v5967_v52, %v6191_v36  ;;  %v2397_v8 = vsub.f32 %v5961_v27, %v6191_v36  ;;  %v4396_v52 = vpack.c.bf16 %v348_v19, %v345_v42  ;;  %v359_v36 = vld [vmem:[%s6709_s9 + $0x740] sm:$0xff]  ;;  %v377_v42 = vld [vmem:[%s6709_s9 + $0x7d0] sm:$0xff] }
 0x5d4   :  { %v2391_v31 = vpop.xlane.xlu1 %2390 }
 0x5d5   :  { %v2392_v53 = vmul.f32 0.0052083335, %v2391_v31  ;;  %v343_v31 = vld [vmem:[%s6709_s9 + $0x6c0] sm:$0xff] }
 0x5d7   :  { %v2394_v61 = vsub.f32 %v2392_v53, %v2393_v45  ;;  %v4266_v45 = vpack.c.bf16 %v347_v17, %v344_v4  ;;  %v353_v53 = vld [vmem:[%s6709_s9 + $0x710] sm:$0xff]  ;;  %v4404_v4 = vpack.c.bf16 %v360_v56, %v357_v30 }
 0x5d8   :  { %v2413_v7 = vpop.permute.xlu1 %2412 }
 0x5d9   :  { %v2395_v62 = vmax.f32 %v2394_v61, 0.0  ;;  %v2414_v32 = vsel %vm499_vm2, %v5881_v50, %v2413_v7  ;;  %v331_v50 = vld [vmem:[%s6709_s9 + $0x660] sm:$0xff]  ;;  %v4268_v7 = vpack.c.bf16 %v346_v11, %v343_v31 }
 0x5da   :  { %2580 = vmatmul.mubr.f32.vlgmr.msra.gmra.mrb[18].mxu0 %v2414_v32  ;;  %2792 = vmatmul.mubr.f32.vlgmr.msra.gmra.mrb[24].mxu1 %v2414_v32  ;;  %v4260_v49 = vpack.c.bf16 %v334_v33, %v331_v50  ;;  %v399_v61 = vld [vmem:[%s6709_s9 + $0x880] sm:$0xff]  ;;  %v4274_v33 = vpack.c.bf16 %v359_v36, %v356_v39  ;;  %v386_v39 = vld [vmem:[%s6709_s9 + $0x818] sm:$0xff]  ;;  %v385_v36 = vld [vmem:[%s6709_s9 + $0x810] sm:$0xff] }
 0x5db   :  { %v2398_v1 = vadd.f32 1e-06, %v2395_v62  ;;  %4253 = vmatpush1.bf16.msra.mxu0 %v4252_v54  ;;  %4381 = vmatpush3.bf16.msra.mxu1 %v4380_v15  ;;  %v402_v54 = vld [vmem:[%s6709_s9 + $0x898] sm:$0xff]  ;;  %v351_v32 = vld [vmem:[%s6709_s9 + $0x700] sm:$0xff] }
 0x5dc   :  { %4255 = vmatprep.subr.bf16.mxu0 %v4254_v41  ;;  %4383 = vmatprep.subr.bf16.mxu1 %v4382_v16  ;;  %v4270_v41 = vpack.c.bf16 %v353_v53, %v350_v0  ;;  %v352_v16 = vld [vmem:[%s6709_s9 + $0x708] sm:$0xff]  ;;  %v4398_v62 = vpack.c.bf16 %v402_v54, %v399_v61  ;;  %v4400_v51 = vpack.c.bf16 %v354_v40, %v351_v32  ;;  %v371_v31 = vld [vmem:[%s6709_s9 + $0x7a0] sm:$0xff]  ;;  %v370_v53 = vld [vmem:[%s6709_s9 + $0x798] sm:$0xff] }
 0x5dd   :  { %4540 = vrsqrt.f32 %v2398_v1  ;;  %v4272_v50 = vpack.c.bf16 %v352_v16, %v349_v13  ;;  %v4408_v0 = vpack.c.bf16 %v366_v10, %v363_v25  ;;  %v373_v54 = vld [vmem:[%s6709_s9 + $0x7b0] sm:$0xff]  ;;  %v379_v13 = vld [vmem:[%s6709_s9 + $0x7e0] sm:$0xff]  ;;  %v382_v16 = vld [vmem:[%s6709_s9 + $0x7f8] sm:$0xff] }
 0x5de   :  { %v392_v32 = vld [vmem:[%s6709_s9 + $0x848] sm:$0xff]  ;;  %v395_v40 = vld [vmem:[%s6709_s9 + $0x860] sm:$0xff] }
 0x5df   :  { %4257 = vmatpush1.bf16.msra.mxu0 %v4256_v26  ;;  %4385 = vmatpush3.bf16.msra.mxu1 %v4384_v44  ;;  %v355_v44 = vld [vmem:[%s6709_s9 + $0x720] sm:$0xff]  ;;  %v4298_v48 = vpack.c.bf16 %v395_v40, %v392_v32 }
 0x5e0   :  { %4259 = vmatprep.subr.bf16.mxu0 %v4258_v24  ;;  %4387 = vmatprep.subr.bf16.mxu1 %v4386_v57  ;;  %v358_v24 = vld [vmem:[%s6709_s9 + $0x738] sm:$0xff] }
 0x5e3   :  { %4261 = vmatpush1.bf16.msra.mxu0 %v4260_v49  ;;  %4389 = vmatpush3.bf16.msra.mxu1 %v4388_v6  ;;  %v414_v49 = vld [vmem:[%s6709_s9 + $0x8f8] sm:$0xff]  ;;  %v4276_v6 = vpack.c.bf16 %v358_v24, %v355_v44 }
 0x5e4   :  { %4263 = vmatprep.subr.bf16.mxu0 %v4262_v29  ;;  %4391 = vmatprep.subr.bf16.mxu1 %v4390_v55  ;;  %v361_v29 = vld [vmem:[%s6709_s9 + $0x750] sm:$0xff]  ;;  %v4406_v17 = vpack.c.bf16 %v414_v49, %v411_v59  ;;  %v403_v49 = vld [vmem:[%s6709_s9 + $0x8a0] sm:$0xff] }
 0x5e5   :  { %v4280_v11 = vpack.c.bf16 %v364_v12, %v361_v29 }
 0x5e7   :  { %v4541_v15 = vpop.eup %4540  ;;  %4265 = vmatpush1.bf16.msra.mxu0 %v4264_v38  ;;  %4393 = vmatpush3.bf16.msra.mxu1 %v4392_v46  ;;  %v368_v38 = vld [vmem:[%s6709_s9 + $0x788] sm:$0xff] }
 0x5e8   :  { %v2400_v23 = vmul.f32 %v4541_v15, %v2396_v5  ;;  %v2401_v27 = vmul.f32 %v4541_v15, %v2397_v8  ;;  %4267 = vmatprep.subr.bf16.mxu0 %v4266_v45  ;;  %4395 = vmatprep.subr.bf16.mxu1 %v4394_v35  ;;  %v4282_v46 = vpack.c.bf16 %v371_v31, %v368_v38  ;;  %v367_v45 = vld [vmem:[%s6709_s9 + $0x780] sm:$0xff]  ;;  %v374_v35 = vld [vmem:[%s6709_s9 + $0x7b8] sm:$0xff]  ;;  %v376_v5 = vld [vmem:[%s6709_s9 + $0x7c8] sm:$0xff] }
 0x5e9   :  { %v4284_v19 = vpack.c.bf16 %v370_v53, %v367_v45  ;;  %v4286_v61 = vpack.c.bf16 %v377_v42, %v374_v35  ;;  %v380_v8 = vld [vmem:[%s6709_s9 + $0x7e8] sm:$0xff]  ;;  %v383_v15 = vld [vmem:[%s6709_s9 + $0x800] sm:$0xff]  ;;  %v6488_v45 = vsub.s32 2, %v5440_v9 }
 0x5ea   :  { %v2402_v1 = vmul.f32 %v2400_v23, %v5827_v43  ;;  %v2403_v26 = vmul.f32 %v2401_v27, %v5860_v18  ;;  %v362_v43 = vld [vmem:[%s6709_s9 + $0x758] sm:$0xff]  ;;  %v4292_v23 = vpack.c.bf16 %v382_v16, %v379_v13  ;;  %v2950_v9 = vld [vmem:[%s6713_s13 + $0x88] sm:$0xff] }
 0x5eb   :  { %4269 = vmatpush1.bf16.msra.mxu0 %v4268_v7  ;;  %4397 = vmatpush3.bf16.msra.mxu1 %v4396_v52  ;;  %v4288_v7 = vpack.c.bf16 %v376_v5, %v373_v54  ;;  %v389_v52 = vld [vmem:[%s6709_s9 + $0x830] sm:$0xff]  ;;  %v2933_v54 = vld [vmem:[%s6713_s13] sm:$0xff] }
 0x5ec   :  { %v2404_v57 = vadd.f32 %v2402_v1, %v5832_v14  ;;  %v2405_v60 = vadd.f32 %v2403_v26, %v5864_v28  ;;  %4271 = vmatprep.subr.bf16.mxu0 %v4270_v41  ;;  %4399 = vmatprep.subr.bf16.mxu1 %v4398_v62  ;;  %v365_v14 = vld [vmem:[%s6709_s9 + $0x770] sm:$0xff]  ;;  %v4290_v41 = vpack.c.bf16 %v383_v15, %v380_v8  ;;  %v388_v62 = vld [vmem:[%s6709_s9 + $0x828] sm:$0xff]  ;;  %v391_v1 = vld [vmem:[%s6709_s9 + $0x840] sm:$0xff] }
 0x5ed   :  { %v4278_v58 = vpack.c.bf16 %v365_v14, %v362_v43  ;;  %v4294_v27 = vpack.c.bf16 %v389_v52, %v386_v39  ;;  %v4296_v22 = vpack.c.bf16 %v388_v62, %v385_v36  ;;  %v394_v26 = vld [vmem:[%s6709_s9 + $0x858] sm:$0xff]  ;;  %v404_v43 = vld [vmem:[%s6709_s9 + $0x8a8] sm:$0xff] }
 0x5ee   :  { %v2406_v20 = vmax.f32 %v2404_v57, 0.0  ;;  %v2407_v34 = vmax.f32 %v2405_v60, 0.0  ;;  %v4300_v44 = vpack.c.bf16 %v394_v26, %v391_v1  ;;  %v400_v57 = vld [vmem:[%s6709_s9 + $0x888] sm:$0xff] }
 0x5ef   :  { %4273 = vmatpush1.bf16.msra.mxu0 %v4272_v50  ;;  %4401 = vmatpush3.bf16.msra.mxu1 %v4400_v51  ;;  %v398_v50 = vld [vmem:[%s6709_s9 + $0x878] sm:$0xff]  ;;  %v397_v51 = vld [vmem:[%s6709_s9 + $0x870] sm:$0xff]  ;;  %v2934_v8 = vld [vmem:[%s6713_s13 + $0x8] sm:$0xff] }
 0x5f0   :  { %v4497_v55 = vpack.i.bf16 %v2407_v34, %v2406_v20  ;;  %4275 = vmatprep.subr.bf16.mxu0 %v4274_v33  ;;  %4403 = vmatprep.subr.bf16.mxu1 %v4402_v63  ;;  %v401_v33 = vld [vmem:[%s6709_s9 + $0x890] sm:$0xff]  ;;  %v407_v63 = vld [vmem:[%s6709_s9 + $0x8c0] sm:$0xff]  ;;  %v4304_v14 = vpack.c.bf16 %v400_v57, %v397_v51  ;;  %v406_v20 = vld [vmem:[%s6709_s9 + $0x8b8] sm:$0xff]  ;;  %v4412_v15 = vpack.c.bf16 %v2934_v8, %v2933_v54 }
 0x5f1   :  { %v4302_v24 = vpack.c.bf16 %v401_v33, %v398_v50  ;;  %v4306_v59 = vpack.c.bf16 %v407_v63, %v404_v43  ;;  %v410_v34 = vld [vmem:[%s6709_s9 + $0x8d8] sm:$0xff]  ;;  %v4308_v29 = vpack.c.bf16 %v406_v20, %v403_v49  ;;  %v2951_v33 = vld [vmem:[%s6713_s13 + $0x90] sm:$0xff]  ;;  %v2953_v43 = vld [vmem:[%s6713_s13 + $0xa0] sm:$0xff] }
 0x5f2   :  { %4498 = vrot.lane.b32.xlu0 %v4497_v55, %s4574_s19  ;;  %v409_v55 = vld [vmem:[%s6709_s9 + $0x8d0] sm:$0xff]  ;;  %v2936_v57 = vld [vmem:[%s6713_s13 + $0x18] sm:$0xff]  ;;  %v2954_v63 = vld [vmem:[%s6713_s13 + $0xa8] sm:$0xff] }
 0x5f3   :  { %4277 = vmatpush1.bf16.msra.mxu0 %v4276_v6  ;;  %4405 = vmatpush3.bf16.msra.mxu1 %v4404_v4  ;;  %v413_v6 = vld [vmem:[%s6709_s9 + $0x8f0] sm:$0xff]  ;;  %v2956_v20 = vld [vmem:[%s6713_s13 + $0xb8] sm:$0xff] }
 0x5f4   :  { %4279 = vmatprep.subr.bf16.mxu0 %v4278_v58  ;;  %4407 = vmatprep.subr.bf16.mxu1 %v4406_v17  ;;  %v4310_v4 = vpack.c.bf16 %v413_v6, %v410_v34  ;;  %v412_v58 = vld [vmem:[%s6709_s9 + $0x8e8] sm:$0xff]  ;;  %v1919_v17 = vmul.f32 %v6187_v3, %v5860_v18  ;;  %v415_v18 = vld [vmem:[%s6710_s10] sm:$0x7]  ;;  %v2935_v51 = vld [vmem:[%s6713_s13 + $0x10] sm:$0xff] }
 0x5f5   :  { %v4312_v12 = vpack.c.bf16 %v412_v58, %v409_v55  ;;  %v2955_v49 = vld [vmem:[%s6713_s13 + $0xb0] sm:$0xff]  ;;  %v2957_v55 = vld [vmem:[%s6713_s13 + $0xc0] sm:$0xff]  ;;  %v2958_v58 = vld [vmem:[%s6713_s13 + $0xc8] sm:$0xff] }
 0x5f6   :  { %v1921_v25 = vadd.f32 %v1919_v17, %v5864_v28  ;;  %v2440_v28 = vrot.slane %v415_v18, %v6488_v45  ;;  %v4422_v34 = vpack.c.bf16 %v2956_v20, %v2955_v49  ;;  %v2939_v6 = vld [vmem:[%s6713_s13 + $0x30] sm:$0xff]  ;;  %v4426_v17 = vpack.c.bf16 %v2958_v58, %v2957_v55  ;;  %v2948_v8 = vld [vmem:[%s6713_s13 + $0x78] sm:$0xff]  ;;  %v2969_v20 = vld [vmem:[%s6713_s13 + $0x120] sm:$0xff] }
 0x5f7   :  { %4281 = vmatpush1.bf16.msra.mxu0 %v4280_v11  ;;  %4409 = vmatpush3.bf16.msra.mxu1 %v4408_v0  ;;  %v2973_v55 = vld [vmem:[%s6713_s13 + $0x140] sm:$0xff]  ;;  %v2974_v58 = vld [vmem:[%s6713_s13 + $0x148] sm:$0xff] }
 0x5f8   :  { %4283 = vmatprep.subr.bf16.mxu0 %v4282_v46  ;;  %v1923_v11 = vmax.f32 %v1921_v25, 0.0  ;;  %v2942_v25 = vld [vmem:[%s6713_s13 + $0x48] sm:$0xff] }
 0x5fb   :  { %4285 = vmatpush1.bf16.msra.mxu0 %v4284_v19 }
 0x5fc   :  { %4287 = vmatprep.subr.bf16.mxu0 %v4286_v61  ;;  %v2949_v61 = vld [vmem:[%s6713_s13 + $0x80] sm:$0xff] }
 0x5fd   :  { %v4410_v5 = vpack.c.bf16 %v2950_v9, %v2949_v61  ;;  %v2964_v61 = vld [vmem:[%s6713_s13 + $0xf8] sm:$0xff] }
 0x5ff   :  { %4289 = vmatpush1.bf16.msra.mxu0 %v4288_v7  ;;  %4411 = vmatprep.subr.bf16.mxu1 %v4410_v5  ;;  %v2432_v7 = vrot.slane %v415_v18, %v5452_v21  ;;  %v2947_v5 = vld [vmem:[%s6713_s13 + $0x70] sm:$0xff] }
 0x600   :  { %4291 = vmatprep.subr.bf16.mxu0 %v4290_v41  ;;  %v2436_v41 = vrot.slane %v415_v18, %v5443_v2  ;;  %v2961_v18 = vld [vmem:[%s6713_s13 + $0xe0] sm:$0xff] }
 0x603   :  { %4293 = vmatpush1.bf16.msra.mxu0 %v4292_v23 }
 0x604   :  { %4295 = vmatprep.subr.bf16.mxu0 %v4294_v27 }
 0x607   :  { %4297 = vmatpush1.bf16.msra.mxu0 %v4296_v22 }
 0x608   :  { %4299 = vmatprep.subr.bf16.mxu0 %v4298_v48 }
 0x609   :  { %v3322_v60 = vpop.f32.mrb[22].mxu1 }
 0x60a   :  { %v3323_v30 = vpop.f32.mrb[23].mxu1 }
 0x60b   :  { %v3324_v56 = vadd.f32 %v3323_v30, %v3322_v60  ;;  %4301 = vmatpush1.bf16.msra.mxu0 %v4300_v44  ;;  %v2952_v44 = vld [vmem:[%s6713_s13 + $0x98] sm:$0xff]  ;;  %v4416_v60 = vpack.c.bf16 %v2936_v57, %v2935_v51  ;;  %v4418_v30 = vpack.c.bf16 %v2954_v63, %v2953_v43 }
 0x60c   :  { %4303 = vmatprep.subr.bf16.mxu0 %v4302_v24  ;;  %v4414_v24 = vpack.c.bf16 %v2952_v44, %v2951_v33 }
 0x60d   :  { %v2724_v35 = vadd.f32 %v3324_v56, %v2440_v28  ;;  %v2937_v56 = vld [vmem:[%s6713_s13 + $0x20] sm:$0xff]  ;;  %v2962_v28 = vld [vmem:[%s6713_s13 + $0xe8] sm:$0xff] }
 0x60f   :  { %4305 = vmatpush1.bf16.msra.mxu0 %v4304_v14  ;;  %v2938_v14 = vld [vmem:[%s6713_s13 + $0x28] sm:$0xff] }
 0x610   :  { %4307 = vmatprep.subr.bf16.mxu0 %v4306_v59  ;;  %v4420_v59 = vpack.c.bf16 %v2938_v14, %v2937_v56 }
 0x613   :  { %4309 = vmatpush1.bf16.msra.mxu0 %v4308_v29  ;;  %v2940_v29 = vld [vmem:[%s6713_s13 + $0x38] sm:$0xff] }
 0x614   :  { %4311 = vmatprep.subr.bf16.mxu0 %v4310_v4  ;;  %v4424_v4 = vpack.c.bf16 %v2940_v29, %v2939_v6  ;;  %v2971_v29 = vld [vmem:[%s6713_s13 + $0x130] sm:$0xff] }
 0x617   :  { %4313 = vmatpush1.bf16.msra.mxu0 %v4312_v12  ;;  %v2941_v12 = vld [vmem:[%s6713_s13 + $0x40] sm:$0xff] }
 0x664   :  { %v4499_v10 = vpop.permute.xlu0 %4498 }
 0x665   :  { %v4501_v38 = vunpack.i.h.bf16 %v4499_v10  ;;  %v4500_v31 = vunpack.i.l.bf16 %v4499_v10  ;;  %v2959_v10 = vld [vmem:[%s6713_s13 + $0xd0] sm:$0xff] }
 0x667   :  { %v2423_v0 = vsel %vm499_vm2, %v4500_v31, %v4501_v38  ;;  %v2427_v46 = vsel %vm499_vm2, %v1923_v11, %v4500_v31  ;;  %v2960_v38 = vld [vmem:[%s6713_s13 + $0xd8] sm:$0xff]  ;;  %v4428_v31 = vpack.c.bf16 %v2942_v25, %v2941_v12  ;;  %v4455_v12 = vpack.c.bf16 %v2974_v58, %v2973_v55 }
 0x668   :  { %2650 = vmatprep.mubr.f32.mxu0 %v2423_v0  ;;  %2861 = vmatprep.mubr.f32.mxu1 %v2423_v0  ;;  %v4430_v11 = vpack.c.bf16 %v2960_v38, %v2959_v10  ;;  %v2943_v0 = vld [vmem:[%s6713_s13 + $0x50] sm:$0xff]  ;;  %v2976_v25 = vld [vmem:[%s6713_s13 + $0x158] sm:$0xff] }
 0x669   :  { %2651 = vmatmul.mubr.f32.vlgmr.msra.gmra.mrb[18].mxu0 %v2427_v46  ;;  %2862 = vmatmul.mubr.f32.vlgmr.msra.gmra.mrb[26].mxu1 %v2427_v46  ;;  %v2944_v46 = vld [vmem:[%s6713_s13 + $0x58] sm:$0xff] }
 0x66a   :  { %4413 = vmatpush3.bf16.msra.mxu1 %v4412_v15  ;;  %v4440_v15 = vpack.c.bf16 %v2948_v8, %v2947_v5  ;;  %v3177_v5 = vld [vmem:[%s6714_s14] ss:$0 sm:$0xff] }
 0x66b   :  { %4415 = vmatprep.subr.bf16.mxu1 %v4414_v24 }
 0x66e   :  { %4417 = vmatpush3.bf16.msra.mxu1 %v4416_v60 }
 0x66f   :  { %4419 = vmatprep.subr.bf16.mxu1 %v4418_v30 }
 0x672   :  { %4421 = vmatpush3.bf16.msra.mxu1 %v4420_v59 }
 0x673   :  { %4423 = vmatprep.subr.bf16.mxu1 %v4422_v34  ;;  %v2970_v34 = vld [vmem:[%s6713_s13 + $0x128] sm:$0xff] }
 0x674   :  { %v4449_v6 = vpack.c.bf16 %v2970_v34, %v2969_v20 }
 0x676   :  { %4425 = vmatpush3.bf16.msra.mxu1 %v4424_v4 }
 0x677   :  { %4427 = vmatprep.subr.bf16.mxu1 %v4426_v17  ;;  %v2975_v17 = vld [vmem:[%s6713_s13 + $0x150] sm:$0xff] }
 0x678   :  { %v4458_v38 = vpack.c.bf16 %v2976_v25, %v2975_v17 }
 0x67a   :  { %4429 = vmatpush3.bf16.msra.mxu1 %v4428_v31  ;;  %v2977_v31 = vld [vmem:[%s6713_s13 + $0x160] sm:$0xff] }
 0x67b   :  { %4431 = vmatprep.subr.bf16.mxu1 %v4430_v11  ;;  %v2978_v11 = vld [vmem:[%s6713_s13 + $0x168] sm:$0xff] }
 0x6ad   :  { %v3357_v3 = vpop.f32.mrb[24].mxu1 }
 0x6ae   :  { %v3358_v53 = vpop.f32.mrb[25].mxu1 }
 0x6af   :  { %v3359_v42 = vadd.f32 %v3358_v53, %v3357_v3  ;;  %v4432_v3 = vpack.c.bf16 %v2944_v46, %v2943_v0  ;;  %v4434_v53 = vpack.c.bf16 %v2962_v28, %v2961_v18  ;;  %v4461_v18 = vpack.c.bf16 %v2978_v11, %v2977_v31  ;;  %v2980_v28 = vld [vmem:[%s6713_s13 + $0x178] sm:$0xff] }
 0x6b1   :  { %v2794_v19 = vadd.f32 %v3359_v42, %v2724_v35  ;;  %v2945_v35 = vld [vmem:[%s6713_s13 + $0x60] sm:$0xff]  ;;  %v2946_v42 = vld [vmem:[%s6713_s13 + $0x68] sm:$0xff]  ;;  %4433 = vmatpush3.bf16.msra.mxu1 %v4432_v3 }
 0x6b2   :  { %v4436_v9 = vpack.c.bf16 %v2946_v42, %v2945_v35  ;;  %4435 = vmatprep.subr.bf16.mxu1 %v4434_v53 }
 0x6b5   :  { %4437 = vmatpush3.bf16.msra.mxu1 %v4436_v9 }
 0x73c   :  { %v2652_v13 = vpop.f32.mrb[18].mxu0  ;;  %v3392_v16 = vpop.f32.mrb[26].mxu1 }
 0x73d   :  { %v6508_v39 = vadd.f32 %v2652_v13, %v2432_v7  ;;  %v2654_v52 = vpop.f32.mrb[19].mxu0  ;;  %v3393_v23 = vpop.f32.mrb[27].mxu1 }
 0x73e   :  { %v6510_v27 = vadd.f32 %v2654_v52, %v2436_v41  ;;  %v3394_v36 = vadd.f32 %v3393_v23, %v3392_v16 }
 0x73f   :  { %v2873_v62 = vmul.f32 %v6508_v39, %v6508_v39 }
 0x740   :  { %v2874_v32 = vmul.f32 %v6510_v27, %v6510_v27  ;;  %v6516_v40 = vadd.f32 %v3394_v36, %v2794_v19  ;;  %v2867_v22 = vadd.f32 %v6510_v27, %v6508_v39  ;;  %v2963_v19 = vld [vmem:[%s6713_s13 + $0xf0] sm:$0xff] }
 0x741   :  { %v4438_v54 = vpack.c.bf16 %v2964_v61, %v2963_v19 }
 0x742   :  { %v2868_v48 = vadd.f32 %v2867_v22, %v6516_v40  ;;  %v2875_v1 = vmul.f32 %v6516_v40, %v6516_v40  ;;  %v2876_v26 = vadd.f32 %v2874_v32, %v2873_v62  ;;  %v416_v32 = vld [vmem:[%s6711_s11] sm:$0x7] }
 0x743   :  { %4439 = vmatprep.subr.bf16.mxu1 %v4438_v54  ;;  %v6614_v22 = vld [vmem:[%s6712_s12] sm:$0x7]  ;;  %v2904_v46 = vrot.slane %v416_v32, %v6488_v45 }
 0x744   :  { %2869 = vadd.xlane.f32.xlu0 %v2868_v48  ;;  %v2877_v50 = vadd.f32 %v2876_v26, %v2875_v1  ;;  %4441 = vmatpush3.bf16.msra.mxu1 %v4440_v15  ;;  %v2900_v26 = vrot.slane %v416_v32, %v5443_v2  ;;  %v2919_v24 = vrot.slane %v6614_v22, %v5443_v2  ;;  %v2967_v2 = vld [vmem:[%s6713_s13 + $0x110] sm:$0xff] }
 0x745   :  { %4442 = vmatprep.subr.bf16.mxu1 %v6721_v47  ;;  %v2915_v57 = vrot.slane %v6614_v22, %v5452_v21  ;;  %v2923_v53 = vrot.slane %v6614_v22, %v6488_v45 }
 0x746   :  { %2878 = vadd.xlane.f32.xlu1 %v2877_v50  ;;  %v2896_v50 = vrot.slane %v416_v32, %v5452_v21  ;;  %v2968_v21 = vld [vmem:[%s6713_s13 + $0x118] sm:$0xff] }
 0x747   :  { %v4446_v49 = vpack.c.bf16 %v2968_v21, %v2967_v2 }
 0x7d1   :  { %v2870_v7 = vpop.xlane.xlu0 %2869 }
 0x7d2   :  { %v2872_v41 = vmul.f32 0.0026041667, %v2870_v7 }
 0x7d3   :  { %v2879_v13 = vpop.xlane.xlu1 %2878 }
 0x7d4   :  { %v2880_v16 = vmul.f32 0.0026041667, %v2879_v13  ;;  %v2881_v52 = vmul.f32 %v2872_v41, %v2872_v41  ;;  %v2884_v48 = vsub.f32 %v6508_v39, %v2872_v41  ;;  %v2885_v1 = vsub.f32 %v6510_v27, %v2872_v41  ;;  %v2965_v39 = vld [vmem:[%s6713_s13 + $0x100] sm:$0xff]  ;;  %v2966_v27 = vld [vmem:[%s6713_s13 + $0x108] sm:$0xff] }
 0x7d5   :  { %v4443_v59 = vpack.c.bf16 %v2966_v27, %v2965_v39  ;;  %v2886_v10 = vsub.f32 %v6516_v40, %v2872_v41  ;;  %v2979_v40 = vld [vmem:[%s6713_s13 + $0x170] sm:$0xff] }
 0x7d6   :  { %v2882_v23 = vsub.f32 %v2880_v16, %v2881_v52  ;;  %v4464_v35 = vpack.c.bf16 %v2980_v28, %v2979_v40 }
 0x7d8   :  { %v2883_v36 = vmax.f32 %v2882_v23, 0.0 }
 0x7da   :  { %v2887_v62 = vadd.f32 1e-06, %v2883_v36 }
 0x7dc   :  { %4542 = vrsqrt.f32 %v2887_v62 }
 0x7e6   :  { %v4543_v33 = vpop.eup %4542 }
 0x7e7   :  { %v2890_v44 = vmul.f32 %v4543_v33, %v2885_v1  ;;  %v2889_v51 = vmul.f32 %v4543_v33, %v2884_v48  ;;  %v2891_v0 = vmul.f32 %v4543_v33, %v2886_v10 }
 0x7e9   :  { %v2909_v60 = vmul.f32 %v2900_v26, %v2890_v44  ;;  %v2908_v43 = vmul.f32 %v2896_v50, %v2889_v51  ;;  %v2910_v3 = vmul.f32 %v2904_v46, %v2891_v0 }
 0x7eb   :  { %v2928_v63 = vadd.f32 %v2919_v24, %v2909_v60  ;;  %v2927_v30 = vadd.f32 %v2915_v57, %v2908_v43  ;;  %v2929_v42 = vadd.f32 %v2923_v53, %v2910_v3 }
 0x7ed   :  { %v2931_v56 = vmax.f32 %v2928_v63, 0.0  ;;  %v2930_v14 = vmax.f32 %v2927_v30, 0.0  ;;  %v2932_v19 = vmax.f32 %v2929_v42, 0.0 }
 0x7ef   :  { %3052 = vmatprep.mubr.f32.mxu1 %v2931_v56 }
 0x7f0   :  { %3053 = vmatmul.mubr.f32.vlgmr.msra.gmra.mrb[28].mxu1 %v2930_v14 }
 0x7f1   :  { %4444 = vmatpush3.bf16.msra.mxu1 %v4443_v59  ;;  %3719 = vmatprep.mubr.msk.f32.mxu1 %vm4572_vm0, %v6720_v37  ;;  %v2972_v37 = vld [vmem:[%s6713_s13 + $0x138] sm:$0xff]  ;;  %s4575_s13 = smov [#allocation2]  }
 0x7f2   :  { %4445 = vmatprep.subr.bf16.mxu1 %v6721_v47  ;;  %v4452_v4 = vpack.c.bf16 %v2972_v37, %v2971_v29  ;;  %s3135_s24 = sshll.u32 %s4575_s13, 4  ;;  %s3136_s24 = int_to_ptr.vmem [resolvable:$true] %s3135_s24 }
 0x7f3   :  { %s4547_s25 = scalar_lea.vmem %s3136_s24, 128  ;;  %p4552_p1 = scmp.lt.s32.totalorder %s3136_s24, %s3136_s24 }
 0x7f4   :  { %p4548_p0 = scmp.ne.s32.totalorder %s3136_s24, %s4547_s25  ;;  %p4553_p2 = scmp.lt.s32.totalorder %s4547_s25, %s4547_s25 }
 0x7f5   :  { %4447 = vmatpush3.bf16.msra.mxu1 %v4446_v49 }
 0x7f6   :  { %4448 = vmatprep.subr.bf16.mxu1 %v6721_v47  ;;  %p4554_p3 = por %p4553_p2, %p4552_p1 }
 0x7f8   :  { %p4555_p4 = pnand %p4554_p3, %p4548_p0 }
 0x7f9   :  { %4450 = vmatpush3.bf16.msra.mxu1 %v4449_v6 }
 0x7fa   :  { %4451 = vmatprep.subr.bf16.mxu1 %v6721_v47 }
 0x7fd   :  { %4453 = vmatpush3.bf16.msra.mxu1 %v4452_v4 }
 0x7fe   :  { %4454 = vmatprep.subr.bf16.mxu1 %v6721_v47 }
 0x801   :  { %4456 = vmatpush3.bf16.msra.mxu1 %v4455_v12 }
 0x802   :  { %4457 = vmatprep.subr.bf16.mxu1 %v6721_v47 }
 0x805   :  { %4459 = vmatpush3.bf16.msra.mxu1 %v4458_v38 }
 0x806   :  { %4460 = vmatprep.subr.bf16.mxu1 %v6721_v47 }
 0x809   :  { %4462 = vmatpush3.bf16.msra.mxu1 %v4461_v18 }
 0x80a   :  { %4463 = vmatprep.subr.bf16.mxu1 %v6721_v47 }
 0x80d   :  { %4465 = vmatpush3.bf16.msra.mxu1 %v4464_v35 }
 0x810   :  { %3720 = vmatmul.mubr.f32.vlgmr.msra.gmra.mrb[30].mxu1 %v2932_v19 }
 0x8c3   :  { %v3427_v61 = vpop.f32.mrb[28].mxu1 }
 0x8c4   :  { %v3428_v9 = vpop.f32.mrb[29].mxu1 }
 0x8c5   :  { %v3429_v54 = vadd.f32 %v3428_v9, %v3427_v61 }
 0x8c7   :  { %v3055_v8 = vadd.f32 %v3429_v54, %v3177_v5 }
 0x8e3   :  { %v3124_v15 = vpop.f32.mrb[30].mxu1 }
 0x8e4   :  { %v3125_v45 = vadd.f32 %v3124_v15, %v3055_v8  ;;  %v3721_v7 = vpop.f32.mrb[31].mxu1 }
 0x8e6   :  { %3128 = vst [vmem:[#allocation2] sm:$0xff] %v3125_v45 }
 0x8e7   :  { %4558 = shalt.err (!%p4555_p4)
}
 0x8e8   :  { %s4559_s9 = scalar_lea.hbm %s6715_s15, 128 }
 0x8e9   :  { %p4560_p5 = scmp.ne.s32.totalorder %s6715_s15, %s4559_s9  ;;  %p4563_p6 = scmp.lt.u32.totalorder %s4559_s9, %s6715_s15 }
 0x8eb   :  { %p4565_p7 = pnand %p4563_p6, %p4560_p5 }
 0x8ed   :  { %4568 = shalt.err (!%p4565_p7)
}
 0x8ee   :  { %3138 = dma.vmem_to_hbm [thread:$0]  %s3136_s24, 128, %s6715_s15, [#allocation3]  }
 0x8ef   :  { %4569 = dma.done.wait [#allocation3], 128  }
 0x8f0   :  { %4570 = vsyncadd [#allocation3], 4294967168 }
 0x8f1   :  { %3142 = vsyncpa [#allocation3], 1 }

</bundles_post_ra>
